<compile_context>
chip_gen: v6e
topology: v6e:2x2x1
jax: 0.10.0
libtpu: 0.0.40
codegen_flags: <defaults>
</compile_context>

<pallas_src>
import jax
import jax.numpy as jnp
from jax.experimental import pallas as pl
from jax.experimental.pallas import tpu as pltpu


# ----------------------------------------------------------------------------
# Tiling / compiler-parameter helpers
# ----------------------------------------------------------------------------

_VMEM_LIMIT_BYTES = 48 * 1024 * 1024   # safe on v5e/v6e (128 MiB) and v7x (64 MiB)
_TILE_BUDGET_BYTES = 8 * 1024 * 1024   # per-step working set incl. double buffers
_MAX_TILE_ROWS = 2048


def _compiler_params():
    return pltpu.CompilerParams(
        dimension_semantics=("parallel", "parallel"),
        vmem_limit_bytes=_VMEM_LIMIT_BYTES,
    )


def _tile_rows(S, bytes_per_row):
    """Largest multiple of 8 that divides S, fits the VMEM budget, and is capped."""
    if S <= 8:
        return S
    cap = min(S, _MAX_TILE_ROWS, max(8, _TILE_BUDGET_BYTES // max(bytes_per_row, 1)))
    ts = (cap // 8) * 8
    while ts >= 8:
        if S % ts == 0:
            return ts
        ts -= 8
    return S  # fall back to the full (allowed) dimension


# ----------------------------------------------------------------------------
# Pallas kernels
# ----------------------------------------------------------------------------

def _conv_bn_relu_kernel(p_ref, w_ref, scale_ref, shift_ref, o_ref):
    # p_ref: (TS, 9*Cin) bf16 im2col patches; w_ref: (9*Cin, Cout) bf16
    # scale/shift: (1, Cout) f32 folded BatchNorm (+ conv bias); o_ref: (TS, Cout)
    acc = jnp.dot(p_ref[...], w_ref[...], preferred_element_type=jnp.float32)
    acc = jnp.maximum(acc * scale_ref[...] + shift_ref[...], 0.0)
    o_ref[...] = acc.astype(o_ref.dtype)


def _conv_bn_relu_head_kernel(p_ref, w_ref, scale_ref, shift_ref,
                              wf_ref, bf_ref, o_ref):
    # conv5 (3x3 + BN + ReLU) fused with the final 1x1 classifier.
    # wf_ref: (Cout5, Cpad) bf16 (zero-padded to 128 lanes); bf_ref: (1, Cpad) f32
    acc = jnp.dot(p_ref[...], w_ref[...], preferred_element_type=jnp.float32)
    acc = jnp.maximum(acc * scale_ref[...] + shift_ref[...], 0.0)
    logits = jnp.dot(acc.astype(wf_ref.dtype), wf_ref[...],
                     preferred_element_type=jnp.float32)
    o_ref[...] = (logits + bf_ref[...]).astype(o_ref.dtype)


def _maxpool_kernel(x_ref, o_ref):
    # x_ref: (4, TS, C) the four 2x2-window taps; o_ref: (TS, C)
    # elementwise max kept in f32 (v5e VPU has no bf16).
    a = jnp.maximum(x_ref[0].astype(jnp.float32), x_ref[1].astype(jnp.float32))
    b = jnp.maximum(x_ref[2].astype(jnp.float32), x_ref[3].astype(jnp.float32))
    o_ref[...] = jnp.maximum(a, b).astype(o_ref.dtype)


def _upconv_bn_add_kernel(x_ref, skip_ref, w_ref, scale_ref, shift_ref, o_ref):
    # ConvTranspose2d(k=2, s=2) as ONE lane-dense dot:
    # x_ref: (TS, Cin) bf16; w_ref: (Cin, 4*Cout) bf16 (tap-major, channel-minor)
    # skip_ref/o_ref: (TS, 4*Cout); scale/shift: (1, 4*Cout) f32
    y = jnp.dot(x_ref[...], w_ref[...], preferred_element_type=jnp.float32)
    y = y * scale_ref[...] + shift_ref[...] + skip_ref[...].astype(jnp.float32)
    o_ref[...] = y.astype(o_ref.dtype)


# ----------------------------------------------------------------------------
# Layout plumbing + pallas_call wrappers
# ----------------------------------------------------------------------------

def _im2col3x3(x):
    # (N, H, W, C) -> (N, H*W, 9*C), tap-major / channel-minor along the last axis.
    N, H, W, C = x.shape
    xp = jnp.pad(x, ((0, 0), (1, 1), (1, 1), (0, 0)))
    cols = [xp[:, dy:dy + H, dx:dx + W, :] for dy in range(3) for dx in range(3)]
    return jnp.concatenate(cols, axis=-1).reshape(N, H * W, 9 * C)


def conv3x3_bn_relu(x, w, scale, shift):
    # x: (N, H, W, Cin) bf16; w: (3, 3, Cin, Cout) f32 -> (N, H, W, Cout) bf16
    N, H, W, Cin = x.shape
    Cout = w.shape[-1]
    S, K = H * W, 9 * Cin
    patches = _im2col3x3(x)                                   # (N, S, K) bf16
    wk = w.reshape(K, Cout).astype(jnp.bfloat16)
    ts = _tile_rows(S, 2 * (K * 2 + Cout * 2))
    cost = pl.CostEstimate(
        flops=2 * N * S * K * Cout, transcendentals=0,
        bytes_accessed=2 * (N * S * K + K * Cout + N * S * Cout) + 8 * Cout)
    y = pl.pallas_call(
        _conv_bn_relu_kernel,
        out_shape=jax.ShapeDtypeStruct((N, S, Cout), jnp.bfloat16),
        grid=(N, S // ts),
        in_specs=[
            pl.BlockSpec((None, ts, K), lambda n, s: (n, s, 0)),
            pl.BlockSpec((K, Cout), lambda n, s: (0, 0)),
            pl.BlockSpec((1, Cout), lambda n, s: (0, 0)),
            pl.BlockSpec((1, Cout), lambda n, s: (0, 0)),
        ],
        out_specs=pl.BlockSpec((None, ts, Cout), lambda n, s: (n, s, 0)),
        compiler_params=_compiler_params(),
        cost_estimate=cost,
    )(patches, wk, scale.reshape(1, Cout), shift.reshape(1, Cout))
    return y.reshape(N, H, W, Cout)


def conv3x3_bn_relu_final(x, w, scale, shift, wf, bf, num_classes):
    # conv5 (3x3+BN+ReLU) fused with final 1x1 conv; output padded to 128 lanes.
    N, H, W, Cin = x.shape
    Cout = w.shape[-1]
    S, K = H * W, 9 * Cin
    cpad = ((num_classes + 127) // 128) * 128
    patches = _im2col3x3(x)
    wk = w.reshape(K, Cout).astype(jnp.bfloat16)
    wf_p = jnp.zeros((Cout, cpad), jnp.float32)
    wf_p = wf_p.at[:, :num_classes].set(wf.reshape(Cout, num_classes)).astype(jnp.bfloat16)
    bf_p = jnp.zeros((1, cpad), jnp.float32).at[:, :num_classes].set(bf.reshape(1, num_classes))
    ts = _tile_rows(S, 2 * (K * 2 + cpad * 4))
    cost = pl.CostEstimate(
        flops=2 * N * S * (K * Cout + Cout * cpad), transcendentals=0,
        bytes_accessed=2 * N * S * K + 2 * (K * Cout + Cout * cpad) + 4 * N * S * cpad)
    y = pl.pallas_call(
        _conv_bn_relu_head_kernel,
        out_shape=jax.ShapeDtypeStruct((N, S, cpad), jnp.float32),
        grid=(N, S // ts),
        in_specs=[
            pl.BlockSpec((None, ts, K), lambda n, s: (n, s, 0)),
            pl.BlockSpec((K, Cout), lambda n, s: (0, 0)),
            pl.BlockSpec((1, Cout), lambda n, s: (0, 0)),
            pl.BlockSpec((1, Cout), lambda n, s: (0, 0)),
            pl.BlockSpec((Cout, cpad), lambda n, s: (0, 0)),
            pl.BlockSpec((1, cpad), lambda n, s: (0, 0)),
        ],
        out_specs=pl.BlockSpec((None, ts, cpad), lambda n, s: (n, s, 0)),
        compiler_params=_compiler_params(),
        cost_estimate=cost,
    )(patches, wk, scale.reshape(1, Cout), shift.reshape(1, Cout), wf_p, bf_p)
    return y.reshape(N, H, W, cpad)[..., :num_classes]


def maxpool2x2(x):
    # x: (N, H, W, C) bf16 -> (N, H//2, W//2, C) bf16
    N, H, W, C = x.shape
    Ho, Wo = H // 2, W // 2
    S = Ho * Wo
    xs = (x.reshape(N, Ho, 2, Wo, 2, C)
            .transpose(0, 2, 4, 1, 3, 5)
            .reshape(N, 4, S, C))                             # tap = dy*2 + dx
    ts = _tile_rows(S, 2 * 5 * C * 2)
    y = pl.pallas_call(
        _maxpool_kernel,
        out_shape=jax.ShapeDtypeStruct((N, S, C), x.dtype),
        grid=(N, S // ts),
        in_specs=[pl.BlockSpec((None, 4, ts, C), lambda n, s: (n, 0, s, 0))],
        out_specs=pl.BlockSpec((None, ts, C), lambda n, s: (n, s, 0)),
        compiler_params=_compiler_params(),
        cost_estimate=pl.CostEstimate(flops=3 * N * S * C, transcendentals=0,
                                      bytes_accessed=2 * 5 * N * S * C),
    )(xs)
    return y.reshape(N, Ho, Wo, C)


def upconv2x2_bn_add(x, skip, w, scale, shift):
    # ConvTranspose2d(Cin->Cout, k=2, s=2) + BatchNorm + skip-add, fused.
    # x: (N, H, W, Cin) bf16; skip: (N, 2H, 2W, Cout) bf16; w: (2, 2, Cin, Cout) f32
    N, H, W, Cin = x.shape
    Cout = w.shape[-1]
    S = H * W
    C4 = 4 * Cout
    skip_p = (skip.reshape(N, H, 2, W, 2, Cout)
                  .transpose(0, 1, 3, 2, 4, 5)
                  .reshape(N, S, C4))                         # tap-major channel-minor
    wk = jnp.transpose(w, (2, 0, 1, 3)).reshape(Cin, C4).astype(jnp.bfloat16)
    scale4 = jnp.tile(scale, 4).reshape(1, C4)
    shift4 = jnp.tile(shift, 4).reshape(1, C4)
    ts = _tile_rows(S, 2 * (Cin * 2 + 2 * C4 * 2))
    cost = pl.CostEstimate(
        flops=2 * N * S * Cin * C4, transcendentals=0,
        bytes_accessed=2 * (N * S * Cin + 2 * N * S * C4 + Cin * C4))
    y = pl.pallas_call(
        _upconv_bn_add_kernel,
        out_shape=jax.ShapeDtypeStruct((N, S, C4), jnp.bfloat16),
        grid=(N, S // ts),
        in_specs=[
            pl.BlockSpec((None, ts, Cin), lambda n, s: (n, s, 0)),
            pl.BlockSpec((None, ts, C4), lambda n, s: (n, s, 0)),
            pl.BlockSpec((Cin, C4), lambda n, s: (0, 0)),
            pl.BlockSpec((1, C4), lambda n, s: (0, 0)),
            pl.BlockSpec((1, C4), lambda n, s: (0, 0)),
        ],
        out_specs=pl.BlockSpec((None, ts, C4), lambda n, s: (n, s, 0)),
        compiler_params=_compiler_params(),
        cost_estimate=cost,
    )(x.reshape(N, S, Cin), skip_p, wk, scale4, shift4)
    # depth-to-space back to (N, 2H, 2W, Cout)
    return (y.reshape(N, H, W, 2, 2, Cout)
              .transpose(0, 1, 3, 2, 4, 5)
              .reshape(N, 2 * H, 2 * W, Cout))


# ----------------------------------------------------------------------------
# Parameters (deterministic, shapes from the PyTorch module)
# ----------------------------------------------------------------------------

_BN_EPS = 1e-5


def _bn_fold(gamma, beta, mean, var, conv_bias):
    scale = gamma * jax.lax.rsqrt(var + _BN_EPS)
    shift = beta + (conv_bias - mean) * scale
    return scale, shift


def init_params(key, num_classes=21):
    ks = list(jax.random.split(key, 12))
    kit = iter(ks)

    def kaiming_conv(k, kh, kw, cin, cout):
        # kaiming_normal, mode='fan_out', relu gain
        fan_out = cout * kh * kw
        std = (2.0 / fan_out) ** 0.5
        return std * jax.random.normal(k, (kh, kw, cin, cout), jnp.float32)

    def default_tconv(kw_key, kb_key, cin, cout, ksz):
        # PyTorch default (kaiming-uniform-ish) -- deterministic synthetic stand-in
        fan_in = cin * ksz * ksz
        bound = 1.0 / (fan_in ** 0.5)
        w = jax.random.uniform(kw_key, (ksz, ksz, cin, cout), jnp.float32, -bound, bound)
        b = jax.random.uniform(kb_key, (cout,), jnp.float32, -bound, bound)
        return w, b

    def bn_identity(c):
        # eval-mode fresh BN: gamma=1, beta=0, running_mean=0, running_var=1
        return (jnp.ones((c,), jnp.float32), jnp.zeros((c,), jnp.float32),
                jnp.zeros((c,), jnp.float32), jnp.ones((c,), jnp.float32))

    p = {}

    def conv_block(name, k, cin, cout):
        w = kaiming_conv(k, 3, 3, cin, cout)
        b = jnp.zeros((cout,), jnp.float32)  # conv bias init = 0
        s, sh = _bn_fold(*bn_identity(cout), b)
        p[f"w{name}"], p[f"s{name}"], p[f"h{name}"] = w, s, sh

    conv_block("1", next(kit), 3, 32)
    conv_block("2", next(kit), 32, 64)
    conv_block("3", next(kit), 64, 128)
    conv_block("4", next(kit), 64, 64)
    conv_block("5", next(kit), 32, 32)

    wu1, bu1 = default_tconv(next(kit), next(kit), 128, 64, 2)
    su1, hu1 = _bn_fold(*bn_identity(64), bu1)
    p["wu1"], p["su1"], p["hu1"] = wu1, su1, hu1

    wu2, bu2 = default_tconv(next(kit), next(kit), 64, 32, 2)
    su2, hu2 = _bn_fold(*bn_identity(32), bu2)
    p["wu2"], p["su2"], p["hu2"] = wu2, su2, hu2

    p["wf"] = kaiming_conv(next(kit), 1, 1, 32, num_classes)
    p["bf"] = jnp.zeros((num_classes,), jnp.float32)
    return p


# ----------------------------------------------------------------------------
# Forward pass (mirrors CompactSegmentationModel.forward, NCHW in / NCHW out)
# ----------------------------------------------------------------------------

@jax.jit
def compact_segmentation_forward(params, x_nchw):
    p = params
    num_classes = p["wf"].shape[-1]
    x = jnp.transpose(x_nchw, (0, 2, 3, 1)).astype(jnp.bfloat16)   # -> NHWC, bf16

    x1 = conv3x3_bn_relu(x, p["w1"], p["s1"], p["h1"])                 # (N, H,   W,   32)
    x2 = conv3x3_bn_relu(maxpool2x2(x1), p["w2"], p["s2"], p["h2"])    # (N, H/2, W/2, 64)
    x3 = conv3x3_bn_relu(maxpool2x2(x2), p["w3"], p["s3"], p["h3"])    # (N, H/4, W/4, 128)

    y = upconv2x2_bn_add(x3, x2, p["wu1"], p["su1"], p["hu1"])         # upconv1 + bn_up1 + x2
    y = conv3x3_bn_relu(y, p["w4"], p["s4"], p["h4"])                  # conv4
    y = upconv2x2_bn_add(y, x1, p["wu2"], p["su2"], p["hu2"])          # upconv2 + bn_up2 + x1
    y = conv3x3_bn_relu_final(y, p["w5"], p["s5"], p["h5"],            # conv5 + final_conv
                              p["wf"], p["bf"], num_classes)

    return jnp.transpose(y, (0, 3, 1, 2)).astype(jnp.float32)          # -> NCHW, f32


if __name__ == "__main__":
    key = jax.random.PRNGKey(0)
    k_param, k_input = jax.random.split(key)

    num_classes = 21
    params = init_params(k_param, num_classes=num_classes)
    x = jax.random.normal(k_input, (2, 3, 16, 16), jnp.float32)   # NCHW like PyTorch

    out = compact_segmentation_forward(params, x)
    out = jax.block_until_ready(out)

    assert out.shape == (2, num_classes, 16, 16), out.shape
    assert bool(jnp.all(jnp.isfinite(out)))
    print("KERNEL_OK")
</pallas_src>

<mosaic_0001>
module attributes {stable_mosaic.version = 11 : i64} {
  func.func @_conv_bn_relu_kernel(%arg0: i32, %arg1: i32, %arg2: memref<1x256x27xbf16, #tpu.memory_space<vmem>>, %arg3: memref<27x32xbf16, #tpu.memory_space<vmem>>, %arg4: memref<1x32xf32, #tpu.memory_space<vmem>>, %arg5: memref<1x32xf32, #tpu.memory_space<vmem>>, %arg6: memref<1x256x32xbf16, #tpu.memory_space<vmem>>) attributes {dimension_semantics = [#tpu.dimension_semantics<parallel>, #tpu.dimension_semantics<parallel>], iteration_bounds = array<i64: 2, 1>, scalar_prefetch = 0 : i64, scratch_operands = 0 : i64, tpu.core_type = #tpu.core_type<tc>, window_params = [{transform_indices = @transform_0, window_bounds = array<i64: 1, 256, 27>}, {pipeline_mode = #tpu.pipeline_mode<synchronous>, transform_indices = @transform_1, window_bounds = array<i64: 27, 32>}, {pipeline_mode = #tpu.pipeline_mode<synchronous>, transform_indices = @transform_2, window_bounds = array<i64: 1, 32>}, {pipeline_mode = #tpu.pipeline_mode<synchronous>, transform_indices = @transform_3, window_bounds = array<i64: 1, 32>}, {transform_indices = @transform_4, window_bounds = array<i64: 1, 256, 32>}]} {
    %c0 = arith.constant 0 : index
    %c0_0 = arith.constant 0 : index
    %c0_1 = arith.constant 0 : index
    %0 = vector.load %arg2[%c0, %c0_0, %c0_1] : memref<1x256x27xbf16, #tpu.memory_space<vmem>>, vector<1x256x27xbf16>
    %1 = vector.shape_cast %0 : vector<1x256x27xbf16> to vector<256x27xbf16>
    %c0_2 = arith.constant 0 : index
    %c0_3 = arith.constant 0 : index
    %2 = vector.load %arg3[%c0_2, %c0_3] : memref<27x32xbf16, #tpu.memory_space<vmem>>, vector<27x32xbf16>
    %cst = arith.constant dense<0.000000e+00> : vector<256x32xf32>
    %3 = tpu.matmul %1, %2, %cst {dimension_numbers = #tpu.dot_dimension_numbers<[1], [0], [0], [1], [0, 0, 1, 1], [], []>} : vector<256x27xbf16>, vector<27x32xbf16>, vector<256x32xf32> -> vector<256x32xf32>
    %c0_4 = arith.constant 0 : index
    %c0_5 = arith.constant 0 : index
    %4 = vector.load %arg4[%c0_4, %c0_5] : memref<1x32xf32, #tpu.memory_space<vmem>>, vector<1x32xf32>
    %5 = vector.broadcast %4 : vector<1x32xf32> to vector<256x32xf32>
    %6 = arith.mulf %3, %5 : vector<256x32xf32>
    %c0_6 = arith.constant 0 : index
    %c0_7 = arith.constant 0 : index
    %7 = vector.load %arg5[%c0_6, %c0_7] : memref<1x32xf32, #tpu.memory_space<vmem>>, vector<1x32xf32>
    %8 = vector.broadcast %7 : vector<1x32xf32> to vector<256x32xf32>
    %9 = arith.addf %6, %8 : vector<256x32xf32>
    %cst_8 = arith.constant 0.000000e+00 : f32
    %10 = vector.broadcast %cst_8 : f32 to vector<256x32xf32>
    %11 = arith.maximumf %9, %10 : vector<256x32xf32>
    %12 = arith.truncf %11 : vector<256x32xf32> to vector<256x32xbf16>
    %c0_9 = arith.constant 0 : index
    %c0_10 = arith.constant 0 : index
    %c0_11 = arith.constant 0 : index
    %13 = vector.load %arg6[%c0_9, %c0_10, %c0_11] : memref<1x256x32xbf16, #tpu.memory_space<vmem>>, vector<1x256x32xbf16>
    %14 = vector.shape_cast %13 : vector<1x256x32xbf16> to vector<256x32xbf16>
    %15 = vector.shape_cast %12 : vector<256x32xbf16> to vector<1x256x32xbf16>
    tpu.vector_store %arg6[%c0_9, %c0_10, %c0_11], %15 {strides = array<i32>} : memref<1x256x32xbf16, #tpu.memory_space<vmem>>, vector<1x256x32xbf16>,
    return
  }
  func.func @transform_0(%arg0: i32, %arg1: i32) -> (i32, i32, i32) {
    %c0_i32 = arith.constant 0 : i32
    %c0_i32_0 = arith.constant 0 : i32
    return %arg0, %arg1, %c0_i32 : i32, i32, i32
  }
  func.func @transform_1(%arg0: i32, %arg1: i32) -> (i32, i32) {
    %c0_i32 = arith.constant 0 : i32
    %c0_i32_0 = arith.constant 0 : i32
    %c0_i32_1 = arith.constant 0 : i32
    return %c0_i32, %c0_i32_0 : i32, i32
  }
  func.func @transform_2(%arg0: i32, %arg1: i32) -> (i32, i32) {
    %c0_i32 = arith.constant 0 : i32
    %c0_i32_0 = arith.constant 0 : i32
    %c0_i32_1 = arith.constant 0 : i32
    return %c0_i32, %c0_i32_0 : i32, i32
  }
  func.func @transform_3(%arg0: i32, %arg1: i32) -> (i32, i32) {
    %c0_i32 = arith.constant 0 : i32
    %c0_i32_0 = arith.constant 0 : i32
    %c0_i32_1 = arith.constant 0 : i32
    return %c0_i32, %c0_i32_0 : i32, i32
  }
  func.func @transform_4(%arg0: i32, %arg1: i32) -> (i32, i32, i32) {
    %c0_i32 = arith.constant 0 : i32
    %c0_i32_0 = arith.constant 0 : i32
    return %arg0, %arg1, %c0_i32 : i32, i32, i32
  }
}

module attributes {stable_mosaic.version = 11 : i64} {
  func.func @_maxpool_kernel(%arg0: i32, %arg1: i32, %arg2: memref<1x4x64x32xbf16, #tpu.memory_space<vmem>>, %arg3: memref<1x64x32xbf16, #tpu.memory_space<vmem>>) attributes {dimension_semantics = [#tpu.dimension_semantics<parallel>, #tpu.dimension_semantics<parallel>], iteration_bounds = array<i64: 2, 1>, scalar_prefetch = 0 : i64, scratch_operands = 0 : i64, tpu.core_type = #tpu.core_type<tc>, window_params = [{transform_indices = @transform_0, window_bounds = array<i64: 1, 4, 64, 32>}, {transform_indices = @transform_1, window_bounds = array<i64: 1, 64, 32>}]} {
    %c0 = arith.constant 0 : index
    %c0_0 = arith.constant 0 : index
    %c0_1 = arith.constant 0 : index
    %c0_2 = arith.constant 0 : index
    %0 = vector.load %arg2[%c0, %c0_0, %c0_1, %c0_2] : memref<1x4x64x32xbf16, #tpu.memory_space<vmem>>, vector<1x1x64x32xbf16>
    %1 = vector.shape_cast %0 : vector<1x1x64x32xbf16> to vector<64x32xbf16>
    %2 = arith.extf %1 : vector<64x32xbf16> to vector<64x32xf32>
    %c0_3 = arith.constant 0 : index
    %c1 = arith.constant 1 : index
    %c0_4 = arith.constant 0 : index
    %c0_5 = arith.constant 0 : index
    %3 = vector.load %arg2[%c0_3, %c1, %c0_4, %c0_5] : memref<1x4x64x32xbf16, #tpu.memory_space<vmem>>, vector<1x1x64x32xbf16>
    %4 = vector.shape_cast %3 : vector<1x1x64x32xbf16> to vector<64x32xbf16>
    %5 = arith.extf %4 : vector<64x32xbf16> to vector<64x32xf32>
    %6 = arith.maximumf %2, %5 : vector<64x32xf32>
    %c0_6 = arith.constant 0 : index
    %c2 = arith.constant 2 : index
    %c0_7 = arith.constant 0 : index
    %c0_8 = arith.constant 0 : index
    %7 = vector.load %arg2[%c0_6, %c2, %c0_7, %c0_8] : memref<1x4x64x32xbf16, #tpu.memory_space<vmem>>, vector<1x1x64x32xbf16>
    %8 = vector.shape_cast %7 : vector<1x1x64x32xbf16> to vector<64x32xbf16>
    %9 = arith.extf %8 : vector<64x32xbf16> to vector<64x32xf32>
    %c0_9 = arith.constant 0 : index
    %c3 = arith.constant 3 : index
    %c0_10 = arith.constant 0 : index
    %c0_11 = arith.constant 0 : index
    %10 = vector.load %arg2[%c0_9, %c3, %c0_10, %c0_11] : memref<1x4x64x32xbf16, #tpu.memory_space<vmem>>, vector<1x1x64x32xbf16>
    %11 = vector.shape_cast %10 : vector<1x1x64x32xbf16> to vector<64x32xbf16>
    %12 = arith.extf %11 : vector<64x32xbf16> to vector<64x32xf32>
    %13 = arith.maximumf %9, %12 : vector<64x32xf32>
    %14 = arith.maximumf %6, %13 : vector<64x32xf32>
    %15 = arith.truncf %14 : vector<64x32xf32> to vector<64x32xbf16>
    %c0_12 = arith.constant 0 : index
    %c0_13 = arith.constant 0 : index
    %c0_14 = arith.constant 0 : index
    %16 = vector.load %arg3[%c0_12, %c0_13, %c0_14] : memref<1x64x32xbf16, #tpu.memory_space<vmem>>, vector<1x64x32xbf16>
    %17 = vector.shape_cast %16 : vector<1x64x32xbf16> to vector<64x32xbf16>
    %18 = vector.shape_cast %15 : vector<64x32xbf16> to vector<1x64x32xbf16>
    tpu.vector_store %arg3[%c0_12, %c0_13, %c0_14], %18 {strides = array<i32>} : memref<1x64x32xbf16, #tpu.memory_space<vmem>>, vector<1x64x32xbf16>,
    return
  }
  func.func @transform_0(%arg0: i32, %arg1: i32) -> (i32, i32, i32, i32) {
    %c0_i32 = arith.constant 0 : i32
    %c0_i32_0 = arith.constant 0 : i32
    %c0_i32_1 = arith.constant 0 : i32
    return %arg0, %c0_i32, %arg1, %c0_i32_0 : i32, i32, i32, i32
  }
  func.func @transform_1(%arg0: i32, %arg1: i32) -> (i32, i32, i32) {
    %c0_i32 = arith.constant 0 : i32
    %c0_i32_0 = arith.constant 0 : i32
    return %arg0, %arg1, %c0_i32 : i32, i32, i32
  }
}

module attributes {stable_mosaic.version = 11 : i64} {
  func.func @_conv_bn_relu_kernel(%arg0: i32, %arg1: i32, %arg2: memref<1x64x288xbf16, #tpu.memory_space<vmem>>, %arg3: memref<288x64xbf16, #tpu.memory_space<vmem>>, %arg4: memref<1x64xf32, #tpu.memory_space<vmem>>, %arg5: memref<1x64xf32, #tpu.memory_space<vmem>>, %arg6: memref<1x64x64xbf16, #tpu.memory_space<vmem>>) attributes {dimension_semantics = [#tpu.dimension_semantics<parallel>, #tpu.dimension_semantics<parallel>], iteration_bounds = array<i64: 2, 1>, scalar_prefetch = 0 : i64, scratch_operands = 0 : i64, tpu.core_type = #tpu.core_type<tc>, window_params = [{transform_indices = @transform_0, window_bounds = array<i64: 1, 64, 288>}, {pipeline_mode = #tpu.pipeline_mode<synchronous>, transform_indices = @transform_1, window_bounds = array<i64: 288, 64>}, {pipeline_mode = #tpu.pipeline_mode<synchronous>, transform_indices = @transform_2, window_bounds = array<i64: 1, 64>}, {pipeline_mode = #tpu.pipeline_mode<synchronous>, transform_indices = @transform_3, window_bounds = array<i64: 1, 64>}, {transform_indices = @transform_4, window_bounds = array<i64: 1, 64, 64>}]} {
    %c0 = arith.constant 0 : index
    %c0_0 = arith.constant 0 : index
    %c0_1 = arith.constant 0 : index
    %0 = vector.load %arg2[%c0, %c0_0, %c0_1] : memref<1x64x288xbf16, #tpu.memory_space<vmem>>, vector<1x64x288xbf16>
    %1 = vector.shape_cast %0 : vector<1x64x288xbf16> to vector<64x288xbf16>
    %c0_2 = arith.constant 0 : index
    %c0_3 = arith.constant 0 : index
    %2 = vector.load %arg3[%c0_2, %c0_3] : memref<288x64xbf16, #tpu.memory_space<vmem>>, vector<288x64xbf16>
    %cst = arith.constant dense<0.000000e+00> : vector<64x64xf32>
    %3 = tpu.matmul %1, %2, %cst {dimension_numbers = #tpu.dot_dimension_numbers<[1], [0], [0], [1], [0, 0, 1, 1], [], []>} : vector<64x288xbf16>, vector<288x64xbf16>, vector<64x64xf32> -> vector<64x64xf32>
    %c0_4 = arith.constant 0 : index
    %c0_5 = arith.constant 0 : index
    %4 = vector.load %arg4[%c0_4, %c0_5] : memref<1x64xf32, #tpu.memory_space<vmem>>, vector<1x64xf32>
    %5 = vector.broadcast %4 : vector<1x64xf32> to vector<64x64xf32>
    %6 = arith.mulf %3, %5 : vector<64x64xf32>
    %c0_6 = arith.constant 0 : index
    %c0_7 = arith.constant 0 : index
    %7 = vector.load %arg5[%c0_6, %c0_7] : memref<1x64xf32, #tpu.memory_space<vmem>>, vector<1x64xf32>
    %8 = vector.broadcast %7 : vector<1x64xf32> to vector<64x64xf32>
    %9 = arith.addf %6, %8 : vector<64x64xf32>
    %cst_8 = arith.constant 0.000000e+00 : f32
    %10 = vector.broadcast %cst_8 : f32 to vector<64x64xf32>
    %11 = arith.maximumf %9, %10 : vector<64x64xf32>
    %12 = arith.truncf %11 : vector<64x64xf32> to vector<64x64xbf16>
    %c0_9 = arith.constant 0 : index
    %c0_10 = arith.constant 0 : index
    %c0_11 = arith.constant 0 : index
    %13 = vector.load %arg6[%c0_9, %c0_10, %c0_11] : memref<1x64x64xbf16, #tpu.memory_space<vmem>>, vector<1x64x64xbf16>
    %14 = vector.shape_cast %13 : vector<1x64x64xbf16> to vector<64x64xbf16>
    %15 = vector.shape_cast %12 : vector<64x64xbf16> to vector<1x64x64xbf16>
    tpu.vector_store %arg6[%c0_9, %c0_10, %c0_11], %15 {strides = array<i32>} : memref<1x64x64xbf16, #tpu.memory_space<vmem>>, vector<1x64x64xbf16>,
    return
  }
  func.func @transform_0(%arg0: i32, %arg1: i32) -> (i32, i32, i32) {
    %c0_i32 = arith.constant 0 : i32
    %c0_i32_0 = arith.constant 0 : i32
    return %arg0, %arg1, %c0_i32 : i32, i32, i32
  }
  func.func @transform_1(%arg0: i32, %arg1: i32) -> (i32, i32) {
    %c0_i32 = arith.constant 0 : i32
    %c0_i32_0 = arith.constant 0 : i32
    %c0_i32_1 = arith.constant 0 : i32
    return %c0_i32, %c0_i32_0 : i32, i32
  }
  func.func @transform_2(%arg0: i32, %arg1: i32) -> (i32, i32) {
    %c0_i32 = arith.constant 0 : i32
    %c0_i32_0 = arith.constant 0 : i32
    %c0_i32_1 = arith.constant 0 : i32
    return %c0_i32, %c0_i32_0 : i32, i32
  }
  func.func @transform_3(%arg0: i32, %arg1: i32) -> (i32, i32) {
    %c0_i32 = arith.constant 0 : i32
    %c0_i32_0 = arith.constant 0 : i32
    %c0_i32_1 = arith.constant 0 : i32
    return %c0_i32, %c0_i32_0 : i32, i32
  }
  func.func @transform_4(%arg0: i32, %arg1: i32) -> (i32, i32, i32) {
    %c0_i32 = arith.constant 0 : i32
    %c0_i32_0 = arith.constant 0 : i32
    return %arg0, %arg1, %c0_i32 : i32, i32, i32
  }
}

module attributes {stable_mosaic.version = 11 : i64} {
  func.func @_maxpool_kernel(%arg0: i32, %arg1: i32, %arg2: memref<1x4x16x64xbf16, #tpu.memory_space<vmem>>, %arg3: memref<1x16x64xbf16, #tpu.memory_space<vmem>>) attributes {dimension_semantics = [#tpu.dimension_semantics<parallel>, #tpu.dimension_semantics<parallel>], iteration_bounds = array<i64: 2, 1>, scalar_prefetch = 0 : i64, scratch_operands = 0 : i64, tpu.core_type = #tpu.core_type<tc>, window_params = [{transform_indices = @transform_0, window_bounds = array<i64: 1, 4, 16, 64>}, {transform_indices = @transform_1, window_bounds = array<i64: 1, 16, 64>}]} {
    %c0 = arith.constant 0 : index
    %c0_0 = arith.constant 0 : index
    %c0_1 = arith.constant 0 : index
    %c0_2 = arith.constant 0 : index
    %0 = vector.load %arg2[%c0, %c0_0, %c0_1, %c0_2] : memref<1x4x16x64xbf16, #tpu.memory_space<vmem>>, vector<1x1x16x64xbf16>
    %1 = vector.shape_cast %0 : vector<1x1x16x64xbf16> to vector<16x64xbf16>
    %2 = arith.extf %1 : vector<16x64xbf16> to vector<16x64xf32>
    %c0_3 = arith.constant 0 : index
    %c1 = arith.constant 1 : index
    %c0_4 = arith.constant 0 : index
    %c0_5 = arith.constant 0 : index
    %3 = vector.load %arg2[%c0_3, %c1, %c0_4, %c0_5] : memref<1x4x16x64xbf16, #tpu.memory_space<vmem>>, vector<1x1x16x64xbf16>
    %4 = vector.shape_cast %3 : vector<1x1x16x64xbf16> to vector<16x64xbf16>
    %5 = arith.extf %4 : vector<16x64xbf16> to vector<16x64xf32>
    %6 = arith.maximumf %2, %5 : vector<16x64xf32>
    %c0_6 = arith.constant 0 : index
    %c2 = arith.constant 2 : index
    %c0_7 = arith.constant 0 : index
    %c0_8 = arith.constant 0 : index
    %7 = vector.load %arg2[%c0_6, %c2, %c0_7, %c0_8] : memref<1x4x16x64xbf16, #tpu.memory_space<vmem>>, vector<1x1x16x64xbf16>
    %8 = vector.shape_cast %7 : vector<1x1x16x64xbf16> to vector<16x64xbf16>
    %9 = arith.extf %8 : vector<16x64xbf16> to vector<16x64xf32>
    %c0_9 = arith.constant 0 : index
    %c3 = arith.constant 3 : index
    %c0_10 = arith.constant 0 : index
    %c0_11 = arith.constant 0 : index
    %10 = vector.load %arg2[%c0_9, %c3, %c0_10, %c0_11] : memref<1x4x16x64xbf16, #tpu.memory_space<vmem>>, vector<1x1x16x64xbf16>
    %11 = vector.shape_cast %10 : vector<1x1x16x64xbf16> to vector<16x64xbf16>
    %12 = arith.extf %11 : vector<16x64xbf16> to vector<16x64xf32>
    %13 = arith.maximumf %9, %12 : vector<16x64xf32>
    %14 = arith.maximumf %6, %13 : vector<16x64xf32>
    %15 = arith.truncf %14 : vector<16x64xf32> to vector<16x64xbf16>
    %c0_12 = arith.constant 0 : index
    %c0_13 = arith.constant 0 : index
    %c0_14 = arith.constant 0 : index
    %16 = vector.load %arg3[%c0_12, %c0_13, %c0_14] : memref<1x16x64xbf16, #tpu.memory_space<vmem>>, vector<1x16x64xbf16>
    %17 = vector.shape_cast %16 : vector<1x16x64xbf16> to vector<16x64xbf16>
    %18 = vector.shape_cast %15 : vector<16x64xbf16> to vector<1x16x64xbf16>
    tpu.vector_store %arg3[%c0_12, %c0_13, %c0_14], %18 {strides = array<i32>} : memref<1x16x64xbf16, #tpu.memory_space<vmem>>, vector<1x16x64xbf16>,
    return
  }
  func.func @transform_0(%arg0: i32, %arg1: i32) -> (i32, i32, i32, i32) {
    %c0_i32 = arith.constant 0 : i32
    %c0_i32_0 = arith.constant 0 : i32
    %c0_i32_1 = arith.constant 0 : i32
    return %arg0, %c0_i32, %arg1, %c0_i32_0 : i32, i32, i32, i32
  }
  func.func @transform_1(%arg0: i32, %arg1: i32) -> (i32, i32, i32) {
    %c0_i32 = arith.constant 0 : i32
    %c0_i32_0 = arith.constant 0 : i32
    return %arg0, %arg1, %c0_i32 : i32, i32, i32
  }
}

module attributes {stable_mosaic.version = 11 : i64} {
  func.func @_conv_bn_relu_kernel(%arg0: i32, %arg1: i32, %arg2: memref<1x16x576xbf16, #tpu.memory_space<vmem>>, %arg3: memref<576x128xbf16, #tpu.memory_space<vmem>>, %arg4: memref<1x128xf32, #tpu.memory_space<vmem>>, %arg5: memref<1x128xf32, #tpu.memory_space<vmem>>, %arg6: memref<1x16x128xbf16, #tpu.memory_space<vmem>>) attributes {dimension_semantics = [#tpu.dimension_semantics<parallel>, #tpu.dimension_semantics<parallel>], iteration_bounds = array<i64: 2, 1>, scalar_prefetch = 0 : i64, scratch_operands = 0 : i64, tpu.core_type = #tpu.core_type<tc>, window_params = [{transform_indices = @transform_0, window_bounds = array<i64: 1, 16, 576>}, {pipeline_mode = #tpu.pipeline_mode<synchronous>, transform_indices = @transform_1, window_bounds = array<i64: 576, 128>}, {pipeline_mode = #tpu.pipeline_mode<synchronous>, transform_indices = @transform_2, window_bounds = array<i64: 1, 128>}, {pipeline_mode = #tpu.pipeline_mode<synchronous>, transform_indices = @transform_3, window_bounds = array<i64: 1, 128>}, {transform_indices = @transform_4, window_bounds = array<i64: 1, 16, 128>}]} {
    %c0 = arith.constant 0 : index
    %c0_0 = arith.constant 0 : index
    %c0_1 = arith.constant 0 : index
    %0 = vector.load %arg2[%c0, %c0_0, %c0_1] : memref<1x16x576xbf16, #tpu.memory_space<vmem>>, vector<1x16x576xbf16>
    %1 = vector.shape_cast %0 : vector<1x16x576xbf16> to vector<16x576xbf16>
    %c0_2 = arith.constant 0 : index
    %c0_3 = arith.constant 0 : index
    %2 = vector.load %arg3[%c0_2, %c0_3] : memref<576x128xbf16, #tpu.memory_space<vmem>>, vector<576x128xbf16>
    %cst = arith.constant dense<0.000000e+00> : vector<16x128xf32>
    %3 = tpu.matmul %1, %2, %cst {dimension_numbers = #tpu.dot_dimension_numbers<[1], [0], [0], [1], [0, 0, 1, 1], [], []>} : vector<16x576xbf16>, vector<576x128xbf16>, vector<16x128xf32> -> vector<16x128xf32>
    %c0_4 = arith.constant 0 : index
    %c0_5 = arith.constant 0 : index
    %4 = vector.load %arg4[%c0_4, %c0_5] : memref<1x128xf32, #tpu.memory_space<vmem>>, vector<1x128xf32>
    %5 = vector.broadcast %4 : vector<1x128xf32> to vector<16x128xf32>
    %6 = arith.mulf %3, %5 : vector<16x128xf32>
    %c0_6 = arith.constant 0 : index
    %c0_7 = arith.constant 0 : index
    %7 = vector.load %arg5[%c0_6, %c0_7] : memref<1x128xf32, #tpu.memory_space<vmem>>, vector<1x128xf32>
    %8 = vector.broadcast %7 : vector<1x128xf32> to vector<16x128xf32>
    %9 = arith.addf %6, %8 : vector<16x128xf32>
    %cst_8 = arith.constant 0.000000e+00 : f32
    %10 = vector.broadcast %cst_8 : f32 to vector<16x128xf32>
    %11 = arith.maximumf %9, %10 : vector<16x128xf32>
    %12 = arith.truncf %11 : vector<16x128xf32> to vector<16x128xbf16>
    %c0_9 = arith.constant 0 : index
    %c0_10 = arith.constant 0 : index
    %c0_11 = arith.constant 0 : index
    %13 = vector.load %arg6[%c0_9, %c0_10, %c0_11] : memref<1x16x128xbf16, #tpu.memory_space<vmem>>, vector<1x16x128xbf16>
    %14 = vector.shape_cast %13 : vector<1x16x128xbf16> to vector<16x128xbf16>
    %15 = vector.shape_cast %12 : vector<16x128xbf16> to vector<1x16x128xbf16>
    tpu.vector_store %arg6[%c0_9, %c0_10, %c0_11], %15 {strides = array<i32>} : memref<1x16x128xbf16, #tpu.memory_space<vmem>>, vector<1x16x128xbf16>,
    return
  }
  func.func @transform_0(%arg0: i32, %arg1: i32) -> (i32, i32, i32) {
    %c0_i32 = arith.constant 0 : i32
    %c0_i32_0 = arith.constant 0 : i32
    return %arg0, %arg1, %c0_i32 : i32, i32, i32
  }
  func.func @transform_1(%arg0: i32, %arg1: i32) -> (i32, i32) {
    %c0_i32 = arith.constant 0 : i32
    %c0_i32_0 = arith.constant 0 : i32
    %c0_i32_1 = arith.constant 0 : i32
    return %c0_i32, %c0_i32_0 : i32, i32
  }
  func.func @transform_2(%arg0: i32, %arg1: i32) -> (i32, i32) {
    %c0_i32 = arith.constant 0 : i32
    %c0_i32_0 = arith.constant 0 : i32
    %c0_i32_1 = arith.constant 0 : i32
    return %c0_i32, %c0_i32_0 : i32, i32
  }
  func.func @transform_3(%arg0: i32, %arg1: i32) -> (i32, i32) {
    %c0_i32 = arith.constant 0 : i32
    %c0_i32_0 = arith.constant 0 : i32
    %c0_i32_1 = arith.constant 0 : i32
    return %c0_i32, %c0_i32_0 : i32, i32
  }
  func.func @transform_4(%arg0: i32, %arg1: i32) -> (i32, i32, i32) {
    %c0_i32 = arith.constant 0 : i32
    %c0_i32_0 = arith.constant 0 : i32
    return %arg0, %arg1, %c0_i32 : i32, i32, i32
  }
}

module attributes {stable_mosaic.version = 11 : i64} {
  func.func @_upconv_bn_add_kernel(%arg0: i32, %arg1: i32, %arg2: memref<1x16x128xbf16, #tpu.memory_space<vmem>>, %arg3: memref<1x16x256xbf16, #tpu.memory_space<vmem>>, %arg4: memref<128x256xbf16, #tpu.memory_space<vmem>>, %arg5: memref<1x256xf32, #tpu.memory_space<vmem>>, %arg6: memref<1x256xf32, #tpu.memory_space<vmem>>, %arg7: memref<1x16x256xbf16, #tpu.memory_space<vmem>>) attributes {dimension_semantics = [#tpu.dimension_semantics<parallel>, #tpu.dimension_semantics<parallel>], iteration_bounds = array<i64: 2, 1>, scalar_prefetch = 0 : i64, scratch_operands = 0 : i64, tpu.core_type = #tpu.core_type<tc>, window_params = [{transform_indices = @transform_0, window_bounds = array<i64: 1, 16, 128>}, {transform_indices = @transform_1, window_bounds = array<i64: 1, 16, 256>}, {pipeline_mode = #tpu.pipeline_mode<synchronous>, transform_indices = @transform_2, window_bounds = array<i64: 128, 256>}, {pipeline_mode = #tpu.pipeline_mode<synchronous>, transform_indices = @transform_3, window_bounds = array<i64: 1, 256>}, {pipeline_mode = #tpu.pipeline_mode<synchronous>, transform_indices = @transform_4, window_bounds = array<i64: 1, 256>}, {transform_indices = @transform_5, window_bounds = array<i64: 1, 16, 256>}]} {
    %c0 = arith.constant 0 : index
    %c0_0 = arith.constant 0 : index
    %c0_1 = arith.constant 0 : index
    %0 = vector.load %arg2[%c0, %c0_0, %c0_1] : memref<1x16x128xbf16, #tpu.memory_space<vmem>>, vector<1x16x128xbf16>
    %1 = vector.shape_cast %0 : vector<1x16x128xbf16> to vector<16x128xbf16>
    %c0_2 = arith.constant 0 : index
    %c0_3 = arith.constant 0 : index
    %2 = vector.load %arg4[%c0_2, %c0_3] : memref<128x256xbf16, #tpu.memory_space<vmem>>, vector<128x256xbf16>
    %cst = arith.constant dense<0.000000e+00> : vector<16x256xf32>
    %3 = tpu.matmul %1, %2, %cst {dimension_numbers = #tpu.dot_dimension_numbers<[1], [0], [0], [1], [0, 0, 1, 1], [], []>} : vector<16x128xbf16>, vector<128x256xbf16>, vector<16x256xf32> -> vector<16x256xf32>
    %c0_4 = arith.constant 0 : index
    %c0_5 = arith.constant 0 : index
    %4 = vector.load %arg5[%c0_4, %c0_5] : memref<1x256xf32, #tpu.memory_space<vmem>>, vector<1x256xf32>
    %5 = vector.broadcast %4 : vector<1x256xf32> to vector<16x256xf32>
    %6 = arith.mulf %3, %5 : vector<16x256xf32>
    %c0_6 = arith.constant 0 : index
    %c0_7 = arith.constant 0 : index
    %7 = vector.load %arg6[%c0_6, %c0_7] : memref<1x256xf32, #tpu.memory_space<vmem>>, vector<1x256xf32>
    %8 = vector.broadcast %7 : vector<1x256xf32> to vector<16x256xf32>
    %9 = arith.addf %6, %8 : vector<16x256xf32>
    %c0_8 = arith.constant 0 : index
    %c0_9 = arith.constant 0 : index
    %c0_10 = arith.constant 0 : index
    %10 = vector.load %arg3[%c0_8, %c0_9, %c0_10] : memref<1x16x256xbf16, #tpu.memory_space<vmem>>, vector<1x16x256xbf16>
    %11 = vector.shape_cast %10 : vector<1x16x256xbf16> to vector<16x256xbf16>
    %12 = arith.extf %11 : vector<16x256xbf16> to vector<16x256xf32>
    %13 = arith.addf %9, %12 : vector<16x256xf32>
    %14 = arith.truncf %13 : vector<16x256xf32> to vector<16x256xbf16>
    %c0_11 = arith.constant 0 : index
    %c0_12 = arith.constant 0 : index
    %c0_13 = arith.constant 0 : index
    %15 = vector.load %arg7[%c0_11, %c0_12, %c0_13] : memref<1x16x256xbf16, #tpu.memory_space<vmem>>, vector<1x16x256xbf16>
    %16 = vector.shape_cast %15 : vector<1x16x256xbf16> to vector<16x256xbf16>
    %17 = vector.shape_cast %14 : vector<16x256xbf16> to vector<1x16x256xbf16>
    tpu.vector_store %arg7[%c0_11, %c0_12, %c0_13], %17 {strides = array<i32>} : memref<1x16x256xbf16, #tpu.memory_space<vmem>>, vector<1x16x256xbf16>,
    return
  }
  func.func @transform_0(%arg0: i32, %arg1: i32) -> (i32, i32, i32) {
    %c0_i32 = arith.constant 0 : i32
    %c0_i32_0 = arith.constant 0 : i32
    return %arg0, %arg1, %c0_i32 : i32, i32, i32
  }
  func.func @transform_1(%arg0: i32, %arg1: i32) -> (i32, i32, i32) {
    %c0_i32 = arith.constant 0 : i32
    %c0_i32_0 = arith.constant 0 : i32
    return %arg0, %arg1, %c0_i32 : i32, i32, i32
  }
  func.func @transform_2(%arg0: i32, %arg1: i32) -> (i32, i32) {
    %c0_i32 = arith.constant 0 : i32
    %c0_i32_0 = arith.constant 0 : i32
    %c0_i32_1 = arith.constant 0 : i32
    return %c0_i32, %c0_i32_0 : i32, i32
  }
  func.func @transform_3(%arg0: i32, %arg1: i32) -> (i32, i32) {
    %c0_i32 = arith.constant 0 : i32
    %c0_i32_0 = arith.constant 0 : i32
    %c0_i32_1 = arith.constant 0 : i32
    return %c0_i32, %c0_i32_0 : i32, i32
  }
  func.func @transform_4(%arg0: i32, %arg1: i32) -> (i32, i32) {
    %c0_i32 = arith.constant 0 : i32
    %c0_i32_0 = arith.constant 0 : i32
    %c0_i32_1 = arith.constant 0 : i32
    return %c0_i32, %c0_i32_0 : i32, i32
  }
  func.func @transform_5(%arg0: i32, %arg1: i32) -> (i32, i32, i32) {
    %c0_i32 = arith.constant 0 : i32
    %c0_i32_0 = arith.constant 0 : i32
    return %arg0, %arg1, %c0_i32 : i32, i32, i32
  }
}

module attributes {stable_mosaic.version = 11 : i64} {
  func.func @_conv_bn_relu_kernel(%arg0: i32, %arg1: i32, %arg2: memref<1x64x576xbf16, #tpu.memory_space<vmem>>, %arg3: memref<576x64xbf16, #tpu.memory_space<vmem>>, %arg4: memref<1x64xf32, #tpu.memory_space<vmem>>, %arg5: memref<1x64xf32, #tpu.memory_space<vmem>>, %arg6: memref<1x64x64xbf16, #tpu.memory_space<vmem>>) attributes {dimension_semantics = [#tpu.dimension_semantics<parallel>, #tpu.dimension_semantics<parallel>], iteration_bounds = array<i64: 2, 1>, scalar_prefetch = 0 : i64, scratch_operands = 0 : i64, tpu.core_type = #tpu.core_type<tc>, window_params = [{transform_indices = @transform_0, window_bounds = array<i64: 1, 64, 576>}, {pipeline_mode = #tpu.pipeline_mode<synchronous>, transform_indices = @transform_1, window_bounds = array<i64: 576, 64>}, {pipeline_mode = #tpu.pipeline_mode<synchronous>, transform_indices = @transform_2, window_bounds = array<i64: 1, 64>}, {pipeline_mode = #tpu.pipeline_mode<synchronous>, transform_indices = @transform_3, window_bounds = array<i64: 1, 64>}, {transform_indices = @transform_4, window_bounds = array<i64: 1, 64, 64>}]} {
    %c0 = arith.constant 0 : index
    %c0_0 = arith.constant 0 : index
    %c0_1 = arith.constant 0 : index
    %0 = vector.load %arg2[%c0, %c0_0, %c0_1] : memref<1x64x576xbf16, #tpu.memory_space<vmem>>, vector<1x64x576xbf16>
    %1 = vector.shape_cast %0 : vector<1x64x576xbf16> to vector<64x576xbf16>
    %c0_2 = arith.constant 0 : index
    %c0_3 = arith.constant 0 : index
    %2 = vector.load %arg3[%c0_2, %c0_3] : memref<576x64xbf16, #tpu.memory_space<vmem>>, vector<576x64xbf16>
    %cst = arith.constant dense<0.000000e+00> : vector<64x64xf32>
    %3 = tpu.matmul %1, %2, %cst {dimension_numbers = #tpu.dot_dimension_numbers<[1], [0], [0], [1], [0, 0, 1, 1], [], []>} : vector<64x576xbf16>, vector<576x64xbf16>, vector<64x64xf32> -> vector<64x64xf32>
    %c0_4 = arith.constant 0 : index
    %c0_5 = arith.constant 0 : index
    %4 = vector.load %arg4[%c0_4, %c0_5] : memref<1x64xf32, #tpu.memory_space<vmem>>, vector<1x64xf32>
    %5 = vector.broadcast %4 : vector<1x64xf32> to vector<64x64xf32>
    %6 = arith.mulf %3, %5 : vector<64x64xf32>
    %c0_6 = arith.constant 0 : index
    %c0_7 = arith.constant 0 : index
    %7 = vector.load %arg5[%c0_6, %c0_7] : memref<1x64xf32, #tpu.memory_space<vmem>>, vector<1x64xf32>
    %8 = vector.broadcast %7 : vector<1x64xf32> to vector<64x64xf32>
    %9 = arith.addf %6, %8 : vector<64x64xf32>
    %cst_8 = arith.constant 0.000000e+00 : f32
    %10 = vector.broadcast %cst_8 : f32 to vector<64x64xf32>
    %11 = arith.maximumf %9, %10 : vector<64x64xf32>
    %12 = arith.truncf %11 : vector<64x64xf32> to vector<64x64xbf16>
    %c0_9 = arith.constant 0 : index
    %c0_10 = arith.constant 0 : index
    %c0_11 = arith.constant 0 : index
    %13 = vector.load %arg6[%c0_9, %c0_10, %c0_11] : memref<1x64x64xbf16, #tpu.memory_space<vmem>>, vector<1x64x64xbf16>
    %14 = vector.shape_cast %13 : vector<1x64x64xbf16> to vector<64x64xbf16>
    %15 = vector.shape_cast %12 : vector<64x64xbf16> to vector<1x64x64xbf16>
    tpu.vector_store %arg6[%c0_9, %c0_10, %c0_11], %15 {strides = array<i32>} : memref<1x64x64xbf16, #tpu.memory_space<vmem>>, vector<1x64x64xbf16>,
    return
  }
  func.func @transform_0(%arg0: i32, %arg1: i32) -> (i32, i32, i32) {
    %c0_i32 = arith.constant 0 : i32
    %c0_i32_0 = arith.constant 0 : i32
    return %arg0, %arg1, %c0_i32 : i32, i32, i32
  }
  func.func @transform_1(%arg0: i32, %arg1: i32) -> (i32, i32) {
    %c0_i32 = arith.constant 0 : i32
    %c0_i32_0 = arith.constant 0 : i32
    %c0_i32_1 = arith.constant 0 : i32
    return %c0_i32, %c0_i32_0 : i32, i32
  }
  func.func @transform_2(%arg0: i32, %arg1: i32) -> (i32, i32) {
    %c0_i32 = arith.constant 0 : i32
    %c0_i32_0 = arith.constant 0 : i32
    %c0_i32_1 = arith.constant 0 : i32
    return %c0_i32, %c0_i32_0 : i32, i32
  }
  func.func @transform_3(%arg0: i32, %arg1: i32) -> (i32, i32) {
    %c0_i32 = arith.constant 0 : i32
    %c0_i32_0 = arith.constant 0 : i32
    %c0_i32_1 = arith.constant 0 : i32
    return %c0_i32, %c0_i32_0 : i32, i32
  }
  func.func @transform_4(%arg0: i32, %arg1: i32) -> (i32, i32, i32) {
    %c0_i32 = arith.constant 0 : i32
    %c0_i32_0 = arith.constant 0 : i32
    return %arg0, %arg1, %c0_i32 : i32, i32, i32
  }
}

module attributes {stable_mosaic.version = 11 : i64} {
  func.func @_upconv_bn_add_kernel(%arg0: i32, %arg1: i32, %arg2: memref<1x64x64xbf16, #tpu.memory_space<vmem>>, %arg3: memref<1x64x128xbf16, #tpu.memory_space<vmem>>, %arg4: memref<64x128xbf16, #tpu.memory_space<vmem>>, %arg5: memref<1x128xf32, #tpu.memory_space<vmem>>, %arg6: memref<1x128xf32, #tpu.memory_space<vmem>>, %arg7: memref<1x64x128xbf16, #tpu.memory_space<vmem>>) attributes {dimension_semantics = [#tpu.dimension_semantics<parallel>, #tpu.dimension_semantics<parallel>], iteration_bounds = array<i64: 2, 1>, scalar_prefetch = 0 : i64, scratch_operands = 0 : i64, tpu.core_type = #tpu.core_type<tc>, window_params = [{transform_indices = @transform_0, window_bounds = array<i64: 1, 64, 64>}, {transform_indices = @transform_1, window_bounds = array<i64: 1, 64, 128>}, {pipeline_mode = #tpu.pipeline_mode<synchronous>, transform_indices = @transform_2, window_bounds = array<i64: 64, 128>}, {pipeline_mode = #tpu.pipeline_mode<synchronous>, transform_indices = @transform_3, window_bounds = array<i64: 1, 128>}, {pipeline_mode = #tpu.pipeline_mode<synchronous>, transform_indices = @transform_4, window_bounds = array<i64: 1, 128>}, {transform_indices = @transform_5, window_bounds = array<i64: 1, 64, 128>}]} {
    %c0 = arith.constant 0 : index
    %c0_0 = arith.constant 0 : index
    %c0_1 = arith.constant 0 : index
    %0 = vector.load %arg2[%c0, %c0_0, %c0_1] : memref<1x64x64xbf16, #tpu.memory_space<vmem>>, vector<1x64x64xbf16>
    %1 = vector.shape_cast %0 : vector<1x64x64xbf16> to vector<64x64xbf16>
    %c0_2 = arith.constant 0 : index
    %c0_3 = arith.constant 0 : index
    %2 = vector.load %arg4[%c0_2, %c0_3] : memref<64x128xbf16, #tpu.memory_space<vmem>>, vector<64x128xbf16>
    %cst = arith.constant dense<0.000000e+00> : vector<64x128xf32>
    %3 = tpu.matmul %1, %2, %cst {dimension_numbers = #tpu.dot_dimension_numbers<[1], [0], [0], [1], [0, 0, 1, 1], [], []>} : vector<64x64xbf16>, vector<64x128xbf16>, vector<64x128xf32> -> vector<64x128xf32>
    %c0_4 = arith.constant 0 : index
    %c0_5 = arith.constant 0 : index
    %4 = vector.load %arg5[%c0_4, %c0_5] : memref<1x128xf32, #tpu.memory_space<vmem>>, vector<1x128xf32>
    %5 = vector.broadcast %4 : vector<1x128xf32> to vector<64x128xf32>
    %6 = arith.mulf %3, %5 : vector<64x128xf32>
    %c0_6 = arith.constant 0 : index
    %c0_7 = arith.constant 0 : index
    %7 = vector.load %arg6[%c0_6, %c0_7] : memref<1x128xf32, #tpu.memory_space<vmem>>, vector<1x128xf32>
    %8 = vector.broadcast %7 : vector<1x128xf32> to vector<64x128xf32>
    %9 = arith.addf %6, %8 : vector<64x128xf32>
    %c0_8 = arith.constant 0 : index
    %c0_9 = arith.constant 0 : index
    %c0_10 = arith.constant 0 : index
    %10 = vector.load %arg3[%c0_8, %c0_9, %c0_10] : memref<1x64x128xbf16, #tpu.memory_space<vmem>>, vector<1x64x128xbf16>
    %11 = vector.shape_cast %10 : vector<1x64x128xbf16> to vector<64x128xbf16>
    %12 = arith.extf %11 : vector<64x128xbf16> to vector<64x128xf32>
    %13 = arith.addf %9, %12 : vector<64x128xf32>
    %14 = arith.truncf %13 : vector<64x128xf32> to vector<64x128xbf16>
    %c0_11 = arith.constant 0 : index
    %c0_12 = arith.constant 0 : index
    %c0_13 = arith.constant 0 : index
    %15 = vector.load %arg7[%c0_11, %c0_12, %c0_13] : memref<1x64x128xbf16, #tpu.memory_space<vmem>>, vector<1x64x128xbf16>
    %16 = vector.shape_cast %15 : vector<1x64x128xbf16> to vector<64x128xbf16>
    %17 = vector.shape_cast %14 : vector<64x128xbf16> to vector<1x64x128xbf16>
    tpu.vector_store %arg7[%c0_11, %c0_12, %c0_13], %17 {strides = array<i32>} : memref<1x64x128xbf16, #tpu.memory_space<vmem>>, vector<1x64x128xbf16>,
    return
  }
  func.func @transform_0(%arg0: i32, %arg1: i32) -> (i32, i32, i32) {
    %c0_i32 = arith.constant 0 : i32
    %c0_i32_0 = arith.constant 0 : i32
    return %arg0, %arg1, %c0_i32 : i32, i32, i32
  }
  func.func @transform_1(%arg0: i32, %arg1: i32) -> (i32, i32, i32) {
    %c0_i32 = arith.constant 0 : i32
    %c0_i32_0 = arith.constant 0 : i32
    return %arg0, %arg1, %c0_i32 : i32, i32, i32
  }
  func.func @transform_2(%arg0: i32, %arg1: i32) -> (i32, i32) {
    %c0_i32 = arith.constant 0 : i32
    %c0_i32_0 = arith.constant 0 : i32
    %c0_i32_1 = arith.constant 0 : i32
    return %c0_i32, %c0_i32_0 : i32, i32
  }
  func.func @transform_3(%arg0: i32, %arg1: i32) -> (i32, i32) {
    %c0_i32 = arith.constant 0 : i32
    %c0_i32_0 = arith.constant 0 : i32
    %c0_i32_1 = arith.constant 0 : i32
    return %c0_i32, %c0_i32_0 : i32, i32
  }
  func.func @transform_4(%arg0: i32, %arg1: i32) -> (i32, i32) {
    %c0_i32 = arith.constant 0 : i32
    %c0_i32_0 = arith.constant 0 : i32
    %c0_i32_1 = arith.constant 0 : i32
    return %c0_i32, %c0_i32_0 : i32, i32
  }
  func.func @transform_5(%arg0: i32, %arg1: i32) -> (i32, i32, i32) {
    %c0_i32 = arith.constant 0 : i32
    %c0_i32_0 = arith.constant 0 : i32
    return %arg0, %arg1, %c0_i32 : i32, i32, i32
  }
}

module attributes {stable_mosaic.version = 11 : i64} {
  func.func @_conv_bn_relu_head_kernel(%arg0: i32, %arg1: i32, %arg2: memref<1x256x288xbf16, #tpu.memory_space<vmem>>, %arg3: memref<288x32xbf16, #tpu.memory_space<vmem>>, %arg4: memref<1x32xf32, #tpu.memory_space<vmem>>, %arg5: memref<1x32xf32, #tpu.memory_space<vmem>>, %arg6: memref<32x128xbf16, #tpu.memory_space<vmem>>, %arg7: memref<1x128xf32, #tpu.memory_space<vmem>>, %arg8: memref<1x256x128xf32, #tpu.memory_space<vmem>>) attributes {dimension_semantics = [#tpu.dimension_semantics<parallel>, #tpu.dimension_semantics<parallel>], iteration_bounds = array<i64: 2, 1>, scalar_prefetch = 0 : i64, scratch_operands = 0 : i64, tpu.core_type = #tpu.core_type<tc>, window_params = [{transform_indices = @transform_0, window_bounds = array<i64: 1, 256, 288>}, {pipeline_mode = #tpu.pipeline_mode<synchronous>, transform_indices = @transform_1, window_bounds = array<i64: 288, 32>}, {pipeline_mode = #tpu.pipeline_mode<synchronous>, transform_indices = @transform_2, window_bounds = array<i64: 1, 32>}, {pipeline_mode = #tpu.pipeline_mode<synchronous>, transform_indices = @transform_3, window_bounds = array<i64: 1, 32>}, {pipeline_mode = #tpu.pipeline_mode<synchronous>, transform_indices = @transform_4, window_bounds = array<i64: 32, 128>}, {pipeline_mode = #tpu.pipeline_mode<synchronous>, transform_indices = @transform_5, window_bounds = array<i64: 1, 128>}, {transform_indices = @transform_6, window_bounds = array<i64: 1, 256, 128>}]} {
    %c0 = arith.constant 0 : index
    %c0_0 = arith.constant 0 : index
    %c0_1 = arith.constant 0 : index
    %0 = vector.load %arg2[%c0, %c0_0, %c0_1] : memref<1x256x288xbf16, #tpu.memory_space<vmem>>, vector<1x256x288xbf16>
    %1 = vector.shape_cast %0 : vector<1x256x288xbf16> to vector<256x288xbf16>
    %c0_2 = arith.constant 0 : index
    %c0_3 = arith.constant 0 : index
    %2 = vector.load %arg3[%c0_2, %c0_3] : memref<288x32xbf16, #tpu.memory_space<vmem>>, vector<288x32xbf16>
    %cst = arith.constant dense<0.000000e+00> : vector<256x32xf32>
    %3 = tpu.matmul %1, %2, %cst {dimension_numbers = #tpu.dot_dimension_numbers<[1], [0], [0], [1], [0, 0, 1, 1], [], []>} : vector<256x288xbf16>, vector<288x32xbf16>, vector<256x32xf32> -> vector<256x32xf32>
    %c0_4 = arith.constant 0 : index
    %c0_5 = arith.constant 0 : index
    %4 = vector.load %arg4[%c0_4, %c0_5] : memref<1x32xf32, #tpu.memory_space<vmem>>, vector<1x32xf32>
    %5 = vector.broadcast %4 : vector<1x32xf32> to vector<256x32xf32>
    %6 = arith.mulf %3, %5 : vector<256x32xf32>
    %c0_6 = arith.constant 0 : index
    %c0_7 = arith.constant 0 : index
    %7 = vector.load %arg5[%c0_6, %c0_7] : memref<1x32xf32, #tpu.memory_space<vmem>>, vector<1x32xf32>
    %8 = vector.broadcast %7 : vector<1x32xf32> to vector<256x32xf32>
    %9 = arith.addf %6, %8 : vector<256x32xf32>
    %cst_8 = arith.constant 0.000000e+00 : f32
    %10 = vector.broadcast %cst_8 : f32 to vector<256x32xf32>
    %11 = arith.maximumf %9, %10 : vector<256x32xf32>
    %12 = arith.truncf %11 : vector<256x32xf32> to vector<256x32xbf16>
    %c0_9 = arith.constant 0 : index
    %c0_10 = arith.constant 0 : index
    %13 = vector.load %arg6[%c0_9, %c0_10] : memref<32x128xbf16, #tpu.memory_space<vmem>>, vector<32x128xbf16>
    %cst_11 = arith.constant dense<0.000000e+00> : vector<256x128xf32>
    %14 = tpu.matmul %12, %13, %cst_11 {dimension_numbers = #tpu.dot_dimension_numbers<[1], [0], [0], [1], [0, 0, 1, 1], [], []>} : vector<256x32xbf16>, vector<32x128xbf16>, vector<256x128xf32> -> vector<256x128xf32>
    %c0_12 = arith.constant 0 : index
    %c0_13 = arith.constant 0 : index
    %15 = vector.load %arg7[%c0_12, %c0_13] : memref<1x128xf32, #tpu.memory_space<vmem>>, vector<1x128xf32>
    %16 = vector.broadcast %15 : vector<1x128xf32> to vector<256x128xf32>
    %17 = arith.addf %14, %16 : vector<256x128xf32>
    %c0_14 = arith.constant 0 : index
    %c0_15 = arith.constant 0 : index
    %c0_16 = arith.constant 0 : index
    %18 = vector.load %arg8[%c0_14, %c0_15, %c0_16] : memref<1x256x128xf32, #tpu.memory_space<vmem>>, vector<1x256x128xf32>
    %19 = vector.shape_cast %18 : vector<1x256x128xf32> to vector<256x128xf32>
    %20 = vector.shape_cast %17 : vector<256x128xf32> to vector<1x256x128xf32>
    tpu.vector_store %arg8[%c0_14, %c0_15, %c0_16], %20 {strides = array<i32>} : memref<1x256x128xf32, #tpu.memory_space<vmem>>, vector<1x256x128xf32>,
    return
  }
  func.func @transform_0(%arg0: i32, %arg1: i32) -> (i32, i32, i32) {
    %c0_i32 = arith.constant 0 : i32
    %c0_i32_0 = arith.constant 0 : i32
    return %arg0, %arg1, %c0_i32 : i32, i32, i32
  }
  func.func @transform_1(%arg0: i32, %arg1: i32) -> (i32, i32) {
    %c0_i32 = arith.constant 0 : i32
    %c0_i32_0 = arith.constant 0 : i32
    %c0_i32_1 = arith.constant 0 : i32
    return %c0_i32, %c0_i32_0 : i32, i32
  }
  func.func @transform_2(%arg0: i32, %arg1: i32) -> (i32, i32) {
    %c0_i32 = arith.constant 0 : i32
    %c0_i32_0 = arith.constant 0 : i32
    %c0_i32_1 = arith.constant 0 : i32
    return %c0_i32, %c0_i32_0 : i32, i32
  }
  func.func @transform_3(%arg0: i32, %arg1: i32) -> (i32, i32) {
    %c0_i32 = arith.constant 0 : i32
    %c0_i32_0 = arith.constant 0 : i32
    %c0_i32_1 = arith.constant 0 : i32
    return %c0_i32, %c0_i32_0 : i32, i32
  }
  func.func @transform_4(%arg0: i32, %arg1: i32) -> (i32, i32) {
    %c0_i32 = arith.constant 0 : i32
    %c0_i32_0 = arith.constant 0 : i32
    %c0_i32_1 = arith.constant 0 : i32
    return %c0_i32, %c0_i32_0 : i32, i32
  }
  func.func @transform_5(%arg0: i32, %arg1: i32) -> (i32, i32) {
    %c0_i32 = arith.constant 0 : i32
    %c0_i32_0 = arith.constant 0 : i32
    %c0_i32_1 = arith.constant 0 : i32
    return %c0_i32, %c0_i32_0 : i32, i32
  }
  func.func @transform_6(%arg0: i32, %arg1: i32) -> (i32, i32, i32) {
    %c0_i32 = arith.constant 0 : i32
    %c0_i32_0 = arith.constant 0 : i32
    return %arg0, %arg1, %c0_i32 : i32, i32, i32
  }
}

</mosaic_0001>

<bundles_post_ra>
// kernel: compact_segmentation_forward.10
= control target key start
LH: loop header
LB: loop body
LE: loop exit
PB: predicated region body
PF: predicated region fallthrough
CT: control target
= control target key end

     0   :  { %s565_s6 = smov 0   ;;  %s567_s7 = smov 0   ;;  %s638_s0 = inlined_call_operand.vmem [shape: bf16[2,4,64,32], index: 0, kind: input, shape index: {}]   ;;  %s639_s1 = inlined_call_operand.vmem [shape: bf16[2,64,32], index: 1, kind: output, shape index: {}]  }
   0x1   :  { %s569_s8 = smov 0  }
   0x2 LB: > { %s23_s9 = sadd.s32 1, %s549_s7  ;;  %p379_p0 = scmp.ge.s32.totalorder %s553_s8, 1  ;;  %s553_s8 = sphi %s569_s8, %s11_s8   ;;  %s549_s7 = sphi %s567_s7, %s641_s7   ;;  %s545_s6 = sphi %s565_s6, %s640_s6  }
   0x3   : > { %p25_p1 = scmp.ge.s32.totalorder %s23_s9, 2  ;;  %p108_p2 = scmp.lt.s32.totalorder %s553_s8, 3 }
   0x5   : > { %s643_s9 = smov (%p25_p1, %s23_s9), 0  ;;  %p109_p3 = pnand %p379_p0, %p108_p2 }
   0x6   : > { %p137_p4 = scmp.lt.s32.totalorder (!%p109_p3), %s545_s6, 1 }
   0x7   : > { %112 = sbr.rel (%p109_p3) target bundleno = 38 (0x26), region = 24 }
   0xc   : > { %s645_s6 = smov (!%p137_p4, %s545_s6), 1  ;;  %vm279_vm0 = vcmask 257024  }
   0xd   : > { %s418_s10 = sshll.u32 %s645_s6, 7  ;;  %s419_s14 = sshll.u32 %s645_s6, 5 }
   0xe   : > { %s589_s13 = scalar_lea.vmem %s638_s0, %s418_s10  ;;  %s607_s17 = scalar_lea.vmem %s639_s1, %s419_s14 }
   0xf   : > { %v429_v0 = vld [vmem:[%s589_s13] sm:$0xff]   ;;  %v492_v8 = vld [vmem:[%s589_s13 + $0x8] sm:$0xff]   ;;  %v493_v24 = vld [vmem:[%s589_s13 + $0x10] sm:$0xff]  }
  0x10   : > { %v495_v1 = vld [vmem:[%s589_s13 + $0x20] sm:$0xff]   ;;  %v430_v3 = vunpack.c.l.bf16 %v429_v0  ;;  %v431_v7 = vunpack.c.h.bf16 %v429_v0  ;;  %v496_v9 = vld [vmem:[%s589_s13 + $0x28] sm:$0xff]   ;;  %v434_v17 = vunpack.c.l.bf16 %v492_v8  ;;  %v497_v25 = vld [vmem:[%s589_s13 + $0x30] sm:$0xff]   ;;  %v435_v28 = vunpack.c.h.bf16 %v492_v8 }
  0x11   : > { %v499_v2 = vld [vmem:[%s589_s13 + $0x40] sm:$0xff]   ;;  %v446_v4 = vunpack.c.l.bf16 %v495_v1  ;;  %v447_v11 = vunpack.c.h.bf16 %v495_v1  ;;  %v500_v14 = vld [vmem:[%s589_s13 + $0x48] sm:$0xff]   ;;  %v450_v18 = vunpack.c.l.bf16 %v496_v9  ;;  %v501_v26 = vld [vmem:[%s589_s13 + $0x50] sm:$0xff]   ;;  %v451_v29 = vunpack.c.h.bf16 %v496_v9 }
  0x12   : > { %v462_v5 = vunpack.c.l.bf16 %v499_v2  ;;  %v503_v6 = vld [vmem:[%s589_s13 + $0x60] sm:$0xff]   ;;  %v463_v12 = vunpack.c.h.bf16 %v499_v2  ;;  %v504_v15 = vld [vmem:[%s589_s13 + $0x68] sm:$0xff]   ;;  %v466_v19 = vunpack.c.l.bf16 %v500_v14  ;;  %v467_v30 = vunpack.c.h.bf16 %v500_v14  ;;  %v505_v35 = vld [vmem:[%s589_s13 + $0x70] sm:$0xff]  }
  0x13   : > { %v478_v10 = vunpack.c.l.bf16 %v503_v6  ;;  %v479_v13 = vunpack.c.h.bf16 %v503_v6  ;;  %v189_v16 = vmax.f32 %v430_v3, %v446_v4  ;;  %v190_v21 = vmax.f32 %v431_v7, %v447_v11  ;;  %v494_v44 = vld [vmem:[%s589_s13 + $0x18] sm:$0xff]  }
  0x14   : > { %v482_v23 = vunpack.c.l.bf16 %v504_v15  ;;  %v191_v27 = vmax.f32 %v434_v17, %v450_v18  ;;  %v483_v34 = vunpack.c.h.bf16 %v504_v15  ;;  %v192_v36 = vmax.f32 %v435_v28, %v451_v29  ;;  %v498_v45 = vld [vmem:[%s589_s13 + $0x38] sm:$0xff]  }
  0x15   : > { %v231_v20 = vmax.f32 %v462_v5, %v478_v10  ;;  %v232_v22 = vmax.f32 %v463_v12, %v479_v13  ;;  %v438_v37 = vunpack.c.l.bf16 %v493_v24  ;;  %v454_v38 = vunpack.c.l.bf16 %v497_v25  ;;  %v502_v50 = vld [vmem:[%s589_s13 + $0x58] sm:$0xff]  }
  0x16   : > { %v233_v33 = vmax.f32 %v466_v19, %v482_v23  ;;  %v470_v39 = vunpack.c.l.bf16 %v501_v26  ;;  %v234_v43 = vmax.f32 %v467_v30, %v483_v34  ;;  %v486_v47 = vunpack.c.l.bf16 %v505_v35  ;;  %v506_v51 = vld [vmem:[%s589_s13 + $0x78] sm:$0xff]  }
  0x17   : > { %v239_v31 = vmax.f32 %v189_v16, %v231_v20  ;;  %v240_v32 = vmax.f32 %v190_v21, %v232_v22  ;;  %v193_v46 = vmax.f32 %v438_v37, %v454_v38  ;;  %v439_v48 = vunpack.c.h.bf16 %v493_v24 }
  0x18   : > { %v241_v42 = vmax.f32 %v191_v27, %v233_v33  ;;  %v455_v49 = vunpack.c.h.bf16 %v497_v25  ;;  %v242_v53 = vmax.f32 %v192_v36, %v234_v43  ;;  %v471_v54 = vunpack.c.h.bf16 %v501_v26 }
  0x19   : > { %v420_v40 = vpack.c.bf16 %v239_v31, %v239_v31  ;;  %v421_v41 = vpack.c.bf16 %v240_v32, %v240_v32  ;;  %v487_v55 = vunpack.c.h.bf16 %v505_v35  ;;  %v235_v56 = vmax.f32 %v470_v39, %v486_v47 }
  0x1a   : > { %v422_v52 = vpack.c.bf16 %v241_v42, %v241_v42  ;;  %v194_v57 = vmax.f32 %v439_v48, %v455_v49  ;;  %v442_v58 = vunpack.c.l.bf16 %v494_v44  ;;  %v458_v59 = vunpack.c.l.bf16 %v498_v45 }
  0x1b   : > { %280 = vst.msk [vmem:[%s607_s17] sm:$0xf] %vm279_vm0, %v420_v40  ;;  %281 = vst.msk [vmem:[%s607_s17 + $0x4] sm:$0xf] %vm279_vm0, %v421_v41  ;;  %v423_v60 = vpack.c.bf16 %v242_v53, %v242_v53  ;;  %v236_v61 = vmax.f32 %v471_v54, %v487_v55  ;;  %v474_v62 = vunpack.c.l.bf16 %v502_v50  ;;  %v490_v63 = vunpack.c.l.bf16 %v506_v51 }
  0x1c   : > { %282 = vst.msk [vmem:[%s607_s17 + $0x8] sm:$0xf] %vm279_vm0, %v422_v52  ;;  %v243_v0 = vmax.f32 %v193_v46, %v235_v56  ;;  %v195_v1 = vmax.f32 %v442_v58, %v458_v59  ;;  %v443_v2 = vunpack.c.h.bf16 %v494_v44  ;;  %v459_v3 = vunpack.c.h.bf16 %v498_v45 }
  0x1d   : > { %283 = vst.msk [vmem:[%s607_s17 + $0xc] sm:$0xf] %vm279_vm0, %v423_v60  ;;  %v244_v4 = vmax.f32 %v194_v57, %v236_v61  ;;  %v237_v5 = vmax.f32 %v474_v62, %v490_v63  ;;  %v475_v6 = vunpack.c.h.bf16 %v502_v50  ;;  %v491_v7 = vunpack.c.h.bf16 %v506_v51 }
  0x1e   : > { %v424_v8 = vpack.c.bf16 %v243_v0, %v243_v0  ;;  %v196_v9 = vmax.f32 %v443_v2, %v459_v3 }
  0x1f   : > { %v425_v10 = vpack.c.bf16 %v244_v4, %v244_v4  ;;  %v245_v11 = vmax.f32 %v195_v1, %v237_v5  ;;  %v238_v12 = vmax.f32 %v475_v6, %v491_v7 }
  0x20   : > { %284 = vst.msk [vmem:[%s607_s17 + $0x10] sm:$0xf] %vm279_vm0, %v424_v8 }
  0x21   : > { %285 = vst.msk [vmem:[%s607_s17 + $0x14] sm:$0xf] %vm279_vm0, %v425_v10  ;;  %v426_v13 = vpack.c.bf16 %v245_v11, %v245_v11  ;;  %v246_v14 = vmax.f32 %v196_v9, %v238_v12 }
  0x23   : > { %286 = vst.msk [vmem:[%s607_s17 + $0x18] sm:$0xf] %vm279_vm0, %v426_v13  ;;  %v427_v15 = vpack.c.bf16 %v246_v14, %v246_v14 }
  0x25   : > { %287 = vst.msk [vmem:[%s607_s17 + $0x1c] sm:$0xf] %vm279_vm0, %v427_v15 }
  0x26 PF: > { %s11_s8 = sadd.s32 1, %s553_s8   ;;  %s640_s6 = smov %s549_s7 }
  0x27   : > { %p8_p5 = scmp.ge.s32.totalorder %s11_s8, 4   ;;  %s641_s7 = smov %s643_s9 }
  0x29   :  { %10 = sbr.rel (!%p8_p5) target bundleno = 2 (0x2), region = 57 }

// kernel: compact_segmentation_forward.9
= control target key start
LH: loop header
LB: loop body
LE: loop exit
PB: predicated region body
PF: predicated region fallthrough
CT: control target
= control target key end

     0   :  { %s1204_s15 = smov 0   ;;  %s1206_s16 = smov 0   ;;  %s1424_s0 = inlined_call_operand.vmem [shape: bf16[2,256,27], index: 0, kind: input, shape index: {}]   ;;  %s1425_s1 = inlined_call_operand.vmem [shape: bf16[27,32], index: 1, kind: input, shape index: {}]   ;;  %s1426_s2 = inlined_call_operand.vmem [shape: f32[1,32], index: 2, kind: input, shape index: {}]   ;;  %s1427_s3 = inlined_call_operand.vmem [shape: f32[1,32], index: 3, kind: input, shape index: {}]   ;;  %s1428_s4 = inlined_call_operand.vmem [shape: bf16[2,256,32], index: 4, kind: output, shape index: {}]  }
   0x1   :  { %s1208_s17 = smov 0  }
   0x2 LB: > { %s26_s18 = sadd.s32 1, %s1172_s16  ;;  %p944_p0 = scmp.ge.s32.totalorder %s1176_s17, 1  ;;  %s1176_s17 = sphi %s1208_s17, %s14_s17   ;;  %s1172_s16 = sphi %s1206_s16, %s1430_s16   ;;  %s1168_s15 = sphi %s1204_s15, %s1429_s15  }
   0x3   : > { %p28_p1 = scmp.ge.s32.totalorder %s26_s18, 2  ;;  %p183_p2 = scmp.lt.s32.totalorder %s1176_s17, 3 }
   0x5   : > { %s1432_s18 = smov (%p28_p1, %s26_s18), 0  ;;  %p184_p3 = pnand %p944_p0, %p183_p2 }
   0x6   : > { %p218_p4 = scmp.lt.s32.totalorder (!%p184_p3), %s1168_s15, 1 }
   0x7   : > { %187 = sbr.rel (%p184_p3) target bundleno = 260 (0x104), region = 36 }
   0xc   : > { %v1136_v0 = vld [vmem:[%s1425_s1 + $0x8] sm:$0x3f]   ;;  %vm414_vm0 = vcmask 1044480   ;;  %vm415_vm1 = vcmask 1045504   ;;  %v1178_v1 = vmov 65535   ;;  %v1137_v5 = vld [vmem:[%s1425_s1] sm:$0xff]  }
   0xd   : > { %v416_v2 = vsel %vm414_vm0, 4294967295, %v1178_v1  ;;  %s1434_s15 = smov (!%p218_p4, %s1168_s15), 1  ;;  %vm365_vm2 = vcmask 220160   ;;  %v1273_v22 = vld [vmem:[%s1426_s2] ss:$0 sm:$0xff]  ;;  %vm820_vm3 = vcmask 257024  }
   0xe   : > { %v417_v3 = vsel %vm415_vm1, %v416_v2, 0  ;;  %s1019_s23 = sshll.u32 %s1434_s15, 7  ;;  %v1278_v24 = vld [vmem:[%s1427_s3] ss:$0 sm:$0xff] }
   0xf   : > { %v419_v4 = vand.u32 %v1136_v0, %v417_v3  ;;  %s1236_s26 = scalar_lea.vmem %s1424_s0, %s1019_s23  ;;  %s1293_s7 = scalar_lea.vmem %s1428_s4, %s1019_s23 }
  0x10   : > { %v1138_v6 = vld [vmem:[%s1236_s26] sm:$0xff]   ;;  %v1140_v8 = vld [vmem:[%s1236_s26 + $0x8] sm:$0xff]   ;;  %v1142_v10 = vld [vmem:[%s1236_s26 + $0x10] sm:$0xff]  }
  0x11   : > { %1071 = vmatprep.subr.bf16.mxu0 %v419_v4  ;;  %1107 = vmatprep.subr.bf16.mxu1 %v419_v4  ;;  %v1139_v7 = vld [vmem:[%s1236_s26 + $0x40] sm:$0xff]   ;;  %v1141_v9 = vld [vmem:[%s1236_s26 + $0x48] sm:$0xff]   ;;  %v1143_v11 = vld [vmem:[%s1236_s26 + $0x50] sm:$0xff]  }
  0x12   : > { %1072 = vmatpush3.bf16.msra.mxu0 %v419_v4  ;;  %1109 = vmatpush3.bf16.msra.mxu1 %v419_v4  ;;  %v1144_v12 = vld [vmem:[%s1236_s26 + $0x18] sm:$0xff]   ;;  %v1146_v14 = vld [vmem:[%s1236_s26 + $0x20] sm:$0xff]   ;;  %v1148_v16 = vld [vmem:[%s1236_s26 + $0x28] sm:$0xff]  }
  0x13   : > { %1073 = vmatprep.subr.bf16.mxu0 %v1137_v5  ;;  %1108 = vmatprep.subr.bf16.mxu1 %v1137_v5  ;;  %v1145_v13 = vld [vmem:[%s1236_s26 + $0x58] sm:$0xff]   ;;  %v1147_v15 = vld [vmem:[%s1236_s26 + $0x60] sm:$0xff]   ;;  %v1149_v17 = vld [vmem:[%s1236_s26 + $0x68] sm:$0xff]  }
  0x14   : > { %1075 = vmatprep.mubr.msk.bf16.mxu0 %vm365_vm2, %v1138_v6  ;;  %1091 = vmatprep.mubr.msk.bf16.mxu1 %vm365_vm2, %v1139_v7  ;;  %v1150_v18 = vld [vmem:[%s1236_s26 + $0x30] sm:$0xff]   ;;  %v1152_v20 = vld [vmem:[%s1236_s26 + $0x38] sm:$0xff]  }
  0x15   : > { %v1151_v19 = vld [vmem:[%s1236_s26 + $0x70] sm:$0xff]   ;;  %v1153_v21 = vld [vmem:[%s1236_s26 + $0x78] sm:$0xff]  }
  0x16   : > { %1074 = vmatpush3.bf16.msra.mxu0 %v1137_v5  ;;  %1110 = vmatpush3.bf16.msra.mxu1 %v1137_v5 }
  0x19   : > { %1076 = vmatmul.mubr.msk.bf16.vlgmr.msra.gmra.mxu0 %vm365_vm2, %v1140_v8  ;;  %1092 = vmatmul.mubr.msk.bf16.vlgmr.msra.gmra.mxu1 %vm365_vm2, %v1141_v9 }
  0x1a   : > { %1079 = vmatprep.mubr.msk.bf16.mxu0 %vm365_vm2, %v1142_v10  ;;  %1095 = vmatprep.mubr.msk.bf16.mxu1 %vm365_vm2, %v1143_v11 }
  0x21   : > { %1080 = vmatmul.mubr.msk.bf16.gmra.mxu0 %vm365_vm2, %v1144_v12  ;;  %1096 = vmatmul.mubr.msk.bf16.gmra.mxu1 %vm365_vm2, %v1145_v13 }
  0x22   : > { %1083 = vmatprep.mubr.msk.bf16.mxu0 %vm365_vm2, %v1146_v14  ;;  %1099 = vmatprep.mubr.msk.bf16.mxu1 %vm365_vm2, %v1147_v15 }
  0x29   : > { %1084 = vmatmul.mubr.msk.bf16.gmra.mxu0 %vm365_vm2, %v1148_v16  ;;  %1100 = vmatmul.mubr.msk.bf16.gmra.mxu1 %vm365_vm2, %v1149_v17 }
  0x2a   : > { %1087 = vmatprep.mubr.msk.bf16.mxu0 %vm365_vm2, %v1150_v18  ;;  %1103 = vmatprep.mubr.msk.bf16.mxu1 %vm365_vm2, %v1151_v19 }
  0x31   : > { %1088 = vmatmul.mubr.msk.bf16.gmra.mxu0 %vm365_vm2, %v1152_v20  ;;  %1104 = vmatmul.mubr.msk.bf16.gmra.mxu1 %vm365_vm2, %v1153_v21 }
  0xd9   : > { %v1077_v23 = vpop.f32.mrf.mxu0  ;;  %v1093_v25 = vpop.f32.mrf.mxu1 }
  0xda   : > { %v591_v26 = vmul.f32 %v1077_v23, %v1273_v22  ;;  %v607_v27 = vmul.f32 %v1093_v25, %v1273_v22 }
  0xdb   : > { %v455_v28 = vpop.f32.mrf.mxu0  ;;  %v519_v29 = vpop.f32.mrf.mxu1 }
  0xdc   : > { %v630_v30 = vadd.f32 %v1278_v24, %v591_v26  ;;  %v646_v31 = vadd.f32 %v1278_v24, %v607_v27  ;;  %v589_v32 = vmul.f32 %v1273_v22, %v455_v28  ;;  %v605_v33 = vmul.f32 %v1273_v22, %v519_v29 }
  0xdd   : > { %v1078_v34 = vpop.f32.mrf.mxu0  ;;  %v1094_v35 = vpop.f32.mrf.mxu1 }
  0xde   : > { %v662_v36 = vmax.f32 %v630_v30, 0.0  ;;  %v678_v37 = vmax.f32 %v646_v31, 0.0  ;;  %v628_v38 = vadd.f32 %v1278_v24, %v589_v32  ;;  %v644_v39 = vadd.f32 %v1278_v24, %v605_v33 }
  0xdf   : > { %v592_v40 = vmul.f32 %v1078_v34, %v1273_v22  ;;  %v608_v41 = vmul.f32 %v1094_v35, %v1273_v22  ;;  %v458_v42 = vpop.f32.mrf.mxu0  ;;  %v522_v43 = vpop.f32.mrf.mxu1 }
  0xe0   : > { %v1023_v44 = vpack.c.bf16 %v662_v36, %v662_v36  ;;  %v1039_v45 = vpack.c.bf16 %v678_v37, %v678_v37  ;;  %v660_v46 = vmax.f32 %v628_v38, 0.0  ;;  %v676_v47 = vmax.f32 %v644_v39, 0.0 }
  0xe1   : > { %v631_v48 = vadd.f32 %v1278_v24, %v592_v40  ;;  %v647_v49 = vadd.f32 %v1278_v24, %v608_v41  ;;  %v590_v50 = vmul.f32 %v1273_v22, %v458_v42  ;;  %v606_v51 = vmul.f32 %v1273_v22, %v522_v43  ;;  %v1081_v52 = vpop.f32.mrf.mxu0  ;;  %v1097_v53 = vpop.f32.mrf.mxu1 }
  0xe2   : > { %823 = vst.msk [vmem:[%s1293_s7 + $0x8] sm:$0xf] %vm820_vm3, %v1023_v44  ;;  %839 = vst.msk [vmem:[%s1293_s7 + $0x48] sm:$0xf] %vm820_vm3, %v1039_v45  ;;  %v1021_v54 = vpack.c.bf16 %v660_v46, %v660_v46  ;;  %v1037_v55 = vpack.c.bf16 %v676_v47, %v676_v47  ;;  %v595_v56 = vmul.f32 %v1081_v52, %v1273_v22 }
  0xe3   : > { %v611_v57 = vmul.f32 %v1097_v53, %v1273_v22  ;;  %v663_v58 = vmax.f32 %v631_v48, 0.0  ;;  %v679_v59 = vmax.f32 %v647_v49, 0.0  ;;  %v629_v60 = vadd.f32 %v1278_v24, %v590_v50  ;;  %v471_v62 = vpop.f32.mrf.mxu0  ;;  %v535_v63 = vpop.f32.mrf.mxu1 }
  0xe4   : > { %v645_v61 = vadd.f32 %v1278_v24, %v606_v51  ;;  %821 = vst.msk [vmem:[%s1293_s7] sm:$0xf] %vm820_vm3, %v1021_v54  ;;  %837 = vst.msk [vmem:[%s1293_s7 + $0x40] sm:$0xf] %vm820_vm3, %v1037_v55  ;;  %v634_v0 = vadd.f32 %v1278_v24, %v595_v56  ;;  %v593_v2 = vmul.f32 %v1273_v22, %v471_v62 }
  0xe5   : > { %v650_v1 = vadd.f32 %v1278_v24, %v611_v57  ;;  %v609_v3 = vmul.f32 %v1273_v22, %v535_v63  ;;  %v1024_v4 = vpack.c.bf16 %v663_v58, %v663_v58  ;;  %v1040_v5 = vpack.c.bf16 %v679_v59, %v679_v59  ;;  %v1082_v8 = vpop.f32.mrf.mxu0  ;;  %v1098_v9 = vpop.f32.mrf.mxu1 }
  0xe6   : > { %v661_v6 = vmax.f32 %v629_v60, 0.0  ;;  %v677_v7 = vmax.f32 %v645_v61, 0.0  ;;  %v666_v10 = vmax.f32 %v634_v0, 0.0  ;;  %v632_v12 = vadd.f32 %v1278_v24, %v593_v2 }
  0xe7   : > { %v682_v11 = vmax.f32 %v650_v1, 0.0  ;;  %v648_v13 = vadd.f32 %v1278_v24, %v609_v3  ;;  %824 = vst.msk [vmem:[%s1293_s7 + $0xc] sm:$0xf] %vm820_vm3, %v1024_v4  ;;  %840 = vst.msk [vmem:[%s1293_s7 + $0x4c] sm:$0xf] %vm820_vm3, %v1040_v5  ;;  %v596_v16 = vmul.f32 %v1082_v8, %v1273_v22  ;;  %v612_v17 = vmul.f32 %v1098_v9, %v1273_v22  ;;  %v474_v18 = vpop.f32.mrf.mxu0  ;;  %v538_v19 = vpop.f32.mrf.mxu1 }
  0xe8   : > { %v1022_v14 = vpack.c.bf16 %v661_v6, %v661_v6  ;;  %v1038_v15 = vpack.c.bf16 %v677_v7, %v677_v7  ;;  %v1027_v20 = vpack.c.bf16 %v666_v10, %v666_v10  ;;  %v664_v23 = vmax.f32 %v632_v12, 0.0 }
  0xe9   : > { %v1043_v21 = vpack.c.bf16 %v682_v11, %v682_v11  ;;  %v680_v25 = vmax.f32 %v648_v13, 0.0  ;;  %v635_v26 = vadd.f32 %v1278_v24, %v596_v16  ;;  %v651_v27 = vadd.f32 %v1278_v24, %v612_v17  ;;  %v1085_v30 = vpop.f32.mrf.mxu0  ;;  %v1101_v31 = vpop.f32.mrf.mxu1 }
  0xea   : > { %822 = vst.msk [vmem:[%s1293_s7 + $0x4] sm:$0xf] %vm820_vm3, %v1022_v14  ;;  %838 = vst.msk [vmem:[%s1293_s7 + $0x44] sm:$0xf] %vm820_vm3, %v1038_v15  ;;  %v594_v28 = vmul.f32 %v1273_v22, %v474_v18  ;;  %v610_v29 = vmul.f32 %v1273_v22, %v538_v19  ;;  %v1025_v32 = vpack.c.bf16 %v664_v23, %v664_v23 }
  0xeb   : > { %827 = vst.msk [vmem:[%s1293_s7 + $0x18] sm:$0xf] %vm820_vm3, %v1027_v20  ;;  %843 = vst.msk [vmem:[%s1293_s7 + $0x58] sm:$0xf] %vm820_vm3, %v1043_v21  ;;  %v1041_v33 = vpack.c.bf16 %v680_v25, %v680_v25  ;;  %v599_v34 = vmul.f32 %v1085_v30, %v1273_v22  ;;  %v615_v35 = vmul.f32 %v1101_v31, %v1273_v22  ;;  %v667_v36 = vmax.f32 %v635_v26, 0.0  ;;  %v487_v40 = vpop.f32.mrf.mxu0  ;;  %v551_v41 = vpop.f32.mrf.mxu1 }
  0xec   : > { %v683_v37 = vmax.f32 %v651_v27, 0.0  ;;  %v633_v38 = vadd.f32 %v1278_v24, %v594_v28  ;;  %v649_v39 = vadd.f32 %v1278_v24, %v610_v29  ;;  %825 = vst.msk [vmem:[%s1293_s7 + $0x10] sm:$0xf] %vm820_vm3, %v1025_v32  ;;  %v597_v44 = vmul.f32 %v1273_v22, %v487_v40 }
  0xed   : > { %841 = vst.msk [vmem:[%s1293_s7 + $0x50] sm:$0xf] %vm820_vm3, %v1041_v33  ;;  %v638_v42 = vadd.f32 %v1278_v24, %v599_v34  ;;  %v654_v43 = vadd.f32 %v1278_v24, %v615_v35  ;;  %v613_v45 = vmul.f32 %v1273_v22, %v551_v41  ;;  %v1028_v46 = vpack.c.bf16 %v667_v36, %v667_v36  ;;  %v1086_v50 = vpop.f32.mrf.mxu0  ;;  %v1102_v51 = vpop.f32.mrf.mxu1 }
  0xee   : > { %v1044_v47 = vpack.c.bf16 %v683_v37, %v683_v37  ;;  %v665_v48 = vmax.f32 %v633_v38, 0.0  ;;  %v681_v49 = vmax.f32 %v649_v39, 0.0  ;;  %v636_v54 = vadd.f32 %v1278_v24, %v597_v44 }
  0xef   : > { %v670_v52 = vmax.f32 %v638_v42, 0.0  ;;  %v686_v53 = vmax.f32 %v654_v43, 0.0  ;;  %v652_v55 = vadd.f32 %v1278_v24, %v613_v45  ;;  %828 = vst.msk [vmem:[%s1293_s7 + $0x1c] sm:$0xf] %vm820_vm3, %v1028_v46  ;;  %v600_v58 = vmul.f32 %v1086_v50, %v1273_v22  ;;  %v490_v60 = vpop.f32.mrf.mxu0  ;;  %v554_v61 = vpop.f32.mrf.mxu1 }
  0xf0   : > { %844 = vst.msk [vmem:[%s1293_s7 + $0x5c] sm:$0xf] %vm820_vm3, %v1044_v47  ;;  %v1026_v56 = vpack.c.bf16 %v665_v48, %v665_v48  ;;  %v1042_v57 = vpack.c.bf16 %v681_v49, %v681_v49  ;;  %v616_v59 = vmul.f32 %v1102_v51, %v1273_v22  ;;  %v668_v0 = vmax.f32 %v636_v54, 0.0 }
  0xf1   : > { %v1031_v62 = vpack.c.bf16 %v670_v52, %v670_v52  ;;  %v1047_v63 = vpack.c.bf16 %v686_v53, %v686_v53  ;;  %v684_v1 = vmax.f32 %v652_v55, 0.0  ;;  %v639_v2 = vadd.f32 %v1278_v24, %v600_v58  ;;  %v1089_v6 = vpop.f32.mrf.mxu0  ;;  %v1105_v7 = vpop.f32.mrf.mxu1 }
  0xf2   : > { %826 = vst.msk [vmem:[%s1293_s7 + $0x14] sm:$0xf] %vm820_vm3, %v1026_v56  ;;  %842 = vst.msk [vmem:[%s1293_s7 + $0x54] sm:$0xf] %vm820_vm3, %v1042_v57  ;;  %v655_v3 = vadd.f32 %v1278_v24, %v616_v59  ;;  %v598_v4 = vmul.f32 %v1273_v22, %v490_v60  ;;  %v614_v5 = vmul.f32 %v1273_v22, %v554_v61 }
  0xf3   : > { %831 = vst.msk [vmem:[%s1293_s7 + $0x28] sm:$0xf] %vm820_vm3, %v1031_v62  ;;  %847 = vst.msk [vmem:[%s1293_s7 + $0x68] sm:$0xf] %vm820_vm3, %v1047_v63  ;;  %v1029_v8 = vpack.c.bf16 %v668_v0, %v668_v0  ;;  %v1045_v9 = vpack.c.bf16 %v684_v1, %v684_v1  ;;  %v603_v10 = vmul.f32 %v1089_v6, %v1273_v22  ;;  %v671_v12 = vmax.f32 %v639_v2, 0.0  ;;  %v503_v16 = vpop.f32.mrf.mxu0  ;;  %v567_v17 = vpop.f32.mrf.mxu1 }
  0xf4   : > { %v619_v11 = vmul.f32 %v1105_v7, %v1273_v22  ;;  %v687_v13 = vmax.f32 %v655_v3, 0.0  ;;  %v637_v14 = vadd.f32 %v1278_v24, %v598_v4  ;;  %v653_v15 = vadd.f32 %v1278_v24, %v614_v5 }
  0xf5   : > { %829 = vst.msk [vmem:[%s1293_s7 + $0x20] sm:$0xf] %vm820_vm3, %v1029_v8  ;;  %845 = vst.msk [vmem:[%s1293_s7 + $0x60] sm:$0xf] %vm820_vm3, %v1045_v9  ;;  %v642_v18 = vadd.f32 %v1278_v24, %v603_v10  ;;  %v601_v20 = vmul.f32 %v1273_v22, %v503_v16  ;;  %v617_v21 = vmul.f32 %v1273_v22, %v567_v17  ;;  %v1090_v28 = vpop.f32.mrf.mxu0  ;;  %v1106_v29 = vpop.f32.mrf.mxu1 }
  0xf6   : > { %v658_v19 = vadd.f32 %v1278_v24, %v619_v11  ;;  %v1032_v23 = vpack.c.bf16 %v671_v12, %v671_v12  ;;  %v1048_v25 = vpack.c.bf16 %v687_v13, %v687_v13  ;;  %v669_v26 = vmax.f32 %v637_v14, 0.0 }
  0xf7   : > { %v685_v27 = vmax.f32 %v653_v15, 0.0  ;;  %v674_v30 = vmax.f32 %v642_v18, 0.0  ;;  %v640_v32 = vadd.f32 %v1278_v24, %v601_v20  ;;  %v656_v33 = vadd.f32 %v1278_v24, %v617_v21  ;;  %v506_v38 = vpop.f32.mrf.mxu0  ;;  %v570_v39 = vpop.f32.mrf.mxu1 }
  0xf8   : > { %v690_v31 = vmax.f32 %v658_v19, 0.0  ;;  %832 = vst.msk [vmem:[%s1293_s7 + $0x2c] sm:$0xf] %vm820_vm3, %v1032_v23  ;;  %848 = vst.msk [vmem:[%s1293_s7 + $0x6c] sm:$0xf] %vm820_vm3, %v1048_v25  ;;  %v1030_v34 = vpack.c.bf16 %v669_v26, %v669_v26  ;;  %v604_v36 = vmul.f32 %v1090_v28, %v1273_v22  ;;  %v620_v37 = vmul.f32 %v1106_v29, %v1273_v22 }
  0xf9   : > { %v1046_v35 = vpack.c.bf16 %v685_v27, %v685_v27  ;;  %v1035_v40 = vpack.c.bf16 %v674_v30, %v674_v30  ;;  %v672_v42 = vmax.f32 %v640_v32, 0.0  ;;  %v688_v43 = vmax.f32 %v656_v33, 0.0 }
  0xfa   : > { %v1051_v41 = vpack.c.bf16 %v690_v31, %v690_v31  ;;  %830 = vst.msk [vmem:[%s1293_s7 + $0x24] sm:$0xf] %vm820_vm3, %v1030_v34  ;;  %v643_v44 = vadd.f32 %v1278_v24, %v604_v36  ;;  %v659_v45 = vadd.f32 %v1278_v24, %v620_v37  ;;  %v602_v46 = vmul.f32 %v1273_v22, %v506_v38 }
  0xfb   : > { %846 = vst.msk [vmem:[%s1293_s7 + $0x64] sm:$0xf] %vm820_vm3, %v1046_v35  ;;  %v618_v47 = vmul.f32 %v1273_v22, %v570_v39  ;;  %835 = vst.msk [vmem:[%s1293_s7 + $0x38] sm:$0xf] %vm820_vm3, %v1035_v40  ;;  %v1033_v48 = vpack.c.bf16 %v672_v42, %v672_v42  ;;  %v1049_v49 = vpack.c.bf16 %v688_v43, %v688_v43 }
  0xfc   : > { %851 = vst.msk [vmem:[%s1293_s7 + $0x78] sm:$0xf] %vm820_vm3, %v1051_v41  ;;  %v675_v50 = vmax.f32 %v643_v44, 0.0  ;;  %v691_v51 = vmax.f32 %v659_v45, 0.0  ;;  %v641_v52 = vadd.f32 %v1278_v24, %v602_v46 }
  0xfd   : > { %v657_v53 = vadd.f32 %v1278_v24, %v618_v47  ;;  %833 = vst.msk [vmem:[%s1293_s7 + $0x30] sm:$0xf] %vm820_vm3, %v1033_v48  ;;  %849 = vst.msk [vmem:[%s1293_s7 + $0x70] sm:$0xf] %vm820_vm3, %v1049_v49 }
  0xfe   : > { %v1036_v22 = vpack.c.bf16 %v675_v50, %v675_v50  ;;  %v1052_v54 = vpack.c.bf16 %v691_v51, %v691_v51  ;;  %v673_v55 = vmax.f32 %v641_v52, 0.0 }
  0xff   : > { %v689_v56 = vmax.f32 %v657_v53, 0.0 }
 0x100   : > { %836 = vst.msk [vmem:[%s1293_s7 + $0x3c] sm:$0xf] %vm820_vm3, %v1036_v22  ;;  %852 = vst.msk [vmem:[%s1293_s7 + $0x7c] sm:$0xf] %vm820_vm3, %v1052_v54  ;;  %v1034_v57 = vpack.c.bf16 %v673_v55, %v673_v55 }
 0x101   : > { %v1050_v58 = vpack.c.bf16 %v689_v56, %v689_v56 }
 0x102   : > { %834 = vst.msk [vmem:[%s1293_s7 + $0x34] sm:$0xf] %vm820_vm3, %v1034_v57 }
 0x103   : > { %850 = vst.msk [vmem:[%s1293_s7 + $0x74] sm:$0xf] %vm820_vm3, %v1050_v58 }
 0x104 PF: > { %s14_s17 = sadd.s32 1, %s1176_s17   ;;  %s1429_s15 = smov %s1172_s16 }
 0x105   : > { %p11_p5 = scmp.ge.s32.totalorder %s14_s17, 4   ;;  %s1430_s16 = smov %s1432_s18 }
 0x107   :  { %13 = sbr.rel (!%p11_p5) target bundleno = 2 (0x2), region = 66 }

// kernel: compact_segmentation_forward.12
= control target key start
LH: loop header
LB: loop body
LE: loop exit
PB: predicated region body
PF: predicated region fallthrough
CT: control target
= control target key end

     0   :  { %s379_s6 = smov 0   ;;  %s381_s7 = smov 0   ;;  %s412_s0 = inlined_call_operand.vmem [shape: bf16[2,4,16,64], index: 0, kind: input, shape index: {}]   ;;  %s413_s1 = inlined_call_operand.vmem [shape: bf16[2,16,64], index: 1, kind: output, shape index: {}]  }
   0x1   :  { %s383_s8 = smov 0  }
   0x2 LB: > { %s23_s9 = sadd.s32 1, %s363_s7  ;;  %p283_p0 = scmp.ge.s32.totalorder %s367_s8, 1  ;;  %s367_s8 = sphi %s383_s8, %s11_s8   ;;  %s363_s7 = sphi %s381_s7, %s415_s7   ;;  %s359_s6 = sphi %s379_s6, %s414_s6  }
   0x3   : > { %p25_p1 = scmp.ge.s32.totalorder %s23_s9, 2  ;;  %p108_p2 = scmp.lt.s32.totalorder %s367_s8, 3 }
   0x5   : > { %s417_s9 = smov (%p25_p1, %s23_s9), 0  ;;  %p109_p3 = pnand %p283_p0, %p108_p2 }
   0x6   : > { %p137_p4 = scmp.lt.s32.totalorder (!%p109_p3), %s359_s6, 1 }
   0x7   : > { %112 = sbr.rel (%p109_p3) target bundleno = 26 (0x1a), region = 24 }
   0xc   : > { %s419_s6 = smov (!%p137_p4, %s359_s6), 1  ;;  %vm189_vm0 = vcmask 519168  }
   0xd   : > { %s298_s10 = sshll.u32 %s419_s6, 5  ;;  %s299_s14 = sshll.u32 %s419_s6, 3 }
   0xe   : > { %s144_s13 = scalar_lea.vmem %s412_s0, %s298_s10  ;;  %s154_s17 = scalar_lea.vmem %s413_s1, %s299_s14 }
   0xf   : > { %v303_v0 = vld [vmem:[%s144_s13] sm:$0xff]   ;;  %v318_v1 = vld [vmem:[%s144_s13 + $0x8] sm:$0xff]   ;;  %v319_v2 = vld [vmem:[%s144_s13 + $0x10] sm:$0xff]  }
  0x10   : > { %v304_v3 = vunpack.c.l.bf16 %v303_v0  ;;  %v308_v4 = vunpack.c.l.bf16 %v318_v1  ;;  %v312_v5 = vunpack.c.l.bf16 %v319_v2  ;;  %v320_v6 = vld [vmem:[%s144_s13 + $0x18] sm:$0xff]   ;;  %v305_v7 = vunpack.c.h.bf16 %v303_v0 }
  0x11   : > { %v316_v8 = vunpack.c.l.bf16 %v320_v6  ;;  %v309_v9 = vunpack.c.h.bf16 %v318_v1  ;;  %v313_v10 = vunpack.c.h.bf16 %v319_v2  ;;  %v317_v11 = vunpack.c.h.bf16 %v320_v6 }
  0x12   : > { %v165_v12 = vmax.f32 %v304_v3, %v308_v4 }
  0x13   : > { %v177_v13 = vmax.f32 %v312_v5, %v316_v8  ;;  %v166_v14 = vmax.f32 %v305_v7, %v309_v9  ;;  %v178_v15 = vmax.f32 %v313_v10, %v317_v11 }
  0x15   : > { %v179_v16 = vmax.f32 %v165_v12, %v177_v13  ;;  %v180_v17 = vmax.f32 %v166_v14, %v178_v15 }
  0x17   : > { %v300_v18 = vpack.c.bf16 %v179_v16, %v179_v16  ;;  %v301_v19 = vpack.c.bf16 %v180_v17, %v180_v17 }
  0x19   : > { %190 = vst.msk [vmem:[%s154_s17] sm:$0xf] %vm189_vm0, %v300_v18  ;;  %191 = vst.msk [vmem:[%s154_s17 + $0x4] sm:$0xf] %vm189_vm0, %v301_v19 }
  0x1a PF: > { %s11_s8 = sadd.s32 1, %s367_s8   ;;  %s414_s6 = smov %s363_s7 }
  0x1b   : > { %p8_p5 = scmp.ge.s32.totalorder %s11_s8, 4   ;;  %s415_s7 = smov %s417_s9 }
  0x1d   :  { %10 = sbr.rel (!%p8_p5) target bundleno = 2 (0x2), region = 57 }

// kernel: compact_segmentation_forward.11
= control target key start
LH: loop header
LB: loop body
LE: loop exit
PB: predicated region body
PF: predicated region fallthrough
CT: control target
= control target key end

     0   :  { %s1018_s15 = smov 0   ;;  %s1020_s16 = smov 0   ;;  %s1151_s0 = inlined_call_operand.vmem [shape: bf16[2,64,288], index: 0, kind: input, shape index: {}]   ;;  %s1152_s1 = inlined_call_operand.vmem [shape: bf16[288,64], index: 1, kind: input, shape index: {}]   ;;  %s1153_s2 = inlined_call_operand.vmem [shape: f32[1,64], index: 2, kind: input, shape index: {}]   ;;  %s1154_s3 = inlined_call_operand.vmem [shape: f32[1,64], index: 3, kind: input, shape index: {}]   ;;  %s1155_s4 = inlined_call_operand.vmem [shape: bf16[2,64,64], index: 4, kind: output, shape index: {}]  }
   0x1   :  { %s1022_s17 = smov 0  }
   0x2 LB: > { %s26_s18 = sadd.s32 1, %s987_s16  ;;  %p777_p0 = scmp.ge.s32.totalorder %s991_s17, 1  ;;  %s991_s17 = sphi %s1022_s17, %s14_s17   ;;  %s987_s16 = sphi %s1020_s16, %s1157_s16   ;;  %s983_s15 = sphi %s1018_s15, %s1156_s15  }
   0x3   : > { %p28_p1 = scmp.ge.s32.totalorder %s26_s18, 2  ;;  %p184_p2 = scmp.lt.s32.totalorder %s991_s17, 3 }
   0x5   : > { %s1159_s18 = smov (%p28_p1, %s26_s18), 0  ;;  %p185_p3 = pnand %p777_p0, %p184_p2 }
   0x6   : > { %p220_p4 = scmp.lt.s32.totalorder (!%p185_p3), %s983_s15, 1 }
   0x7   : > { %188 = sbr.rel (%p185_p3) target bundleno = 273 (0x111), region = 36 }
   0xc   : > { %v935_v0 = vld [vmem:[%s1152_s1 + $0x78] sm:$0xff]   ;;  %v937_v2 = vld [vmem:[%s1152_s1 + $0x70] sm:$0xff]   ;;  %v939_v4 = vld [vmem:[%s1152_s1 + $0x68] sm:$0xff]   ;;  %s1161_s15 = smov (!%p220_p4, %s983_s15), 1  ;;  %vm461_vm0 = vcmask 261120   ;;  %vm674_vm1 = vcmask 519168  }
   0xd   : > { %v936_v1 = vld [vmem:[%s1152_s1 + $0x38] sm:$0xff]   ;;  %836 = vmatprep.subr.bf16.mxu0 %v935_v0  ;;  %894 = vmatprep.subr.bf16.mxu1 %v935_v0  ;;  %v938_v3 = vld [vmem:[%s1152_s1 + $0x30] sm:$0xff]   ;;  %v940_v5 = vld [vmem:[%s1152_s1 + $0x28] sm:$0xff]   ;;  %s910_s7 = smul.u32 96, %s1161_s15  ;;  %s827_s19 = sshll.u32 %s1161_s15, 5 }
   0xe   : > { %837 = vmatpush3.bf16.msra.mxu0 %v936_v1  ;;  %902 = vmatpush3.bf16.msra.mxu1 %v936_v1  ;;  %v941_v6 = vld [vmem:[%s1152_s1 + $0x60] sm:$0xff]   ;;  %v943_v8 = vld [vmem:[%s1152_s1 + $0x58] sm:$0xff]   ;;  %v945_v10 = vld [vmem:[%s1152_s1 + $0x50] sm:$0xff]   ;;  %s1124_s22 = scalar_lea.vmem %s1155_s4, %s827_s19 }
   0xf   : > { %838 = vmatprep.subr.bf16.mxu0 %v937_v2  ;;  %895 = vmatprep.subr.bf16.mxu1 %v937_v2  ;;  %v942_v7 = vld [vmem:[%s1152_s1 + $0x20] sm:$0xff]   ;;  %s1069_s14 = scalar_lea.vmem %s1151_s0, %s910_s7  ;;  %v944_v9 = vld [vmem:[%s1152_s1 + $0x18] sm:$0xff]   ;;  %v946_v13 = vld [vmem:[%s1152_s1 + $0x10] sm:$0xff]  }
  0x10   : > { %v953_v11 = vld [vmem:[%s1069_s14 + $0x4] ss:$12 sps:$4 sm:$0xff]   ;;  %v956_v12 = vld [vmem:[%s1069_s14 + $0x4c] ss:$12 sps:$4 sm:$0xff]   ;;  %v954_v20 = vld [vmem:[%s1069_s14 + $0x48] ss:$12 sps:$4 sm:$0xff]  }
  0x11   : > { %v947_v14 = vld [vmem:[%s1152_s1 + $0x48] sm:$0xff]   ;;  %506 = vmatprep.mubr.bf16.mxu0 %v953_v11  ;;  %530 = vmatprep.mubr.bf16.mxu1 %v956_v12  ;;  %v949_v16 = vld [vmem:[%s1152_s1 + $0x40] sm:$0xff]   ;;  %v967_v28 = vld [vmem:[%s1069_s14 + $0x30] ss:$12 sps:$4 sm:$0xff]  }
  0x12   : > { %839 = vmatpush3.bf16.msra.mxu0 %v938_v3  ;;  %903 = vmatpush3.bf16.msra.mxu1 %v938_v3  ;;  %v948_v15 = vld [vmem:[%s1152_s1 + $0x8] sm:$0xff]   ;;  %v950_v17 = vld [vmem:[%s1152_s1] sm:$0xff]   ;;  %v968_v29 = vld [vmem:[%s1069_s14 + $0x50] ss:$12 sps:$4 sm:$0xff]  }
  0x13   : > { %840 = vmatprep.subr.bf16.mxu0 %v939_v4  ;;  %896 = vmatprep.subr.bf16.mxu1 %v939_v4  ;;  %v957_v18 = vld [vmem:[%s1152_s1 + $0x88] sm:$0xff]   ;;  %v958_v22 = vld [vmem:[%s1152_s1 + $0x80] sm:$0xff]  }
  0x14   : > { %v951_v19 = vld [vmem:[%s1069_s14] ss:$12 sps:$4 sm:$0xff]   ;;  %v959_v21 = vld [vmem:[%s1069_s14 + $0x1c] ss:$12 sps:$4 sm:$0xff]   ;;  %v962_v24 = vld [vmem:[%s1069_s14 + $0x18] ss:$12 sps:$4 sm:$0xff]  }
  0x15   : > { %v961_v23 = vld [vmem:[%s1069_s14 + $0x8] ss:$12 sps:$4 sm:$0xff]   ;;  %v963_v25 = vld [vmem:[%s1069_s14 + $0x20] ss:$12 sps:$4 sm:$0xff]   ;;  %v966_v27 = vld [vmem:[%s1069_s14 + $0x38] ss:$12 sps:$4 sm:$0xff]  }
  0x16   : > { %841 = vmatpush3.bf16.msra.mxu0 %v940_v5  ;;  %904 = vmatpush3.bf16.msra.mxu1 %v940_v5  ;;  %v964_v26 = vld [vmem:[%s1069_s14 + $0x34] ss:$12 sps:$4 sm:$0xff]  }
  0x17   : > { %842 = vmatprep.subr.bf16.mxu0 %v941_v6  ;;  %897 = vmatprep.subr.bf16.mxu1 %v941_v6  ;;  %v815_v42 = vld [vmem:[%s1153_s2] ss:$0 sm:$0xff] }
  0x18   : > { %v816_v46 = vld [vmem:[%s1154_s3] ss:$0 sm:$0xff] }
  0x1a   : > { %843 = vmatpush3.bf16.msra.mxu0 %v942_v7  ;;  %905 = vmatpush3.bf16.msra.mxu1 %v942_v7 }
  0x1b   : > { %844 = vmatprep.subr.bf16.mxu0 %v943_v8  ;;  %898 = vmatprep.subr.bf16.mxu1 %v943_v8 }
  0x1e   : > { %845 = vmatpush3.bf16.msra.mxu0 %v944_v9  ;;  %906 = vmatpush3.bf16.msra.mxu1 %v944_v9 }
  0x1f   : > { %846 = vmatprep.subr.bf16.mxu0 %v945_v10  ;;  %899 = vmatprep.subr.bf16.mxu1 %v945_v10 }
  0x22   : > { %847 = vmatpush3.bf16.msra.mxu0 %v946_v13  ;;  %907 = vmatpush3.bf16.msra.mxu1 %v946_v13 }
  0x23   : > { %848 = vmatprep.subr.bf16.mxu0 %v947_v14  ;;  %900 = vmatprep.subr.bf16.mxu1 %v947_v14 }
  0x26   : > { %849 = vmatpush3.bf16.msra.mxu0 %v948_v15  ;;  %908 = vmatpush3.bf16.msra.mxu1 %v948_v15 }
  0x27   : > { %850 = vmatprep.subr.bf16.mxu0 %v949_v16  ;;  %901 = vmatprep.subr.bf16.mxu1 %v949_v16 }
  0x2a   : > { %851 = vmatpush3.bf16.msra.mxu0 %v950_v17  ;;  %909 = vmatpush3.bf16.msra.mxu1 %v950_v17 }
  0x2b   : > { %882 = vmatprep.subr.bf16.mxu1 %v957_v18 }
  0x2d   : > { %507 = vmatmul.mubr.bf16.vlgmr.msra.gmra.mxu0 %v951_v19  ;;  %531 = vmatmul.mubr.bf16.vlgmr.msra.gmra.mxu1 %v954_v20 }
  0x2e   : > { %883 = vmatpush3.bf16.msra.mxu1 %v957_v18  ;;  %514 = vmatprep.mubr.bf16.mxu0 %v959_v21 }
  0x2f   : > { %884 = vmatprep.subr.bf16.mxu1 %v958_v22  ;;  %886 = vmatprep.mubr.msk.bf16.mxu1 %vm461_vm0, %v961_v23 }
  0x32   : > { %885 = vmatpush3.bf16.msra.mxu1 %v958_v22 }
  0x35   : > { %515 = vmatmul.mubr.bf16.gmra.mxu0 %v962_v24  ;;  %887 = vmatmul.mubr.msk.bf16.vlgmr.msra.gmra.mxu1 %vm461_vm0, %v963_v25 }
  0x36   : > { %522 = vmatprep.mubr.bf16.mxu0 %v964_v26  ;;  %890 = vmatprep.mubr.msk.bf16.mxu1 %vm461_vm0, %v966_v27 }
  0x3d   : > { %523 = vmatmul.mubr.bf16.gmra.mxu0 %v967_v28  ;;  %891 = vmatmul.mubr.msk.bf16.gmra.mxu1 %vm461_vm0, %v968_v29 }
  0xed   : > { %v852_v30 = vpop.f32.mrf.mxu0  ;;  %v870_v31 = vpop.f32.mrf.mxu1 }
  0xef   : > { %v853_v32 = vpop.f32.mrf.mxu0  ;;  %v871_v33 = vpop.f32.mrf.mxu1 }
  0xf0   : > { %v854_v40 = vadd.f32 %v853_v32, %v852_v30  ;;  %v872_v58 = vadd.f32 %v871_v33, %v870_v31 }
  0xf1   : > { %v855_v34 = vpop.f32.mrf.mxu0  ;;  %v873_v35 = vpop.f32.mrf.mxu1 }
  0xf3   : > { %v856_v36 = vpop.f32.mrf.mxu0  ;;  %v874_v37 = vpop.f32.mrf.mxu1 }
  0xf4   : > { %v857_v49 = vadd.f32 %v856_v36, %v855_v34  ;;  %v875_v1 = vadd.f32 %v874_v37, %v873_v35 }
  0xf5   : > { %v858_v38 = vpop.f32.mrf.mxu0  ;;  %v888_v39 = vpop.f32.mrf.mxu1 }
  0xf7   : > { %v859_v41 = vpop.f32.mrf.mxu0  ;;  %v573_v43 = vpop.f32.mrf.mxu1 }
  0xf8   : > { %v860_v44 = vadd.f32 %v859_v41, %v858_v38  ;;  %v574_v45 = vadd.f32 %v854_v40, %v573_v43 }
  0xf9   : > { %v861_v47 = vpop.f32.mrf.mxu0  ;;  %v889_v48 = vpop.f32.mrf.mxu1 }
  0xfa   : > { %v582_v50 = vadd.f32 %v888_v39, %v860_v44  ;;  %v611_v51 = vmul.f32 %v815_v42, %v574_v45 }
  0xfb   : > { %v862_v52 = vpop.f32.mrf.mxu0  ;;  %v576_v53 = vpop.f32.mrf.mxu1 }
  0xfc   : > { %v613_v54 = vmul.f32 %v815_v42, %v582_v50  ;;  %v626_v55 = vadd.f32 %v816_v46, %v611_v51  ;;  %v863_v56 = vadd.f32 %v862_v52, %v861_v47  ;;  %v577_v57 = vadd.f32 %v857_v49, %v576_v53 }
  0xfd   : > { %v864_v59 = vpop.f32.mrf.mxu0  ;;  %v892_v60 = vpop.f32.mrf.mxu1 }
  0xfe   : > { %v628_v61 = vadd.f32 %v816_v46, %v613_v54  ;;  %v634_v62 = vmax.f32 %v626_v55, 0.0  ;;  %v585_v63 = vadd.f32 %v889_v48, %v863_v56  ;;  %v612_v0 = vmul.f32 %v815_v42, %v577_v57 }
  0xff   : > { %v598_v2 = vadd.f32 %v892_v60, %v872_v58  ;;  %v865_v3 = vpop.f32.mrf.mxu0  ;;  %v589_v4 = vpop.f32.mrf.mxu1 }
 0x100   : > { %v636_v5 = vmax.f32 %v628_v61, 0.0  ;;  %v828_v6 = vpack.c.bf16 %v634_v62, %v634_v62  ;;  %v614_v7 = vmul.f32 %v815_v42, %v585_v63  ;;  %v627_v8 = vadd.f32 %v816_v46, %v612_v0 }
 0x101   : > { %v617_v9 = vmul.f32 %v815_v42, %v598_v2  ;;  %v866_v10 = vadd.f32 %v865_v3, %v864_v59  ;;  %v867_v11 = vpop.f32.mrf.mxu0  ;;  %v893_v12 = vpop.f32.mrf.mxu1 }
 0x102   : > { %v830_v13 = vpack.c.bf16 %v636_v5, %v636_v5  ;;  %675 = vst.msk [vmem:[%s1124_s22] sm:$0xf] %vm674_vm1, %v828_v6  ;;  %v629_v14 = vadd.f32 %v816_v46, %v614_v7  ;;  %v635_v15 = vmax.f32 %v627_v8, 0.0  ;;  %v601_v16 = vadd.f32 %v893_v12, %v875_v1 }
 0x103   : > { %v632_v17 = vadd.f32 %v816_v46, %v617_v9  ;;  %v590_v18 = vadd.f32 %v866_v10, %v589_v4  ;;  %v868_v19 = vpop.f32.mrf.mxu0  ;;  %v592_v26 = vpop.f32.mrf.mxu1 }
 0x104   : > { %677 = vst.msk [vmem:[%s1124_s22 + $0x8] sm:$0xf] %vm674_vm1, %v830_v13  ;;  %v637_v20 = vmax.f32 %v629_v14, 0.0  ;;  %v829_v21 = vpack.c.bf16 %v635_v15, %v635_v15  ;;  %v618_v22 = vmul.f32 %v815_v42, %v601_v16  ;;  %v869_v23 = vadd.f32 %v868_v19, %v867_v11 }
 0x105   : > { %v640_v24 = vmax.f32 %v632_v17, 0.0  ;;  %v615_v25 = vmul.f32 %v815_v42, %v590_v18 }
 0x106   : > { %v831_v27 = vpack.c.bf16 %v637_v20, %v637_v20  ;;  %676 = vst.msk [vmem:[%s1124_s22 + $0x4] sm:$0xf] %vm674_vm1, %v829_v21  ;;  %v633_v28 = vadd.f32 %v816_v46, %v618_v22  ;;  %v593_v29 = vadd.f32 %v869_v23, %v592_v26 }
 0x107   : > { %v834_v30 = vpack.c.bf16 %v640_v24, %v640_v24  ;;  %v630_v31 = vadd.f32 %v816_v46, %v615_v25 }
 0x108   : > { %678 = vst.msk [vmem:[%s1124_s22 + $0xc] sm:$0xf] %vm674_vm1, %v831_v27  ;;  %v641_v32 = vmax.f32 %v633_v28, 0.0  ;;  %v616_v33 = vmul.f32 %v815_v42, %v593_v29 }
 0x109   : > { %681 = vst.msk [vmem:[%s1124_s22 + $0x18] sm:$0xf] %vm674_vm1, %v834_v30  ;;  %v638_v34 = vmax.f32 %v630_v31, 0.0 }
 0x10a   : > { %v835_v35 = vpack.c.bf16 %v641_v32, %v641_v32  ;;  %v631_v36 = vadd.f32 %v816_v46, %v616_v33 }
 0x10b   : > { %v832_v37 = vpack.c.bf16 %v638_v34, %v638_v34 }
 0x10c   : > { %682 = vst.msk [vmem:[%s1124_s22 + $0x1c] sm:$0xf] %vm674_vm1, %v835_v35  ;;  %v639_v38 = vmax.f32 %v631_v36, 0.0 }
 0x10d   : > { %679 = vst.msk [vmem:[%s1124_s22 + $0x10] sm:$0xf] %vm674_vm1, %v832_v37 }
 0x10e   : > { %v833_v39 = vpack.c.bf16 %v639_v38, %v639_v38 }
 0x110   : > { %680 = vst.msk [vmem:[%s1124_s22 + $0x14] sm:$0xf] %vm674_vm1, %v833_v39 }
 0x111 PF: > { %s14_s17 = sadd.s32 1, %s991_s17   ;;  %s1156_s15 = smov %s987_s16 }
 0x112   : > { %p11_p5 = scmp.ge.s32.totalorder %s14_s17, 4   ;;  %s1157_s16 = smov %s1159_s18 }
 0x114   :  { %13 = sbr.rel (!%p11_p5) target bundleno = 2 (0x2), region = 66 }

// kernel: tile.23
= control target key start
LH: loop header
LB: loop body
LE: loop exit
PB: predicated region body
PF: predicated region fallthrough
CT: control target
= control target key end

     0   :  { %s22_s0 = inlined_call_operand.vmem [shape: f32[64], index: 0, kind: input, shape index: {}]   ;;  %s23_s1 = inlined_call_operand.vmem [shape: f32[4,64], index: 1, kind: output, shape index: {}]  }
   0x1   :  { %v4_v0 = vld [vmem:[%s22_s0] ss:$0 sm:$0xff] }
   0x2   :  { %5 = vst [vmem:[%s23_s1] sm:$0xf] %v4_v0 }

// kernel: tile.24
= control target key start
LH: loop header
LB: loop body
LE: loop exit
PB: predicated region body
PF: predicated region fallthrough
CT: control target
= control target key end

     0   :  { %s7_s8 = smov 3  ;;  %vm9_vm0 = vcmask 523264   ;;  %s34_s9 = smov 64   ;;  %vm16_vm1 = vcmask 1048064   ;;  %s54_s0 = inlined_call_operand.vmem [shape: f32[4,64], index: 0, kind: input, shape index: {}]   ;;  %s55_s1 = inlined_call_operand.vmem [shape: f32[1,256], index: 1, kind: output, shape index: {}]  }
   0x1   :  { %v5_v0 = vld [vmem:[%s54_s0] sm:$0xf]  ;;  %s12_s0 = smov 3 }
   0x2   :  { %6 = vst [vmem:[#allocation1] sm:$0xf] %v5_v0 }
   0x9   :  { %v13_v1 = vld [vmem:[#allocation1 + $0x1] ss:$2 sm:%s12_s0]   ;;  %v8_v2 = vld [vmem:[#allocation1] ss:$2 sm:%s7_s8]  }
   0xa   :  { %14 = vrot.lane.b32.xlu0 %v13_v1, %s34_s9  ;;  %10 = vst.msk [vmem:[#allocation0] ss:$8 sm:$0x3] %vm9_vm0, %v8_v2  }
  0x7c   :  { %v15_v3 = vpop.permute.xlu0 %14  }
  0x7d   :  { %17 = vst.msk [vmem:[#allocation0] ss:$8 sm:$0x3] %vm16_vm1, %v15_v3  }
  0x84   :  { %v22_v4 = vld [vmem:[#allocation0] sm:$0x1]  ;;  %v27_v5 = vld [vmem:[#allocation0 + $0x8] sm:$0x1] }
  0x85   :  { %25 = vst [vmem:[%s55_s1] sm:$0x1] %v22_v4  ;;  %32 = vst [vmem:[%s55_s1 + $0x1] sm:$0x1] %v27_v5 }

// kernel: compact_segmentation_forward.14
= control target key start
LH: loop header
LB: loop body
LE: loop exit
PB: predicated region body
PF: predicated region fallthrough
CT: control target
= control target key end

     0   :  { %s765_s18 = smov 0   ;;  %s767_s19 = smov 0   ;;  %s859_s0 = inlined_call_operand.vmem [shape: bf16[2,16,128], index: 0, kind: input, shape index: {}]   ;;  %s860_s1 = inlined_call_operand.vmem [shape: bf16[2,16,256], index: 1, kind: input, shape index: {}]   ;;  %s861_s2 = inlined_call_operand.vmem [shape: bf16[128,256], index: 2, kind: input, shape index: {}]   ;;  %s862_s3 = inlined_call_operand.vmem [shape: f32[1,256], index: 3, kind: input, shape index: {}]   ;;  %s863_s4 = inlined_call_operand.vmem [shape: f32[1,256], index: 4, kind: input, shape index: {}]   ;;  %s864_s5 = inlined_call_operand.vmem [shape: bf16[2,16,256], index: 5, kind: output, shape index: {}]  }
   0x1   :  { %s769_s20 = smov 0  }
   0x2 LB: > { %s27_s21 = sadd.s32 1, %s728_s19  ;;  %p627_p0 = scmp.ge.s32.totalorder %s732_s20, 1  ;;  %s732_s20 = sphi %s769_s20, %s15_s20   ;;  %s728_s19 = sphi %s767_s19, %s866_s19   ;;  %s724_s18 = sphi %s765_s18, %s865_s18  }
   0x3   : > { %p29_p1 = scmp.ge.s32.totalorder %s27_s21, 2  ;;  %p226_p2 = scmp.lt.s32.totalorder %s732_s20, 3 }
   0x5   : > { %s868_s21 = smov (%p29_p1, %s27_s21), 0  ;;  %p227_p3 = pnand %p627_p0, %p226_p2 }
   0x6   : > { %p274_p4 = scmp.lt.s32.totalorder (!%p227_p3), %s724_s18, 1 }
   0x7   : > { %230 = sbr.rel (%p227_p3) target bundleno = 253 (0xfd), region = 40 }
   0xc   : > { %v685_v0 = vld [vmem:[%s861_s2 + $0x74] ss:$8 sps:$4 sm:$0xff]   ;;  %v687_v1 = vld [vmem:[%s861_s2 + $0x70] ss:$8 sps:$4 sm:$0xff]   ;;  %v734_v2 = vmov 0   ;;  %s870_s18 = smov (!%p274_p4, %s724_s18), 1  ;;  %v455_v18 = vlaneseq }
   0xd   : > { %442 = vmatprep.mubr.bf16.mxu0 %v734_v2  ;;  %410 = vmatprep.subr.bf16.mxu0 %v685_v0  ;;  %v688_v3 = vld [vmem:[%s861_s2 + $0x64] ss:$8 sps:$4 sm:$0xff]   ;;  %v690_v4 = vld [vmem:[%s861_s2 + $0x60] ss:$8 sps:$4 sm:$0xff]   ;;  %v691_v5 = vld [vmem:[%s861_s2 + $0x54] ss:$8 sps:$4 sm:$0xff]  }
   0xe   : > { %411 = vmatpush1.bf16.msra.mxu0 %v687_v1  ;;  %s655_s7 = sshll.u32 %s870_s18, 3  ;;  %v693_v6 = vld [vmem:[%s861_s2 + $0x50] ss:$8 sps:$4 sm:$0xff]   ;;  %v694_v7 = vld [vmem:[%s861_s2 + $0x44] ss:$8 sps:$4 sm:$0xff]   ;;  %v456_v19 = vshrl.u32 %v455_v18, 7 }
   0xf   : > { %412 = vmatprep.subr.bf16.mxu0 %v688_v3  ;;  %s281_s14 = scalar_lea.vmem %s859_s0, %s655_s7  ;;  %v696_v8 = vld [vmem:[%s861_s2 + $0x40] ss:$8 sps:$4 sm:$0xff]   ;;  %v697_v9 = vld [vmem:[%s861_s2 + $0x34] ss:$8 sps:$4 sm:$0xff]   ;;  %v699_v10 = vld [vmem:[%s861_s2 + $0x30] ss:$8 sps:$4 sm:$0xff]  }
  0x10   : > { %v700_v11 = vld [vmem:[%s861_s2 + $0x24] ss:$8 sps:$4 sm:$0xff]   ;;  %v702_v12 = vld [vmem:[%s861_s2 + $0x20] ss:$8 sps:$4 sm:$0xff]   ;;  %v703_v13 = vld [vmem:[%s861_s2 + $0x14] ss:$8 sps:$4 sm:$0xff]  }
  0x11   : > { %v705_v14 = vld [vmem:[%s861_s2 + $0x10] ss:$8 sps:$4 sm:$0xff]   ;;  %v706_v15 = vld [vmem:[%s861_s2 + $0x4] ss:$8 sps:$4 sm:$0xff]   ;;  %v708_v16 = vld [vmem:[%s861_s2] ss:$8 sps:$4 sm:$0xff]  }
  0x12   : > { %413 = vmatpush1.bf16.msra.mxu0 %v690_v4  ;;  %v709_v17 = vld [vmem:[%s281_s14] sm:$0xff]   ;;  %v457_v20 = vsub.s32 0, %v456_v19  ;;  %s656_s12 = sshll.u32 %s870_s18, 4  ;;  %v461_v22 = vsub.s32 1, %v456_v19 }
  0x13   : > { %414 = vmatprep.subr.bf16.mxu0 %v691_v5  ;;  %v453_v21 = vld [vmem:[%s862_s3] sm:$0x3]  ;;  %s292_s24 = scalar_lea.vmem %s860_s1, %s656_s12  ;;  %s303_s25 = scalar_lea.vmem %s864_s5, %s656_s12 }
  0x14   : > { %v469_v23 = vld [vmem:[%s863_s4] sm:$0x3]  ;;  %v458_v24 = vrot.slane %v453_v21, %v457_v20  ;;  %v462_v26 = vrot.slane %v453_v21, %v461_v22  ;;  %v486_v36 = vld [vmem:[%s292_s24 + $0x8] sm:$0xff] }
  0x15   : > { %v474_v25 = vrot.slane %v469_v23, %v457_v20  ;;  %v485_v28 = vld [vmem:[%s292_s24] sm:$0xff]  ;;  %v478_v30 = vrot.slane %v469_v23, %v461_v22  ;;  %v489_v40 = vunpack.c.l.bf16 %v486_v36  ;;  %v490_v42 = vunpack.c.h.bf16 %v486_v36 }
  0x16   : > { %415 = vmatpush1.bf16.msra.mxu0 %v693_v6  ;;  %v487_v33 = vunpack.c.l.bf16 %v485_v28  ;;  %v488_v35 = vunpack.c.h.bf16 %v485_v28 }
  0x17   : > { %416 = vmatprep.subr.bf16.mxu0 %v694_v7 }
  0x1a   : > { %417 = vmatpush1.bf16.msra.mxu0 %v696_v8 }
  0x1b   : > { %418 = vmatprep.subr.bf16.mxu0 %v697_v9 }
  0x1e   : > { %419 = vmatpush1.bf16.msra.mxu0 %v699_v10 }
  0x1f   : > { %420 = vmatprep.subr.bf16.mxu0 %v700_v11 }
  0x22   : > { %421 = vmatpush1.bf16.msra.mxu0 %v702_v12 }
  0x23   : > { %422 = vmatprep.subr.bf16.mxu0 %v703_v13 }
  0x26   : > { %423 = vmatpush1.bf16.msra.mxu0 %v705_v14 }
  0x27   : > { %424 = vmatprep.subr.bf16.mxu0 %v706_v15 }
  0x2a   : > { %425 = vmatpush1.bf16.msra.mxu0 %v708_v16 }
  0x2d   : > { %443 = vmatmul.mubr.bf16.vlgmr.msra.gmra.mxu0 %v709_v17 }
  0xed   : > { %v444_v27 = vpop.f32.mrf.mxu0 }
  0xee   : > { %v465_v29 = vmul.f32 %v458_v24, %v444_v27 }
  0xef   : > { %v446_v31 = vpop.f32.mrf.mxu0 }
  0xf0   : > { %v481_v32 = vadd.f32 %v474_v25, %v465_v29  ;;  %v466_v34 = vmul.f32 %v462_v26, %v446_v31 }
  0xf1   : > { %v448_v37 = vpop.f32.mrf.mxu0 }
  0xf2   : > { %v482_v38 = vadd.f32 %v478_v30, %v466_v34  ;;  %v467_v39 = vmul.f32 %v458_v24, %v448_v37  ;;  %v491_v43 = vadd.f32 %v487_v33, %v481_v32 }
  0xf3   : > { %v450_v41 = vpop.f32.mrf.mxu0 }
  0xf4   : > { %v492_v44 = vadd.f32 %v488_v35, %v482_v38  ;;  %v483_v45 = vadd.f32 %v474_v25, %v467_v39  ;;  %v468_v46 = vmul.f32 %v462_v26, %v450_v41 }
  0xf6   : > { %v658_v47 = vpack.c.bf16 %v492_v44, %v491_v43  ;;  %v484_v48 = vadd.f32 %v478_v30, %v468_v46  ;;  %v493_v49 = vadd.f32 %v489_v40, %v483_v45 }
  0xf8   : > { %507 = vst [vmem:[%s303_s25] sm:$0xff] %v658_v47  ;;  %v494_v50 = vadd.f32 %v490_v42, %v484_v48 }
  0xfa   : > { %v659_v51 = vpack.c.bf16 %v494_v50, %v493_v49 }
  0xfc   : > { %508 = vst [vmem:[%s303_s25 + $0x8] sm:$0xff] %v659_v51 }
  0xfd PF: > { %s15_s20 = sadd.s32 1, %s732_s20   ;;  %s865_s18 = smov %s728_s19 }
  0xfe   : > { %p12_p5 = scmp.ge.s32.totalorder %s15_s20, 4   ;;  %s866_s19 = smov %s868_s21 }
 0x100   :  { %14 = sbr.rel (!%p12_p5) target bundleno = 2 (0x2), region = 73 }

// kernel: compact_segmentation_forward.13
= control target key start
LH: loop header
LB: loop body
LE: loop exit
PB: predicated region body
PF: predicated region fallthrough
CT: control target
= control target key end

     0   :  { %s1053_s15 = smov 0   ;;  %s1055_s16 = smov 0   ;;  %s1208_s0 = inlined_call_operand.vmem [shape: bf16[2,16,576], index: 0, kind: input, shape index: {}]   ;;  %s1209_s1 = inlined_call_operand.vmem [shape: bf16[576,128], index: 1, kind: input, shape index: {}]   ;;  %s1210_s2 = inlined_call_operand.vmem [shape: f32[1,128], index: 2, kind: input, shape index: {}]   ;;  %s1211_s3 = inlined_call_operand.vmem [shape: f32[1,128], index: 3, kind: input, shape index: {}]   ;;  %s1212_s4 = inlined_call_operand.vmem [shape: bf16[2,16,128], index: 4, kind: output, shape index: {}]  }
   0x1   :  { %s1057_s17 = smov 0  }
   0x2 LB: > { %s26_s18 = sadd.s32 1, %s1020_s16  ;;  %p811_p0 = scmp.ge.s32.totalorder %s1024_s17, 1  ;;  %s1024_s17 = sphi %s1057_s17, %s14_s17   ;;  %s1020_s16 = sphi %s1055_s16, %s1214_s16   ;;  %s1016_s15 = sphi %s1053_s15, %s1213_s15  }
   0x3   : > { %p28_p1 = scmp.ge.s32.totalorder %s26_s18, 2  ;;  %p184_p2 = scmp.lt.s32.totalorder %s1024_s17, 3 }
   0x5   : > { %s1216_s18 = smov (%p28_p1, %s26_s18), 0  ;;  %p185_p3 = pnand %p811_p0, %p184_p2 }
   0x6   : > { %p220_p4 = scmp.lt.s32.totalorder (!%p185_p3), %s1016_s15, 1 }
   0x7   : > { %188 = sbr.rel (%p185_p3) target bundleno = 270 (0x10e), region = 36 }
   0xc   : > { %v959_v0 = vld [vmem:[%s1209_s1 + $0x78] sm:$0xff]   ;;  %v963_v4 = vld [vmem:[%s1209_s1 + $0x70] sm:$0xff]   ;;  %v967_v8 = vld [vmem:[%s1209_s1 + $0x68] sm:$0xff]   ;;  %s1218_s15 = smov (!%p220_p4, %s1016_s15), 1  ;;  %v1026_v34 = vmov 0.0   ;;  %vm1027_vm0 = vmmov 0  }
   0xd   : > { %v960_v1 = vld [vmem:[%s1209_s1 + $0xf8] sm:$0xff]   ;;  %871 = vmatprep.subr.bf16.mxu0 %v959_v0  ;;  %v964_v5 = vld [vmem:[%s1209_s1 + $0xf0] sm:$0xff]   ;;  %v968_v9 = vld [vmem:[%s1209_s1 + $0xe8] sm:$0xff]   ;;  %s932_s27 = smul.u32 40, %s1218_s15  ;;  %vm560_vm1 = vcmask 523264   ;;  %s863_s7 = sshll.u32 %s1218_s15, 3 }
   0xe   : > { %v961_v2 = vld [vmem:[%s1209_s1 + $0x38] sm:$0xff]   ;;  %893 = vmatprep.subr.bf16.mxu1 %v960_v1  ;;  %v965_v6 = vld [vmem:[%s1209_s1 + $0x30] sm:$0xff]   ;;  %v969_v10 = vld [vmem:[%s1209_s1 + $0x28] sm:$0xff]   ;;  %s238_s10 = scalar_lea.vmem %s1212_s4, %s863_s7 }
   0xf   : > { %v962_v3 = vld [vmem:[%s1209_s1 + $0xb8] sm:$0xff]   ;;  %872 = vmatpush3.bf16.msra.mxu0 %v961_v2  ;;  %v966_v7 = vld [vmem:[%s1209_s1 + $0xb0] sm:$0xff]   ;;  %v970_v11 = vld [vmem:[%s1209_s1 + $0xa8] sm:$0xff]   ;;  %s228_s12 = scalar_lea.vmem %s1208_s0, %s932_s27 }
  0x10   : > { %894 = vmatpush3.bf16.msra.mxu1 %v962_v3  ;;  %873 = vmatprep.subr.bf16.mxu0 %v963_v4  ;;  %v971_v12 = vld [vmem:[%s1209_s1 + $0x60] sm:$0xff]   ;;  %v975_v16 = vld [vmem:[%s1209_s1 + $0x58] sm:$0xff]   ;;  %v979_v20 = vld [vmem:[%s1209_s1 + $0x50] sm:$0xff]  }
  0x11   : > { %895 = vmatprep.subr.bf16.mxu1 %v964_v5  ;;  %v972_v13 = vld [vmem:[%s1209_s1 + $0xe0] sm:$0xff]   ;;  %v976_v17 = vld [vmem:[%s1209_s1 + $0xd8] sm:$0xff]   ;;  %v980_v21 = vld [vmem:[%s1209_s1 + $0xd0] sm:$0xff]  }
  0x12   : > { %v973_v14 = vld [vmem:[%s1209_s1 + $0x20] sm:$0xff]   ;;  %v977_v18 = vld [vmem:[%s1209_s1 + $0x18] sm:$0xff]   ;;  %v981_v22 = vld [vmem:[%s1209_s1 + $0x10] sm:$0xff]  }
  0x13   : > { %874 = vmatpush3.bf16.msra.mxu0 %v965_v6  ;;  %v974_v15 = vld [vmem:[%s1209_s1 + $0xa0] sm:$0xff]   ;;  %v978_v19 = vld [vmem:[%s1209_s1 + $0x98] sm:$0xff]   ;;  %v982_v23 = vld [vmem:[%s1209_s1 + $0x90] sm:$0xff]  }
  0x14   : > { %896 = vmatpush3.bf16.msra.mxu1 %v966_v7  ;;  %875 = vmatprep.subr.bf16.mxu0 %v967_v8  ;;  %v983_v24 = vld [vmem:[%s1209_s1 + $0x48] sm:$0xff]   ;;  %v987_v28 = vld [vmem:[%s1209_s1 + $0x40] sm:$0xff]   ;;  %v997_v37 = vld [vmem:[%s1209_s1 + $0x118] sm:$0xff]  }
  0x15   : > { %897 = vmatprep.subr.bf16.mxu1 %v968_v9  ;;  %v984_v25 = vld [vmem:[%s1209_s1 + $0xc8] sm:$0xff]   ;;  %v988_v29 = vld [vmem:[%s1209_s1 + $0xc0] sm:$0xff]   ;;  %v998_v38 = vld [vmem:[%s1209_s1 + $0x110] sm:$0xff]  }
  0x16   : > { %v985_v26 = vld [vmem:[%s1209_s1 + $0x8] sm:$0xff]   ;;  %v989_v30 = vld [vmem:[%s1209_s1] sm:$0xff]  }
  0x17   : > { %876 = vmatpush3.bf16.msra.mxu0 %v969_v10  ;;  %v986_v27 = vld [vmem:[%s1209_s1 + $0x88] sm:$0xff]   ;;  %v990_v31 = vld [vmem:[%s1209_s1 + $0x80] sm:$0xff]  }
  0x18   : > { %898 = vmatpush3.bf16.msra.mxu1 %v970_v11  ;;  %877 = vmatprep.subr.bf16.mxu0 %v971_v12  ;;  %v991_v32 = vld [vmem:[%s228_s12] ss:$20 sps:$4 sm:$0xff]   ;;  %v993_v33 = vld [vmem:[%s228_s12 + $0x4] ss:$20 sps:$4 sm:$0xff]   ;;  %v994_v35 = vld [vmem:[%s228_s12 + $0x8] ss:$20 sps:$4 sm:$0xff]  }
  0x19   : > { %899 = vmatprep.subr.bf16.mxu1 %v972_v13  ;;  %v996_v36 = vld [vmem:[%s228_s12 + $0xc] ss:$20 sps:$4 sm:$0xff]   ;;  %596 = vmatprep.mubr.bf16.mxu0 %v993_v33  ;;  %v1001_v41 = vld [vmem:[%s228_s12 + $0x10] ss:$20 sps:$4 sm:$0xff]  }
  0x1a   : > { %637 = vmatprep.mubr.bf16.mxu1 %v996_v36  ;;  %v999_v39 = vld [vmem:[%s1209_s1 + $0x108] sm:$0xff]   ;;  %v1000_v40 = vld [vmem:[%s1209_s1 + $0x100] sm:$0xff]  }
  0x1b   : > { %878 = vmatpush3.bf16.msra.mxu0 %v973_v14  ;;  %v857_v56 = vld [vmem:[%s1210_s2] ss:$0 sm:$0xff] }
  0x1c   : > { %900 = vmatpush3.bf16.msra.mxu1 %v974_v15  ;;  %879 = vmatprep.subr.bf16.mxu0 %v975_v16  ;;  %v858_v61 = vld [vmem:[%s1211_s3] ss:$0 sm:$0xff] }
  0x1d   : > { %901 = vmatprep.subr.bf16.mxu1 %v976_v17 }
  0x1f   : > { %880 = vmatpush3.bf16.msra.mxu0 %v977_v18 }
  0x20   : > { %902 = vmatpush3.bf16.msra.mxu1 %v978_v19  ;;  %881 = vmatprep.subr.bf16.mxu0 %v979_v20 }
  0x21   : > { %903 = vmatprep.subr.bf16.mxu1 %v980_v21 }
  0x23   : > { %882 = vmatpush3.bf16.msra.mxu0 %v981_v22 }
  0x24   : > { %904 = vmatpush3.bf16.msra.mxu1 %v982_v23  ;;  %883 = vmatprep.subr.bf16.mxu0 %v983_v24 }
  0x25   : > { %905 = vmatprep.subr.bf16.mxu1 %v984_v25 }
  0x27   : > { %884 = vmatpush3.bf16.msra.mxu0 %v985_v26 }
  0x28   : > { %906 = vmatpush3.bf16.msra.mxu1 %v986_v27  ;;  %885 = vmatprep.subr.bf16.mxu0 %v987_v28 }
  0x29   : > { %907 = vmatprep.subr.bf16.mxu1 %v988_v29 }
  0x2b   : > { %886 = vmatpush3.bf16.msra.mxu0 %v989_v30 }
  0x2c   : > { %908 = vmatpush3.bf16.msra.mxu1 %v990_v31  ;;  %920 = vmatprep.subr.bf16.mxu0 %v1026_v34 }
  0x2e   : > { %597 = vmatmul.mubr.bf16.vlgmr.msra.gmra.mxu0 %v991_v32 }
  0x2f   : > { %638 = vmatmul.mubr.bf16.vlgmr.msra.gmra.mxu1 %v994_v35  ;;  %921 = vmatpush3.bf16.msra.mxu0 %v997_v37 }
  0x30   : > { %922 = vmatprep.subr.bf16.mxu0 %v1026_v34  ;;  %928 = vmatprep.mubr.msk.bf16.mxu0 %vm1027_vm0, %v1026_v34 }
  0x33   : > { %923 = vmatpush3.bf16.msra.mxu0 %v998_v38 }
  0x34   : > { %924 = vmatprep.subr.bf16.mxu0 %v1026_v34 }
  0x37   : > { %925 = vmatpush3.bf16.msra.mxu0 %v999_v39 }
  0x38   : > { %926 = vmatprep.subr.bf16.mxu0 %v1026_v34 }
  0x3b   : > { %927 = vmatpush3.bf16.msra.mxu0 %v1000_v40 }
  0x3e   : > { %929 = vmatmul.mubr.msk.bf16.vlgmr.msra.gmra.mxu0 %vm560_vm1, %v1001_v41 }
  0xee   : > { %v887_v42 = vpop.f32.mrf.mxu0 }
  0xef   : > { %v909_v43 = vpop.f32.mrf.mxu1 }
  0xf0   : > { %v888_v44 = vpop.f32.mrf.mxu0 }
  0xf1   : > { %v910_v45 = vpop.f32.mrf.mxu1  ;;  %v889_v48 = vadd.f32 %v888_v44, %v887_v42 }
  0xf2   : > { %v890_v46 = vpop.f32.mrf.mxu0  ;;  %v911_v49 = vadd.f32 %v910_v45, %v909_v43 }
  0xf3   : > { %v912_v47 = vpop.f32.mrf.mxu1 }
  0xf4   : > { %v891_v50 = vpop.f32.mrf.mxu0  ;;  %v640_v54 = vadd.f32 %v911_v49, %v889_v48 }
  0xf5   : > { %v913_v51 = vpop.f32.mrf.mxu1  ;;  %v892_v52 = vadd.f32 %v891_v50, %v890_v46 }
  0xf6   : > { %v914_v53 = vadd.f32 %v913_v51, %v912_v47 }
  0xf8   : > { %v643_v60 = vadd.f32 %v914_v53, %v892_v52 }
  0xfe   : > { %v680_v55 = vpop.f32.mrf.mxu0 }
  0xff   : > { %v681_v57 = vadd.f32 %v680_v55, %v640_v54 }
 0x100   : > { %v930_v58 = vpop.f32.mrf.mxu0 }
 0x101   : > { %v694_v59 = vmul.f32 %v857_v56, %v681_v57 }
 0x102   : > { %v683_v62 = vpop.f32.mrf.mxu0 }
 0x103   : > { %v684_v63 = vadd.f32 %v683_v62, %v643_v60  ;;  %v703_v1 = vadd.f32 %v858_v61, %v694_v59 }
 0x104   : > { %v931_v0 = vpop.f32.mrf.mxu0 }
 0x105   : > { %v695_v2 = vmul.f32 %v857_v56, %v684_v63  ;;  %v705_v4 = vmax.f32 %v703_v1, 0.0 }
 0x107   : > { %v704_v3 = vadd.f32 %v858_v61, %v695_v2 }
 0x109   : > { %v706_v5 = vmax.f32 %v704_v3, 0.0 }
 0x10b   : > { %v869_v6 = vpack.c.bf16 %v706_v5, %v705_v4 }
 0x10d   : > { %870 = vst [vmem:[%s238_s10] sm:$0xff] %v869_v6  }
 0x10e PF: > { %s14_s17 = sadd.s32 1, %s1024_s17   ;;  %s1213_s15 = smov %s1020_s16 }
 0x10f   : > { %p11_p5 = scmp.ge.s32.totalorder %s14_s17, 4   ;;  %s1214_s16 = smov %s1216_s18 }
 0x111   :  { %13 = sbr.rel (!%p11_p5) target bundleno = 2 (0x2), region = 66 }

// kernel: tile.33
= control target key start
LH: loop header
LB: loop body
LE: loop exit
PB: predicated region body
PF: predicated region fallthrough
CT: control target
= control target key end

     0   :  { %s22_s0 = inlined_call_operand.vmem [shape: f32[32], index: 0, kind: input, shape index: {}]   ;;  %s23_s1 = inlined_call_operand.vmem [shape: f32[4,32], index: 1, kind: output, shape index: {}]  }
   0x1   :  { %v4_v0 = vld [vmem:[%s22_s0] ss:$0 sm:$0xff] }
   0x2   :  { %5 = vst [vmem:[%s23_s1] sm:$0xf] %v4_v0 }

// kernel: tile.34
= control target key start
LH: loop header
LB: loop body
LE: loop exit
PB: predicated region body
PF: predicated region fallthrough
CT: control target
= control target key end

     0   :  { %vm8_vm0 = vcmask 261120   ;;  %s40_s8 = smov 32   ;;  %s41_s9 = smov 64   ;;  %vm14_vm1 = vcmask 1048320   ;;  %vm20_vm2 = vcmask 785920   ;;  %vm26_vm3 = vcmask 523520   ;;  %s58_s0 = inlined_call_operand.vmem [shape: f32[4,32], index: 0, kind: input, shape index: {}]   ;;  %s59_s1 = inlined_call_operand.vmem [shape: f32[1,128], index: 1, kind: output, shape index: {}]  }
   0x1   :  { %v5_v0 = vld [vmem:[%s58_s0] sm:$0xf]  ;;  %s39_s0 = smov 96  }
   0x2   :  { %6 = vst [vmem:[#allocation1] sm:$0xf] %v5_v0 }
   0x9   :  { %v11_v1 = vld [vmem:[#allocation1 + $0x3] sm:$0x1]   ;;  %v23_v2 = vld [vmem:[#allocation1 + $0x1] sm:$0x1]   ;;  %v7_v3 = vld [vmem:[#allocation1] sm:$0x1]  }
   0xa   :  { %12 = vrot.lane.b32.xlu0 %v11_v1, %s39_s0  ;;  %24 = vrot.lane.b32.xlu1 %v23_v2, %s40_s8  ;;  %v17_v4 = vld [vmem:[#allocation1 + $0x2] sm:$0x1]   ;;  %9 = vst.msk [vmem:[#allocation0] sm:$0x1] %vm8_vm0, %v7_v3  }
   0xe   :  { %18 = vrot.lane.b32.xlu0 %v17_v4, %s41_s9 }
  0x7c   :  { %v13_v5 = vpop.permute.xlu0 %12   ;;  %v25_v6 = vpop.permute.xlu1 %24  }
  0x7d   :  { %15 = vst.msk [vmem:[#allocation0] sm:$0x1] %vm14_vm1, %v13_v5  }
  0x80   :  { %v19_v7 = vpop.permute.xlu0 %18  }
  0x81   :  { %21 = vst.msk [vmem:[#allocation0] sm:$0x1] %vm20_vm2, %v19_v7  }
  0x82   :  { %27 = vst.msk [vmem:[#allocation0] sm:$0x1] %vm26_vm3, %v25_v6  }
  0x89   :  { %v32_v8 = vld [vmem:[#allocation0] sm:$0x1] }
  0x8a   :  { %35 = vst [vmem:[%s59_s1] sm:$0x1] %v32_v8 }

// kernel: compact_segmentation_forward.15
= control target key start
LH: loop header
LB: loop body
LE: loop exit
PB: predicated region body
PF: predicated region fallthrough
CT: control target
= control target key end

     0   :  { %s1369_s15 = smov 0   ;;  %s1371_s16 = smov 0   ;;  %s1564_s0 = inlined_call_operand.vmem [shape: bf16[2,64,576], index: 0, kind: input, shape index: {}]   ;;  %s1565_s1 = inlined_call_operand.vmem [shape: bf16[576,64], index: 1, kind: input, shape index: {}]   ;;  %s1566_s2 = inlined_call_operand.vmem [shape: f32[1,64], index: 2, kind: input, shape index: {}]   ;;  %s1567_s3 = inlined_call_operand.vmem [shape: f32[1,64], index: 3, kind: input, shape index: {}]   ;;  %s1568_s4 = inlined_call_operand.vmem [shape: bf16[2,64,64], index: 4, kind: output, shape index: {}]  }
   0x1   :  { %s1373_s17 = smov 0  }
   0x2 LB: > { %s26_s18 = sadd.s32 1, %s1338_s16  ;;  %p1034_p0 = scmp.ge.s32.totalorder %s1342_s17, 1  ;;  %s1342_s17 = sphi %s1373_s17, %s14_s17   ;;  %s1338_s16 = sphi %s1371_s16, %s1570_s16   ;;  %s1334_s15 = sphi %s1369_s15, %s1569_s15  }
   0x3   : > { %p28_p1 = scmp.ge.s32.totalorder %s26_s18, 2  ;;  %p184_p2 = scmp.lt.s32.totalorder %s1342_s17, 3 }
   0x5   : > { %s1572_s18 = smov (%p28_p1, %s26_s18), 0  ;;  %p185_p3 = pnand %p1034_p0, %p184_p2 }
   0x6   : > { %p220_p4 = scmp.lt.s32.totalorder (!%p185_p3), %s1334_s15, 1 }
   0x7   : > { %188 = sbr.rel (%p185_p3) target bundleno = 289 (0x121), region = 36 }
   0xc   : > { %v1256_v0 = vld [vmem:[%s1565_s1 + $0x78] sm:$0xff]   ;;  %v1260_v4 = vld [vmem:[%s1565_s1 + $0x70] sm:$0xff]   ;;  %v1264_v8 = vld [vmem:[%s1565_s1 + $0x68] sm:$0xff]   ;;  %s1574_s15 = smov (!%p220_p4, %s1334_s15), 1  ;;  %vm653_vm0 = vcmask 523264   ;;  %vm931_vm1 = vcmask 519168  }
   0xd   : > { %v1257_v1 = vld [vmem:[%s1565_s1 + $0xf8] sm:$0xff]   ;;  %1119 = vmatprep.subr.bf16.mxu0 %v1256_v0  ;;  %v1261_v5 = vld [vmem:[%s1565_s1 + $0xf0] sm:$0xff]   ;;  %v1265_v9 = vld [vmem:[%s1565_s1 + $0xe8] sm:$0xff]   ;;  %s1231_s27 = smul.u32 160, %s1574_s15  ;;  %s1110_s7 = sshll.u32 %s1574_s15, 5 }
   0xe   : > { %v1258_v2 = vld [vmem:[%s1565_s1 + $0x38] sm:$0xff]   ;;  %1159 = vmatprep.subr.bf16.mxu1 %v1257_v1  ;;  %v1262_v6 = vld [vmem:[%s1565_s1 + $0x30] sm:$0xff]   ;;  %v1266_v10 = vld [vmem:[%s1565_s1 + $0x28] sm:$0xff]   ;;  %s1537_s10 = scalar_lea.vmem %s1568_s4, %s1110_s7 }
   0xf   : > { %v1259_v3 = vld [vmem:[%s1565_s1 + $0xb8] sm:$0xff]   ;;  %1120 = vmatpush3.bf16.msra.mxu0 %v1258_v2  ;;  %v1263_v7 = vld [vmem:[%s1565_s1 + $0xb0] sm:$0xff]   ;;  %v1267_v11 = vld [vmem:[%s1565_s1 + $0xa8] sm:$0xff]   ;;  %s1487_s12 = scalar_lea.vmem %s1564_s0, %s1231_s27 }
  0x10   : > { %1160 = vmatpush3.bf16.msra.mxu1 %v1259_v3  ;;  %1121 = vmatprep.subr.bf16.mxu0 %v1260_v4  ;;  %v1268_v12 = vld [vmem:[%s1565_s1 + $0x60] sm:$0xff]   ;;  %v1272_v16 = vld [vmem:[%s1565_s1 + $0x58] sm:$0xff]   ;;  %v1276_v20 = vld [vmem:[%s1565_s1 + $0x50] sm:$0xff]  }
  0x11   : > { %1161 = vmatprep.subr.bf16.mxu1 %v1261_v5  ;;  %v1269_v13 = vld [vmem:[%s1565_s1 + $0xe0] sm:$0xff]   ;;  %v1273_v17 = vld [vmem:[%s1565_s1 + $0xd8] sm:$0xff]   ;;  %v1277_v21 = vld [vmem:[%s1565_s1 + $0xd0] sm:$0xff]  }
  0x12   : > { %v1270_v14 = vld [vmem:[%s1565_s1 + $0x20] sm:$0xff]   ;;  %v1274_v18 = vld [vmem:[%s1565_s1 + $0x18] sm:$0xff]   ;;  %v1278_v22 = vld [vmem:[%s1565_s1 + $0x10] sm:$0xff]  }
  0x13   : > { %1122 = vmatpush3.bf16.msra.mxu0 %v1262_v6  ;;  %v1271_v15 = vld [vmem:[%s1565_s1 + $0xa0] sm:$0xff]   ;;  %v1275_v19 = vld [vmem:[%s1565_s1 + $0x98] sm:$0xff]   ;;  %v1279_v23 = vld [vmem:[%s1565_s1 + $0x90] sm:$0xff]  }
  0x14   : > { %1162 = vmatpush3.bf16.msra.mxu1 %v1263_v7  ;;  %1123 = vmatprep.subr.bf16.mxu0 %v1264_v8  ;;  %v1280_v24 = vld [vmem:[%s1565_s1 + $0x48] sm:$0xff]   ;;  %v1284_v28 = vld [vmem:[%s1565_s1 + $0x40] sm:$0xff]   ;;  %v1294_v36 = vld [vmem:[%s1565_s1 + $0x118] sm:$0xff]  }
  0x15   : > { %1163 = vmatprep.subr.bf16.mxu1 %v1265_v9  ;;  %v1281_v25 = vld [vmem:[%s1565_s1 + $0xc8] sm:$0xff]   ;;  %v1285_v29 = vld [vmem:[%s1565_s1 + $0xc0] sm:$0xff]   ;;  %v1301_v39 = vld [vmem:[%s1565_s1 + $0x110] sm:$0xff]  }
  0x16   : > { %v1282_v26 = vld [vmem:[%s1565_s1 + $0x8] sm:$0xff]   ;;  %v1286_v30 = vld [vmem:[%s1565_s1] sm:$0xff]   ;;  %v1304_v43 = vld [vmem:[%s1487_s12 + $0x5c] ss:$20 sps:$4 sm:$0xff]  }
  0x17   : > { %1124 = vmatpush3.bf16.msra.mxu0 %v1266_v10  ;;  %v1283_v27 = vld [vmem:[%s1565_s1 + $0x88] sm:$0xff]   ;;  %v1287_v31 = vld [vmem:[%s1565_s1 + $0x80] sm:$0xff]   ;;  %v1309_v48 = vld [vmem:[%s1487_s12 + $0x7c] ss:$20 sps:$4 sm:$0xff]  }
  0x18   : > { %1164 = vmatpush3.bf16.msra.mxu1 %v1267_v11  ;;  %1125 = vmatprep.subr.bf16.mxu0 %v1268_v12  ;;  %v1288_v32 = vld [vmem:[%s1487_s12] ss:$20 sps:$4 sm:$0xff]   ;;  %v1290_v33 = vld [vmem:[%s1487_s12 + $0x4] ss:$20 sps:$4 sm:$0xff]   ;;  %v1291_v34 = vld [vmem:[%s1487_s12 + $0x8] ss:$20 sps:$4 sm:$0xff]  }
  0x19   : > { %1165 = vmatprep.subr.bf16.mxu1 %v1269_v13  ;;  %v1293_v35 = vld [vmem:[%s1487_s12 + $0xc] ss:$20 sps:$4 sm:$0xff]   ;;  %698 = vmatprep.mubr.bf16.mxu0 %v1290_v33  ;;  %v1297_v38 = vld [vmem:[%s1487_s12 + $0x34] ss:$20 sps:$4 sm:$0xff]   ;;  %v1300_v41 = vld [vmem:[%s1487_s12 + $0x30] ss:$20 sps:$4 sm:$0xff]  }
  0x1a   : > { %763 = vmatprep.mubr.bf16.mxu1 %v1293_v35  ;;  %v1295_v37 = vld [vmem:[%s1487_s12 + $0x2c] ss:$20 sps:$4 sm:$0xff]   ;;  %v1299_v40 = vld [vmem:[%s1487_s12 + $0x28] ss:$20 sps:$4 sm:$0xff]   ;;  %v1306_v46 = vld [vmem:[%s1487_s12 + $0x50] ss:$20 sps:$4 sm:$0xff]  }
  0x1b   : > { %1126 = vmatpush3.bf16.msra.mxu0 %v1270_v14  ;;  %v1302_v42 = vld [vmem:[%s1487_s12 + $0x54] ss:$20 sps:$4 sm:$0xff]   ;;  %v1315_v45 = vld [vmem:[%s1565_s1 + $0x100] sm:$0xff]   ;;  %v1307_v47 = vld [vmem:[%s1487_s12 + $0x58] ss:$20 sps:$4 sm:$0xff]  }
  0x1c   : > { %1166 = vmatpush3.bf16.msra.mxu1 %v1271_v15  ;;  %1127 = vmatprep.subr.bf16.mxu0 %v1272_v16  ;;  %v1308_v44 = vld [vmem:[%s1565_s1 + $0x108] sm:$0xff]   ;;  %v1311_v49 = vld [vmem:[%s1487_s12 + $0x84] ss:$20 sps:$4 sm:$0xff]   ;;  %v1314_v51 = vld [vmem:[%s1487_s12 + $0x80] ss:$20 sps:$4 sm:$0xff]  }
  0x1d   : > { %1167 = vmatprep.subr.bf16.mxu1 %v1273_v17  ;;  %v1313_v50 = vld [vmem:[%s1487_s12 + $0x78] ss:$20 sps:$4 sm:$0xff]   ;;  %v1316_v52 = vld [vmem:[%s1487_s12 + $0x10] ss:$20 sps:$4 sm:$0xff]   ;;  %v1317_v53 = vld [vmem:[%s1487_s12 + $0x60] ss:$20 sps:$4 sm:$0xff]  }
  0x1e   : > { %v1318_v54 = vld [vmem:[%s1487_s12 + $0x38] ss:$20 sps:$4 sm:$0xff]   ;;  %v1319_v55 = vld [vmem:[%s1487_s12 + $0x88] ss:$20 sps:$4 sm:$0xff]  }
  0x1f   : > { %1128 = vmatpush3.bf16.msra.mxu0 %v1274_v18 }
  0x20   : > { %1168 = vmatpush3.bf16.msra.mxu1 %v1275_v19  ;;  %1129 = vmatprep.subr.bf16.mxu0 %v1276_v20 }
  0x21   : > { %1169 = vmatprep.subr.bf16.mxu1 %v1277_v21 }
  0x23   : > { %1130 = vmatpush3.bf16.msra.mxu0 %v1278_v22 }
  0x24   : > { %1170 = vmatpush3.bf16.msra.mxu1 %v1279_v23  ;;  %1131 = vmatprep.subr.bf16.mxu0 %v1280_v24 }
  0x25   : > { %1171 = vmatprep.subr.bf16.mxu1 %v1281_v25 }
  0x27   : > { %1132 = vmatpush3.bf16.msra.mxu0 %v1282_v26 }
  0x28   : > { %1172 = vmatpush3.bf16.msra.mxu1 %v1283_v27  ;;  %1133 = vmatprep.subr.bf16.mxu0 %v1284_v28 }
  0x29   : > { %1173 = vmatprep.subr.bf16.mxu1 %v1285_v29 }
  0x2b   : > { %1134 = vmatpush3.bf16.msra.mxu0 %v1286_v30 }
  0x2c   : > { %1174 = vmatpush3.bf16.msra.mxu1 %v1287_v31  ;;  %1207 = vmatprep.subr.bf16.mxu0 %v1294_v36 }
  0x2d   : > { %1223 = vmatprep.subr.bf16.mxu1 %v1294_v36 }
  0x2e   : > { %699 = vmatmul.mubr.bf16.vlgmr.msra.gmra.mxu0 %v1288_v32 }
  0x2f   : > { %764 = vmatmul.mubr.bf16.vlgmr.msra.gmra.mxu1 %v1291_v34  ;;  %1208 = vmatpush3.bf16.msra.mxu0 %v1294_v36 }
  0x30   : > { %1227 = vmatpush3.bf16.msra.mxu1 %v1294_v36  ;;  %706 = vmatprep.mubr.bf16.mxu0 %v1295_v37 }
  0x31   : > { %771 = vmatprep.mubr.bf16.mxu1 %v1297_v38  ;;  %1209 = vmatprep.subr.bf16.mxu0 %v1301_v39  ;;  %v1098_v38 = vld [vmem:[%s1566_s2] ss:$0 sm:$0xff] }
  0x32   : > { %1224 = vmatprep.subr.bf16.mxu1 %v1301_v39 }
  0x33   : > { %1210 = vmatpush3.bf16.msra.mxu0 %v1301_v39 }
  0x34   : > { %1228 = vmatpush3.bf16.msra.mxu1 %v1301_v39  ;;  %1211 = vmatprep.subr.bf16.mxu0 %v1308_v44 }
  0x35   : > { %1225 = vmatprep.subr.bf16.mxu1 %v1308_v44 }
  0x36   : > { %707 = vmatmul.mubr.bf16.gmra.mxu0 %v1299_v40 }
  0x37   : > { %772 = vmatmul.mubr.bf16.gmra.mxu1 %v1300_v41  ;;  %714 = vmatprep.mubr.bf16.mxu0 %v1302_v42 }
  0x38   : > { %779 = vmatprep.mubr.bf16.mxu1 %v1304_v43  ;;  %1212 = vmatpush3.bf16.msra.mxu0 %v1308_v44 }
  0x39   : > { %1229 = vmatpush3.bf16.msra.mxu1 %v1308_v44  ;;  %1213 = vmatprep.subr.bf16.mxu0 %v1315_v45 }
  0x3a   : > { %1226 = vmatprep.subr.bf16.mxu1 %v1315_v45 }
  0x3c   : > { %1214 = vmatpush3.bf16.msra.mxu0 %v1315_v45 }
  0x3d   : > { %1230 = vmatpush3.bf16.msra.mxu1 %v1315_v45 }
  0x3e   : > { %715 = vmatmul.mubr.bf16.gmra.mxu0 %v1306_v46 }
  0x3f   : > { %780 = vmatmul.mubr.bf16.gmra.mxu1 %v1307_v47  ;;  %722 = vmatprep.mubr.bf16.mxu0 %v1309_v48  ;;  %v1099_v47 = vld [vmem:[%s1567_s3] ss:$0 sm:$0xff] }
  0x40   : > { %787 = vmatprep.mubr.bf16.mxu1 %v1311_v49 }
  0x46   : > { %723 = vmatmul.mubr.bf16.gmra.mxu0 %v1313_v50 }
  0x47   : > { %788 = vmatmul.mubr.bf16.gmra.mxu1 %v1314_v51  ;;  %1215 = vmatprep.mubr.msk.bf16.mxu0 %vm653_vm0, %v1316_v52 }
  0x48   : > { %1219 = vmatprep.mubr.msk.bf16.mxu1 %vm653_vm0, %v1317_v53 }
  0x4e   : > { %1216 = vmatmul.mubr.msk.bf16.vlgmr.msra.gmra.mxu0 %vm653_vm0, %v1318_v54 }
  0x4f   : > { %1220 = vmatmul.mubr.msk.bf16.vlgmr.msra.gmra.mxu1 %vm653_vm0, %v1319_v55 }
  0xee   : > { %v1135_v56 = vpop.f32.mrf.mxu0 }
  0xef   : > { %v1175_v57 = vpop.f32.mrf.mxu1 }
  0xf0   : > { %v1136_v58 = vpop.f32.mrf.mxu0 }
  0xf1   : > { %v1176_v59 = vpop.f32.mrf.mxu1  ;;  %v1137_v25 = vadd.f32 %v1136_v58, %v1135_v56 }
  0xf2   : > { %v1138_v60 = vpop.f32.mrf.mxu0  ;;  %v1177_v26 = vadd.f32 %v1176_v59, %v1175_v57 }
  0xf3   : > { %v1178_v61 = vpop.f32.mrf.mxu1 }
  0xf4   : > { %v1139_v62 = vpop.f32.mrf.mxu0  ;;  %v766_v44 = vadd.f32 %v1177_v26, %v1137_v25 }
  0xf5   : > { %v1179_v63 = vpop.f32.mrf.mxu1  ;;  %v1140_v40 = vadd.f32 %v1139_v62, %v1138_v60 }
  0xf6   : > { %v1141_v0 = vpop.f32.mrf.mxu0  ;;  %v1180_v41 = vadd.f32 %v1179_v63, %v1178_v61 }
  0xf7   : > { %v1181_v1 = vpop.f32.mrf.mxu1 }
  0xf8   : > { %v1142_v2 = vpop.f32.mrf.mxu0  ;;  %v769_v63 = vadd.f32 %v1180_v41, %v1140_v40 }
  0xf9   : > { %v1182_v3 = vpop.f32.mrf.mxu1  ;;  %v1143_v19 = vadd.f32 %v1142_v2, %v1141_v0 }
  0xfa   : > { %v1144_v4 = vpop.f32.mrf.mxu0  ;;  %v1183_v20 = vadd.f32 %v1182_v3, %v1181_v1 }
  0xfb   : > { %v1184_v5 = vpop.f32.mrf.mxu1 }
  0xfc   : > { %v1145_v6 = vpop.f32.mrf.mxu0  ;;  %v774_v34 = vadd.f32 %v1183_v20, %v1143_v19 }
  0xfd   : > { %v1185_v7 = vpop.f32.mrf.mxu1  ;;  %v1146_v31 = vadd.f32 %v1145_v6, %v1144_v4 }
  0xfe   : > { %v1147_v8 = vpop.f32.mrf.mxu0  ;;  %v1186_v32 = vadd.f32 %v1185_v7, %v1184_v5 }
  0xff   : > { %v1187_v9 = vpop.f32.mrf.mxu1 }
 0x100   : > { %v1148_v10 = vpop.f32.mrf.mxu0  ;;  %v777_v54 = vadd.f32 %v1186_v32, %v1146_v31 }
 0x101   : > { %v1188_v11 = vpop.f32.mrf.mxu1  ;;  %v1149_v28 = vadd.f32 %v1148_v10, %v1147_v8 }
 0x102   : > { %v1150_v12 = vpop.f32.mrf.mxu0  ;;  %v1189_v29 = vadd.f32 %v1188_v11, %v1187_v9 }
 0x103   : > { %v1190_v13 = vpop.f32.mrf.mxu1 }
 0x104   : > { %v1151_v14 = vpop.f32.mrf.mxu0  ;;  %v782_v50 = vadd.f32 %v1189_v29, %v1149_v28 }
 0x105   : > { %v1191_v15 = vpop.f32.mrf.mxu1  ;;  %v1152_v45 = vadd.f32 %v1151_v14, %v1150_v12 }
 0x106   : > { %v1153_v16 = vpop.f32.mrf.mxu0  ;;  %v1192_v46 = vadd.f32 %v1191_v15, %v1190_v13 }
 0x107   : > { %v1193_v17 = vpop.f32.mrf.mxu1 }
 0x108   : > { %v1154_v18 = vpop.f32.mrf.mxu0  ;;  %v785_v4 = vadd.f32 %v1192_v46, %v1152_v45 }
 0x109   : > { %v1194_v21 = vpop.f32.mrf.mxu1  ;;  %v1155_v22 = vadd.f32 %v1154_v18, %v1153_v16 }
 0x10a   : > { %v1195_v23 = vadd.f32 %v1194_v21, %v1193_v17  ;;  %v1156_v24 = vpop.f32.mrf.mxu0 }
 0x10b   : > { %v1196_v27 = vpop.f32.mrf.mxu1 }
 0x10c   : > { %v1157_v30 = vpop.f32.mrf.mxu0  ;;  %v790_v39 = vadd.f32 %v1195_v23, %v1155_v22 }
 0x10d   : > { %v1197_v33 = vpop.f32.mrf.mxu1  ;;  %v1158_v35 = vadd.f32 %v1157_v30, %v1156_v24 }
 0x10e   : > { %v1198_v36 = vadd.f32 %v1197_v33, %v1196_v27  ;;  %v1217_v37 = vpop.f32.mrf.mxu0 }
 0x10f   : > { %v839_v42 = vadd.f32 %v1217_v37, %v774_v34  ;;  %v1221_v43 = vpop.f32.mrf.mxu1 }
 0x110   : > { %v855_v48 = vadd.f32 %v1221_v43, %v790_v39  ;;  %v830_v49 = vpop.f32.mrf.mxu0  ;;  %v793_v58 = vadd.f32 %v1198_v36, %v1158_v35 }
 0x111   : > { %v870_v51 = vmul.f32 %v1098_v38, %v839_v42  ;;  %v831_v52 = vadd.f32 %v830_v49, %v766_v44  ;;  %v846_v53 = vpop.f32.mrf.mxu1 }
 0x112   : > { %v874_v55 = vmul.f32 %v1098_v38, %v855_v48  ;;  %v847_v56 = vadd.f32 %v846_v53, %v782_v50  ;;  %v1218_v57 = vpop.f32.mrf.mxu0 }
 0x113   : > { %v885_v59 = vadd.f32 %v1099_v47, %v870_v51  ;;  %v868_v60 = vmul.f32 %v1098_v38, %v831_v52  ;;  %v842_v61 = vadd.f32 %v1218_v57, %v777_v54  ;;  %v1222_v62 = vpop.f32.mrf.mxu1 }
 0x114   : > { %v889_v0 = vadd.f32 %v1099_v47, %v874_v55  ;;  %v872_v1 = vmul.f32 %v1098_v38, %v847_v56  ;;  %v858_v2 = vadd.f32 %v1222_v62, %v793_v58  ;;  %v833_v3 = vpop.f32.mrf.mxu0 }
 0x115   : > { %v893_v5 = vmax.f32 %v885_v59, 0.0  ;;  %v883_v6 = vadd.f32 %v1099_v47, %v868_v60  ;;  %v871_v7 = vmul.f32 %v1098_v38, %v842_v61  ;;  %v834_v8 = vadd.f32 %v833_v3, %v769_v63  ;;  %v849_v9 = vpop.f32.mrf.mxu1 }
 0x116   : > { %v897_v10 = vmax.f32 %v889_v0, 0.0  ;;  %v887_v11 = vadd.f32 %v1099_v47, %v872_v1  ;;  %v875_v12 = vmul.f32 %v1098_v38, %v858_v2  ;;  %v850_v13 = vadd.f32 %v849_v9, %v785_v4 }
 0x117   : > { %v1113_v14 = vpack.c.bf16 %v893_v5, %v893_v5  ;;  %v891_v15 = vmax.f32 %v883_v6, 0.0  ;;  %v886_v16 = vadd.f32 %v1099_v47, %v871_v7  ;;  %v869_v17 = vmul.f32 %v1098_v38, %v834_v8 }
 0x118   : > { %v1117_v18 = vpack.c.bf16 %v897_v10, %v897_v10  ;;  %v895_v19 = vmax.f32 %v887_v11, 0.0  ;;  %v890_v20 = vadd.f32 %v1099_v47, %v875_v12  ;;  %v873_v21 = vmul.f32 %v1098_v38, %v850_v13 }
 0x119   : > { %934 = vst.msk [vmem:[%s1537_s10 + $0x8] sm:$0xf] %vm931_vm1, %v1113_v14  ;;  %v1111_v22 = vpack.c.bf16 %v891_v15, %v891_v15  ;;  %v894_v23 = vmax.f32 %v886_v16, 0.0  ;;  %v884_v24 = vadd.f32 %v1099_v47, %v869_v17 }
 0x11a   : > { %938 = vst.msk [vmem:[%s1537_s10 + $0x18] sm:$0xf] %vm931_vm1, %v1117_v18  ;;  %v1115_v25 = vpack.c.bf16 %v895_v19, %v895_v19  ;;  %v898_v26 = vmax.f32 %v890_v20, 0.0  ;;  %v888_v27 = vadd.f32 %v1099_v47, %v873_v21 }
 0x11b   : > { %932 = vst.msk [vmem:[%s1537_s10] sm:$0xf] %vm931_vm1, %v1111_v22  ;;  %v1114_v28 = vpack.c.bf16 %v894_v23, %v894_v23  ;;  %v892_v29 = vmax.f32 %v884_v24, 0.0 }
 0x11c   : > { %936 = vst.msk [vmem:[%s1537_s10 + $0x10] sm:$0xf] %vm931_vm1, %v1115_v25  ;;  %v1118_v30 = vpack.c.bf16 %v898_v26, %v898_v26  ;;  %v896_v31 = vmax.f32 %v888_v27, 0.0 }
 0x11d   : > { %935 = vst.msk [vmem:[%s1537_s10 + $0xc] sm:$0xf] %vm931_vm1, %v1114_v28  ;;  %v1112_v32 = vpack.c.bf16 %v892_v29, %v892_v29 }
 0x11e   : > { %939 = vst.msk [vmem:[%s1537_s10 + $0x1c] sm:$0xf] %vm931_vm1, %v1118_v30  ;;  %v1116_v33 = vpack.c.bf16 %v896_v31, %v896_v31 }
 0x11f   : > { %933 = vst.msk [vmem:[%s1537_s10 + $0x4] sm:$0xf] %vm931_vm1, %v1112_v32 }
 0x120   : > { %937 = vst.msk [vmem:[%s1537_s10 + $0x14] sm:$0xf] %vm931_vm1, %v1116_v33 }
 0x121 PF: > { %s14_s17 = sadd.s32 1, %s1342_s17   ;;  %s1569_s15 = smov %s1338_s16 }
 0x122   : > { %p11_p5 = scmp.ge.s32.totalorder %s14_s17, 4   ;;  %s1570_s16 = smov %s1572_s18 }
 0x124   :  { %13 = sbr.rel (!%p11_p5) target bundleno = 2 (0x2), region = 66 }

// kernel: compact_segmentation_forward.16
= control target key start
LH: loop header
LB: loop body
LE: loop exit
PB: predicated region body
PF: predicated region fallthrough
CT: control target
= control target key end

     0   :  { %s844_s18 = smov 0   ;;  %s846_s19 = smov 0   ;;  %s907_s0 = inlined_call_operand.vmem [shape: bf16[2,64,64], index: 0, kind: input, shape index: {}]   ;;  %s908_s1 = inlined_call_operand.vmem [shape: bf16[2,64,128], index: 1, kind: input, shape index: {}]   ;;  %s909_s2 = inlined_call_operand.vmem [shape: bf16[64,128], index: 2, kind: input, shape index: {}]   ;;  %s910_s3 = inlined_call_operand.vmem [shape: f32[1,128], index: 3, kind: input, shape index: {}]   ;;  %s911_s4 = inlined_call_operand.vmem [shape: f32[1,128], index: 4, kind: input, shape index: {}]   ;;  %s912_s5 = inlined_call_operand.vmem [shape: bf16[2,64,128], index: 5, kind: output, shape index: {}]  }
   0x1   :  { %s848_s20 = smov 0  }
   0x2 LB: > { %s27_s21 = sadd.s32 1, %s808_s19  ;;  %p642_p0 = scmp.ge.s32.totalorder %s812_s20, 1  ;;  %s812_s20 = sphi %s848_s20, %s15_s20   ;;  %s808_s19 = sphi %s846_s19, %s914_s19   ;;  %s804_s18 = sphi %s844_s18, %s913_s18  }
   0x3   : > { %p29_p1 = scmp.ge.s32.totalorder %s27_s21, 2  ;;  %p225_p2 = scmp.lt.s32.totalorder %s812_s20, 3 }
   0x5   : > { %s916_s21 = smov (%p29_p1, %s27_s21), 0  ;;  %p226_p3 = pnand %p642_p0, %p225_p2 }
   0x6   : > { %p271_p4 = scmp.lt.s32.totalorder (!%p226_p3), %s804_s18, 1 }
   0x7   : > { %229 = sbr.rel (%p226_p3) target bundleno = 237 (0xed), region = 40 }
   0xc   : > { %v782_v0 = vld [vmem:[%s909_s2 + $0x18] sm:$0xff]   ;;  %v783_v1 = vld [vmem:[%s909_s2 + $0x10] sm:$0xff]   ;;  %s918_s18 = smov (!%p271_p4, %s804_s18), 1  ;;  %v784_v2 = vld [vmem:[%s909_s2 + $0x8] sm:$0xff]   ;;  %vm361_vm0 = vcmask 523264  }
   0xd   : > { %734 = vmatprep.subr.bf16.mxu0 %v782_v0  ;;  %750 = vmatprep.subr.bf16.mxu1 %v782_v0  ;;  %s871_s28 = sshll.u32 %s918_s18, 5  ;;  %v785_v5 = vld [vmem:[%s909_s2] sm:$0xff]  }
   0xe   : > { %735 = vmatpush3.bf16.msra.mxu0 %v782_v0  ;;  %754 = vmatpush3.bf16.msra.mxu1 %v782_v0  ;;  %s278_s6 = scalar_lea.vmem %s907_s0, %s871_s28  ;;  %s288_s11 = scalar_lea.vmem %s908_s1, %s871_s28  ;;  %v661_v8 = vld [vmem:[%s910_s3] ss:$0 sm:$0xff] }
   0xf   : > { %736 = vmatprep.subr.bf16.mxu0 %v783_v1  ;;  %751 = vmatprep.subr.bf16.mxu1 %v783_v1  ;;  %v786_v3 = vld [vmem:[%s278_s6] sm:$0xff]   ;;  %v787_v4 = vld [vmem:[%s278_s6 + $0x10] sm:$0xff]   ;;  %v788_v6 = vld [vmem:[%s278_s6 + $0x8] sm:$0xff]   ;;  %s298_s18 = scalar_lea.vmem %s912_s5, %s871_s28 }
  0x10   : > { %742 = vmatprep.mubr.msk.bf16.mxu0 %vm361_vm0, %v786_v3  ;;  %746 = vmatprep.mubr.msk.bf16.mxu1 %vm361_vm0, %v787_v4  ;;  %v789_v7 = vld [vmem:[%s278_s6 + $0x18] sm:$0xff]   ;;  %v720_v10 = vld [vmem:[%s288_s11 + $0x8] sm:$0xff]   ;;  %v685_v13 = vld [vmem:[%s288_s11] sm:$0xff]  }
  0x11   : > { %v722_v12 = vld [vmem:[%s288_s11 + $0x18] sm:$0xff]   ;;  %v721_v14 = vld [vmem:[%s288_s11 + $0x10] sm:$0xff]   ;;  %v662_v19 = vld [vmem:[%s911_s4] ss:$0 sm:$0xff]  ;;  %v690_v22 = vunpack.c.l.bf16 %v720_v10  ;;  %v686_v24 = vunpack.c.l.bf16 %v685_v13  ;;  %v691_v28 = vunpack.c.h.bf16 %v720_v10  ;;  %v687_v30 = vunpack.c.h.bf16 %v685_v13 }
  0x12   : > { %737 = vmatpush3.bf16.msra.mxu0 %v783_v1  ;;  %755 = vmatpush3.bf16.msra.mxu1 %v783_v1  ;;  %v698_v23 = vunpack.c.l.bf16 %v722_v12  ;;  %v694_v25 = vunpack.c.l.bf16 %v721_v14  ;;  %v699_v29 = vunpack.c.h.bf16 %v722_v12  ;;  %v695_v31 = vunpack.c.h.bf16 %v721_v14 }
  0x13   : > { %738 = vmatprep.subr.bf16.mxu0 %v784_v2  ;;  %752 = vmatprep.subr.bf16.mxu1 %v784_v2 }
  0x16   : > { %739 = vmatpush3.bf16.msra.mxu0 %v784_v2  ;;  %756 = vmatpush3.bf16.msra.mxu1 %v784_v2 }
  0x17   : > { %740 = vmatprep.subr.bf16.mxu0 %v785_v5  ;;  %753 = vmatprep.subr.bf16.mxu1 %v785_v5 }
  0x1a   : > { %741 = vmatpush3.bf16.msra.mxu0 %v785_v5  ;;  %757 = vmatpush3.bf16.msra.mxu1 %v785_v5 }
  0x1d   : > { %743 = vmatmul.mubr.msk.bf16.vlgmr.msra.gmra.mxu0 %vm361_vm0, %v788_v6  ;;  %747 = vmatmul.mubr.msk.bf16.vlgmr.msra.gmra.mxu1 %vm361_vm0, %v789_v7 }
  0xdd   : > { %v744_v9 = vpop.f32.mrf.mxu0  ;;  %v748_v11 = vpop.f32.mrf.mxu1 }
  0xde   : > { %v448_v15 = vmul.f32 %v744_v9, %v661_v8  ;;  %v452_v16 = vmul.f32 %v748_v11, %v661_v8 }
  0xdf   : > { %v408_v17 = vpop.f32.mrf.mxu0  ;;  %v424_v18 = vpop.f32.mrf.mxu1 }
  0xe0   : > { %v446_v20 = vmul.f32 %v661_v8, %v408_v17  ;;  %v450_v21 = vmul.f32 %v661_v8, %v424_v18  ;;  %v463_v32 = vadd.f32 %v662_v19, %v448_v15  ;;  %v467_v33 = vadd.f32 %v662_v19, %v452_v16 }
  0xe1   : > { %v745_v26 = vpop.f32.mrf.mxu0  ;;  %v749_v27 = vpop.f32.mrf.mxu1 }
  0xe2   : > { %v449_v34 = vmul.f32 %v745_v26, %v661_v8  ;;  %v453_v35 = vmul.f32 %v749_v27, %v661_v8  ;;  %v461_v38 = vadd.f32 %v662_v19, %v446_v20  ;;  %v465_v39 = vadd.f32 %v662_v19, %v450_v21 }
  0xe3   : > { %v411_v36 = vpop.f32.mrf.mxu0  ;;  %v427_v37 = vpop.f32.mrf.mxu1  ;;  %v487_v46 = vadd.f32 %v690_v22, %v463_v32  ;;  %v491_v47 = vadd.f32 %v698_v23, %v467_v33 }
  0xe4   : > { %v447_v40 = vmul.f32 %v661_v8, %v411_v36  ;;  %v451_v41 = vmul.f32 %v661_v8, %v427_v37  ;;  %v464_v42 = vadd.f32 %v662_v19, %v449_v34  ;;  %v468_v43 = vadd.f32 %v662_v19, %v453_v35 }
  0xe5   : > { %v485_v50 = vadd.f32 %v686_v24, %v461_v38  ;;  %v489_v51 = vadd.f32 %v694_v25, %v465_v39 }
  0xe6   : > { %v462_v44 = vadd.f32 %v662_v19, %v447_v40  ;;  %v466_v45 = vadd.f32 %v662_v19, %v451_v41  ;;  %v488_v48 = vadd.f32 %v691_v28, %v464_v42  ;;  %v492_v49 = vadd.f32 %v699_v29, %v468_v43 }
  0xe8   : > { %v486_v52 = vadd.f32 %v687_v30, %v462_v44  ;;  %v490_v53 = vadd.f32 %v695_v31, %v466_v45  ;;  %v708_v54 = vpack.c.bf16 %v488_v48, %v487_v46  ;;  %v718_v55 = vpack.c.bf16 %v492_v49, %v491_v47 }
  0xea   : > { %v703_v56 = vpack.c.bf16 %v486_v52, %v485_v50  ;;  %v713_v57 = vpack.c.bf16 %v490_v53, %v489_v51  ;;  %723 = vst [vmem:[%s298_s18 + $0x8] sm:$0xff] %v708_v54   ;;  %725 = vst [vmem:[%s298_s18 + $0x18] sm:$0xff] %v718_v55  }
  0xec   : > { %704 = vst [vmem:[%s298_s18] sm:$0xff] %v703_v56   ;;  %724 = vst [vmem:[%s298_s18 + $0x10] sm:$0xff] %v713_v57  }
  0xed PF: > { %s15_s20 = sadd.s32 1, %s812_s20   ;;  %s913_s18 = smov %s808_s19 }
  0xee   : > { %p12_p5 = scmp.ge.s32.totalorder %s15_s20, 4   ;;  %s914_s19 = smov %s916_s21 }
  0xf0   :  { %14 = sbr.rel (!%p12_p5) target bundleno = 2 (0x2), region = 73 }

// kernel: compact_segmentation_forward.17
= control target key start
LH: loop header
LB: loop body
LE: loop exit
PB: predicated region body
PF: predicated region fallthrough
CT: control target
= control target key end

     0   :  { %s2096_s21 = smov 0   ;;  %s2098_s22 = smov 0   ;;  %s2420_s0 = inlined_call_operand.vmem [shape: bf16[2,256,288], index: 0, kind: input, shape index: {}]   ;;  %s2421_s1 = inlined_call_operand.vmem [shape: bf16[288,32], index: 1, kind: input, shape index: {}]   ;;  %s2422_s2 = inlined_call_operand.vmem [shape: f32[1,32], index: 2, kind: input, shape index: {}]   ;;  %s2423_s3 = inlined_call_operand.vmem [shape: f32[1,32], index: 3, kind: input, shape index: {}]   ;;  %s2424_s4 = inlined_call_operand.vmem [shape: bf16[32,128], index: 4, kind: input, shape index: {}]   ;;  %s2425_s5 = inlined_call_operand.vmem [shape: f32[1,128], index: 5, kind: input, shape index: {}]   ;;  %s2426_s6 = inlined_call_operand.vmem [shape: f32[2,256,128], index: 6, kind: output, shape index: {}]  }
   0x1   :  { %s2100_s23 = smov 0  }
   0x2 LB: > { %s28_s24 = sadd.s32 1, %s2055_s22  ;;  %p1598_p0 = scmp.ge.s32.totalorder %s2059_s23, 1  ;;  %s2059_s23 = sphi %s2100_s23, %s16_s23   ;;  %s2055_s22 = sphi %s2098_s22, %s2428_s22   ;;  %s2051_s21 = sphi %s2096_s21, %s2427_s21  }
   0x3   : > { %p30_p1 = scmp.ge.s32.totalorder %s28_s24, 2  ;;  %p234_p2 = scmp.lt.s32.totalorder %s2059_s23, 3 }
   0x5   : > { %s2430_s24 = smov (%p30_p1, %s28_s24), 0  ;;  %p235_p3 = pnand %p1598_p0, %p234_p2 }
   0x6   : > { %p274_p4 = scmp.lt.s32.totalorder (!%p235_p3), %s2051_s21, 1 }
   0x7   : > { %238 = sbr.rel (%p235_p3) target bundleno = 578 (0x242), region = 44 }
   0xc   : > { %v1953_v0 = vld [vmem:[%s2421_s1 + $0x78] sm:$0xff]   ;;  %v1955_v2 = vld [vmem:[%s2421_s1 + $0x70] sm:$0xff]   ;;  %v1957_v4 = vld [vmem:[%s2421_s1 + $0x68] sm:$0xff]   ;;  %s2432_s21 = smov (!%p274_p4, %s2051_s21), 1  ;;  %vm743_vm0 = vcmask 261120  }
   0xd   : > { %v1954_v1 = vld [vmem:[%s2421_s1 + $0x38] sm:$0xff]   ;;  %1708 = vmatprep.subr.bf16.mxu0 %v1953_v0  ;;  %v1956_v3 = vld [vmem:[%s2421_s1 + $0x30] sm:$0xff]   ;;  %v1958_v5 = vld [vmem:[%s2421_s1 + $0x28] sm:$0xff]   ;;  %s1928_s19 = smul.u32 384, %s2432_s21  ;;  %s1707_s9 = sshll.u32 %s2432_s21, 8 }
   0xe   : > { %1709 = vmatpush3.bf16.msra.mxu0 %v1954_v1  ;;  %v1959_v6 = vld [vmem:[%s2421_s1 + $0x60] sm:$0xff]   ;;  %v1961_v8 = vld [vmem:[%s2421_s1 + $0x58] sm:$0xff]   ;;  %v1967_v9 = vld [vmem:[%s2421_s1 + $0x88] sm:$0xff]   ;;  %s2345_s14 = scalar_lea.vmem %s2426_s6, %s1707_s9 }
   0xf   : > { %1710 = vmatprep.subr.bf16.mxu0 %v1955_v2  ;;  %v1960_v7 = vld [vmem:[%s2421_s1 + $0x20] sm:$0xff]   ;;  %v1962_v10 = vld [vmem:[%s2421_s1 + $0x18] sm:$0xff]   ;;  %v1963_v11 = vld [vmem:[%s2421_s1 + $0x50] sm:$0xff]   ;;  %1856 = vmatprep.subr.bf16.mxu1 %v1967_v9  ;;  %s2156_s8 = scalar_lea.vmem %s2420_s0, %s1928_s19 }
  0x10   : > { %v1964_v12 = vld [vmem:[%s2421_s1 + $0x10] sm:$0xff]   ;;  %1857 = vmatpush3.bf16.msra.mxu1 %v1967_v9  ;;  %v1970_v13 = vld [vmem:[%s2421_s1 + $0x80] sm:$0xff]   ;;  %v1965_v14 = vld [vmem:[%s2421_s1 + $0x48] sm:$0xff]  }
  0x11   : > { %1858 = vmatprep.subr.bf16.mxu1 %v1970_v13  ;;  %v1973_v15 = vld [vmem:[%s2156_s8 + $0x4] ss:$12 sps:$4 sm:$0xff]   ;;  %v1974_v16 = vld [vmem:[%s2156_s8 + $0x8] ss:$12 sps:$4 sm:$0xff]   ;;  %v1975_v17 = vld [vmem:[%s2156_s8 + $0x20] ss:$12 sps:$4 sm:$0xff]  }
  0x12   : > { %1711 = vmatpush3.bf16.msra.mxu0 %v1956_v3  ;;  %824 = vmatprep.mubr.bf16.mxu0 %v1973_v15  ;;  %v1966_v18 = vld [vmem:[%s2421_s1 + $0x8] sm:$0xff]   ;;  %v1968_v19 = vld [vmem:[%s2421_s1 + $0x40] sm:$0xff]   ;;  %v1983_v22 = vld [vmem:[%s2156_s8 + $0x50] ss:$12 sps:$4 sm:$0xff]  }
  0x13   : > { %1712 = vmatprep.subr.bf16.mxu0 %v1957_v4  ;;  %1860 = vmatprep.mubr.msk.bf16.mxu1 %vm743_vm0, %v1974_v16  ;;  %v1982_v20 = vld [vmem:[%s2156_s8 + $0x38] ss:$12 sps:$4 sm:$0xff]   ;;  %v1990_v23 = vld [vmem:[%s2156_s8 + $0x68] ss:$12 sps:$4 sm:$0xff]   ;;  %v1971_v24 = vld [vmem:[%s2156_s8] ss:$12 sps:$4 sm:$0xff]  }
  0x14   : > { %1859 = vmatpush3.bf16.msra.mxu1 %v1970_v13  ;;  %v1969_v21 = vld [vmem:[%s2421_s1] sm:$0xff]   ;;  %v1976_v25 = vld [vmem:[%s2156_s8 + $0x1c] ss:$12 sps:$4 sm:$0xff]   ;;  %v1984_v33 = vld [vmem:[%s2156_s8 + $0x4c] ss:$12 sps:$4 sm:$0xff]  }
  0x15   : > { %v1991_v26 = vld [vmem:[%s2156_s8 + $0x80] ss:$12 sps:$4 sm:$0xff]   ;;  %v1998_v27 = vld [vmem:[%s2156_s8 + $0x98] ss:$12 sps:$4 sm:$0xff]   ;;  %v1999_v30 = vld [vmem:[%s2156_s8 + $0xb0] ss:$12 sps:$4 sm:$0xff]  }
  0x16   : > { %1713 = vmatpush3.bf16.msra.mxu0 %v1958_v5  ;;  %v1978_v28 = vld [vmem:[%s2156_s8 + $0x18] ss:$12 sps:$4 sm:$0xff]   ;;  %v1979_v29 = vld [vmem:[%s2156_s8 + $0x34] ss:$12 sps:$4 sm:$0xff]   ;;  %v1981_v32 = vld [vmem:[%s2156_s8 + $0x30] ss:$12 sps:$4 sm:$0xff]  }
  0x17   : > { %1714 = vmatprep.subr.bf16.mxu0 %v1959_v6  ;;  %1861 = vmatmul.mubr.msk.bf16.vlgmr.msra.gmra.mxu1 %vm743_vm0, %v1975_v17  ;;  %v2006_v31 = vld [vmem:[%s2156_s8 + $0xc8] ss:$12 sps:$4 sm:$0xff]   ;;  %v2007_v34 = vld [vmem:[%s2156_s8 + $0xe0] ss:$12 sps:$4 sm:$0xff]   ;;  %v2014_v35 = vld [vmem:[%s2156_s8 + $0xf8] ss:$12 sps:$4 sm:$0xff]  }
  0x18   : > { %1864 = vmatprep.mubr.msk.bf16.mxu1 %vm743_vm0, %v1982_v20  ;;  %v1986_v36 = vld [vmem:[%s2156_s8 + $0x48] ss:$12 sps:$4 sm:$0xff]   ;;  %v1987_v37 = vld [vmem:[%s2156_s8 + $0x64] ss:$12 sps:$4 sm:$0xff]   ;;  %v1989_v40 = vld [vmem:[%s2156_s8 + $0x60] ss:$12 sps:$4 sm:$0xff]  }
  0x19   : > { %v2015_v38 = vld [vmem:[%s2156_s8 + $0x110] ss:$12 sps:$4 sm:$0xff]   ;;  %v2022_v39 = vld [vmem:[%s2156_s8 + $0x128] ss:$12 sps:$4 sm:$0xff]   ;;  %v2023_v42 = vld [vmem:[%s2156_s8 + $0x140] ss:$12 sps:$4 sm:$0xff]  }
  0x1a   : > { %1715 = vmatpush3.bf16.msra.mxu0 %v1960_v7  ;;  %v1992_v41 = vld [vmem:[%s2156_s8 + $0x7c] ss:$12 sps:$4 sm:$0xff]   ;;  %v2030_v43 = vld [vmem:[%s2156_s8 + $0x158] ss:$12 sps:$4 sm:$0xff]   ;;  %v1995_v45 = vld [vmem:[%s2156_s8 + $0x94] ss:$12 sps:$4 sm:$0xff]  }
  0x1b   : > { %1716 = vmatprep.subr.bf16.mxu0 %v1961_v8  ;;  %v1994_v44 = vld [vmem:[%s2156_s8 + $0x78] ss:$12 sps:$4 sm:$0xff]   ;;  %v2031_v46 = vld [vmem:[%s2156_s8 + $0x170] ss:$12 sps:$4 sm:$0xff]   ;;  %v2002_v49 = vld [vmem:[%s2156_s8 + $0xa8] ss:$12 sps:$4 sm:$0xff]  }
  0x1c   : > { %v1997_v47 = vld [vmem:[%s2156_s8 + $0x90] ss:$12 sps:$4 sm:$0xff]   ;;  %v2000_v48 = vld [vmem:[%s2156_s8 + $0xac] ss:$12 sps:$4 sm:$0xff]   ;;  %v2011_v54 = vld [vmem:[%s2156_s8 + $0xf4] ss:$12 sps:$4 sm:$0xff]  }
  0x1d   : > { %v2003_v50 = vld [vmem:[%s2156_s8 + $0xc4] ss:$12 sps:$4 sm:$0xff]   ;;  %v2005_v51 = vld [vmem:[%s2156_s8 + $0xc0] ss:$12 sps:$4 sm:$0xff]   ;;  %v2008_v52 = vld [vmem:[%s2156_s8 + $0xdc] ss:$12 sps:$4 sm:$0xff]  }
  0x1e   : > { %1717 = vmatpush3.bf16.msra.mxu0 %v1962_v10  ;;  %v2010_v53 = vld [vmem:[%s2156_s8 + $0xd8] ss:$12 sps:$4 sm:$0xff]   ;;  %v2013_v55 = vld [vmem:[%s2156_s8 + $0xf0] ss:$12 sps:$4 sm:$0xff]   ;;  %v2035_v57 = vld [vmem:[%s2424_s4 + $0x8] sm:$0xff]  }
  0x1f   : > { %1718 = vmatprep.subr.bf16.mxu0 %v1963_v11  ;;  %1865 = vmatmul.mubr.msk.bf16.gmra.mxu1 %vm743_vm0, %v1983_v22  ;;  %v2016_v56 = vld [vmem:[%s2156_s8 + $0x10c] ss:$12 sps:$4 sm:$0xff]   ;;  %v2018_v58 = vld [vmem:[%s2156_s8 + $0x108] ss:$12 sps:$4 sm:$0xff]   ;;  %v2019_v59 = vld [vmem:[%s2156_s8 + $0x124] ss:$12 sps:$4 sm:$0xff]  }
  0x20   : > { %1868 = vmatprep.mubr.msk.bf16.mxu1 %vm743_vm0, %v1990_v23  ;;  %1892 = vmatprep.subr.bf16.mxu1 %v2035_v57  ;;  %v2036_v60 = vld [vmem:[%s2424_s4] sm:$0xff]   ;;  %v2024_v62 = vld [vmem:[%s2156_s8 + $0x13c] ss:$12 sps:$4 sm:$0xff]   ;;  %v2032_v2 = vld [vmem:[%s2156_s8 + $0x16c] ss:$12 sps:$4 sm:$0xff]  }
  0x21   : > { %1893 = vmatpush3.bf16.msra.mxu1 %v2035_v57  ;;  %v2021_v61 = vld [vmem:[%s2156_s8 + $0x120] ss:$12 sps:$4 sm:$0xff]   ;;  %v2026_v63 = vld [vmem:[%s2156_s8 + $0x138] ss:$12 sps:$4 sm:$0xff]   ;;  %v2029_v1 = vld [vmem:[%s2156_s8 + $0x150] ss:$12 sps:$4 sm:$0xff]  }
  0x22   : > { %1719 = vmatpush3.bf16.msra.mxu0 %v1964_v12  ;;  %1894 = vmatprep.subr.bf16.mxu1 %v2036_v60  ;;  %v2027_v0 = vld [vmem:[%s2156_s8 + $0x154] ss:$12 sps:$4 sm:$0xff]  }
  0x23   : > { %1720 = vmatprep.subr.bf16.mxu0 %v1965_v14  ;;  %v2034_v3 = vld [vmem:[%s2156_s8 + $0x168] ss:$12 sps:$4 sm:$0xff]   ;;  %v2249_v11 = vld [vmem:[%s2422_s2] ss:$0 sm:$0xff] }
  0x24   : > { %v2255_v17 = vld [vmem:[%s2423_s3] ss:$0 sm:$0xff] }
  0x25   : > { %1895 = vmatpush3.bf16.msra.mxu1 %v2036_v60 }
  0x26   : > { %1721 = vmatpush3.bf16.msra.mxu0 %v1966_v18 }
  0x27   : > { %1722 = vmatprep.subr.bf16.mxu0 %v1968_v19  ;;  %1869 = vmatmul.mubr.msk.bf16.gmra.mxu1 %vm743_vm0, %v1991_v26 }
  0x28   : > { %1872 = vmatprep.mubr.msk.bf16.mxu1 %vm743_vm0, %v1998_v27 }
  0x2a   : > { %1723 = vmatpush3.bf16.msra.mxu0 %v1969_v21 }
  0x2d   : > { %825 = vmatmul.mubr.bf16.vlgmr.msra.gmra.mxu0 %v1971_v24 }
  0x2e   : > { %832 = vmatprep.mubr.bf16.mxu0 %v1976_v25 }
  0x2f   : > { %1873 = vmatmul.mubr.msk.bf16.gmra.mxu1 %vm743_vm0, %v1999_v30 }
  0x30   : > { %1876 = vmatprep.mubr.msk.bf16.mxu1 %vm743_vm0, %v2006_v31 }
  0x35   : > { %833 = vmatmul.mubr.bf16.gmra.mxu0 %v1978_v28 }
  0x36   : > { %840 = vmatprep.mubr.bf16.mxu0 %v1979_v29 }
  0x37   : > { %1877 = vmatmul.mubr.msk.bf16.gmra.mxu1 %vm743_vm0, %v2007_v34 }
  0x38   : > { %1880 = vmatprep.mubr.msk.bf16.mxu1 %vm743_vm0, %v2014_v35 }
  0x3d   : > { %841 = vmatmul.mubr.bf16.gmra.mxu0 %v1981_v32 }
  0x3e   : > { %848 = vmatprep.mubr.bf16.mxu0 %v1984_v33 }
  0x3f   : > { %1881 = vmatmul.mubr.msk.bf16.gmra.mxu1 %vm743_vm0, %v2015_v38 }
  0x40   : > { %1884 = vmatprep.mubr.msk.bf16.mxu1 %vm743_vm0, %v2022_v39 }
  0x45   : > { %849 = vmatmul.mubr.bf16.gmra.mxu0 %v1986_v36 }
  0x46   : > { %856 = vmatprep.mubr.bf16.mxu0 %v1987_v37 }
  0x47   : > { %1885 = vmatmul.mubr.msk.bf16.gmra.mxu1 %vm743_vm0, %v2023_v42 }
  0x48   : > { %1888 = vmatprep.mubr.msk.bf16.mxu1 %vm743_vm0, %v2030_v43 }
  0x4d   : > { %857 = vmatmul.mubr.bf16.gmra.mxu0 %v1989_v40 }
  0x4e   : > { %864 = vmatprep.mubr.bf16.mxu0 %v1992_v41 }
  0x4f   : > { %1889 = vmatmul.mubr.msk.bf16.gmra.mxu1 %vm743_vm0, %v2031_v46 }
  0x55   : > { %865 = vmatmul.mubr.bf16.gmra.mxu0 %v1994_v44 }
  0x56   : > { %872 = vmatprep.mubr.bf16.mxu0 %v1995_v45 }
  0x5d   : > { %873 = vmatmul.mubr.bf16.gmra.mxu0 %v1997_v47 }
  0x5e   : > { %880 = vmatprep.mubr.bf16.mxu0 %v2000_v48 }
  0x65   : > { %881 = vmatmul.mubr.bf16.gmra.mxu0 %v2002_v49 }
  0x66   : > { %888 = vmatprep.mubr.bf16.mxu0 %v2003_v50 }
  0x6d   : > { %889 = vmatmul.mubr.bf16.gmra.mxu0 %v2005_v51 }
  0x6e   : > { %896 = vmatprep.mubr.bf16.mxu0 %v2008_v52 }
  0x75   : > { %897 = vmatmul.mubr.bf16.gmra.mxu0 %v2010_v53 }
  0x76   : > { %904 = vmatprep.mubr.bf16.mxu0 %v2011_v54 }
  0x7d   : > { %905 = vmatmul.mubr.bf16.gmra.mxu0 %v2013_v55 }
  0x7e   : > { %912 = vmatprep.mubr.bf16.mxu0 %v2016_v56 }
  0x85   : > { %913 = vmatmul.mubr.bf16.gmra.mxu0 %v2018_v58 }
  0x86   : > { %920 = vmatprep.mubr.bf16.mxu0 %v2019_v59 }
  0x8d   : > { %921 = vmatmul.mubr.bf16.gmra.mxu0 %v2021_v61 }
  0x8e   : > { %928 = vmatprep.mubr.bf16.mxu0 %v2024_v62 }
  0x95   : > { %929 = vmatmul.mubr.bf16.gmra.mxu0 %v2026_v63 }
  0x96   : > { %936 = vmatprep.mubr.bf16.mxu0 %v2027_v0 }
  0x9d   : > { %937 = vmatmul.mubr.bf16.gmra.mxu0 %v2029_v1 }
  0x9e   : > { %944 = vmatprep.mubr.bf16.mxu0 %v2032_v2 }
  0xa5   : > { %945 = vmatmul.mubr.bf16.gmra.mxu0 %v2034_v3 }
  0xd7   : > { %v1862_v4 = vpop.f32.mrf.mxu1 }
  0xd9   : > { %v987_v5 = vpop.f32.mrf.mxu1 }
  0xdb   : > { %v1863_v8 = vpop.f32.mrf.mxu1 }
  0xdd   : > { %v990_v14 = vpop.f32.mrf.mxu1 }
  0xdf   : > { %v1866_v21 = vpop.f32.mrf.mxu1 }
  0xe1   : > { %v1003_v29 = vpop.f32.mrf.mxu1 }
  0xe3   : > { %v1867_v38 = vpop.f32.mrf.mxu1 }
  0xe5   : > { %v1006_v46 = vpop.f32.mrf.mxu1 }
  0xe7   : > { %v1870_v55 = vpop.f32.mrf.mxu1 }
  0xe9   : > { %v1019_v63 = vpop.f32.mrf.mxu1 }
  0xed   : > { %v1724_v6 = vpop.f32.mrf.mxu0 }
  0xef   : > { %v1725_v7 = vpop.f32.mrf.mxu0 }
  0xf0   : > { %v1726_v9 = vadd.f32 %v1725_v7, %v1724_v6 }
  0xf1   : > { %v1727_v10 = vpop.f32.mrf.mxu0 }
  0xf2   : > { %v988_v12 = vadd.f32 %v1726_v9, %v987_v5 }
  0xf3   : > { %v1728_v13 = vpop.f32.mrf.mxu0 }
  0xf4   : > { %v1121_v15 = vmul.f32 %v2249_v11, %v988_v12  ;;  %v1729_v16 = vadd.f32 %v1728_v13, %v1727_v10 }
  0xf5   : > { %v1730_v18 = vpop.f32.mrf.mxu0 }
  0xf6   : > { %v991_v19 = vadd.f32 %v1729_v16, %v990_v14  ;;  %v1160_v22 = vadd.f32 %v2255_v17, %v1121_v15 }
  0xf7   : > { %v1731_v20 = vpop.f32.mrf.mxu0 }
  0xf8   : > { %v1122_v23 = vmul.f32 %v2249_v11, %v991_v19  ;;  %v1732_v24 = vadd.f32 %v1731_v20, %v1730_v18  ;;  %v1192_v30 = vmax.f32 %v1160_v22, 0.0 }
  0xf9   : > { %v1733_v25 = vpop.f32.mrf.mxu0 }
  0xfa   : > { %v1161_v26 = vadd.f32 %v2255_v17, %v1122_v23  ;;  %v996_v27 = vadd.f32 %v1862_v4, %v1732_v24 }
  0xfb   : > { %v1734_v28 = vpop.f32.mrf.mxu0 }
  0xfc   : > { %v1193_v31 = vmax.f32 %v1161_v26, 0.0  ;;  %v1123_v32 = vmul.f32 %v2249_v11, %v996_v27  ;;  %v1735_v33 = vadd.f32 %v1734_v28, %v1733_v25 }
  0xfd   : > { %v1736_v34 = vpop.f32.mrf.mxu0 }
  0xfe   : > { %v1224_v35 = vpack.c.bf16 %v1193_v31, %v1192_v30  ;;  %v999_v36 = vadd.f32 %v1863_v8, %v1735_v33  ;;  %v1162_v39 = vadd.f32 %v2255_v17, %v1123_v32  ;;  %v1871_v8 = vpop.f32.mrf.mxu1 }
  0xff   : > { %v1737_v37 = vpop.f32.mrf.mxu0 }
 0x100   : > { %v1124_v40 = vmul.f32 %v2249_v11, %v999_v36  ;;  %v1738_v41 = vadd.f32 %v1737_v37, %v1736_v34  ;;  %1896 = vmatprep.mubr.msk.bf16.mxu1 %vm743_vm0, %v1224_v35  ;;  %v1194_v47 = vmax.f32 %v1162_v39, 0.0  ;;  %v1022_v18 = vpop.f32.mrf.mxu1 }
 0x101   : > { %v1739_v42 = vpop.f32.mrf.mxu0 }
 0x102   : > { %v1163_v43 = vadd.f32 %v2255_v17, %v1124_v40  ;;  %v1004_v44 = vadd.f32 %v1738_v41, %v1003_v29  ;;  %v1874_v27 = vpop.f32.mrf.mxu1 }
 0x103   : > { %v1740_v45 = vpop.f32.mrf.mxu0 }
 0x104   : > { %v1195_v48 = vmax.f32 %v1163_v43, 0.0  ;;  %v1125_v49 = vmul.f32 %v2249_v11, %v1004_v44  ;;  %v1741_v50 = vadd.f32 %v1740_v45, %v1739_v42  ;;  %v1035_v35 = vpop.f32.mrf.mxu1 }
 0x105   : > { %v1742_v51 = vpop.f32.mrf.mxu0 }
 0x106   : > { %v1225_v52 = vpack.c.bf16 %v1195_v48, %v1194_v47  ;;  %v1007_v53 = vadd.f32 %v1741_v50, %v1006_v46  ;;  %v1164_v56 = vadd.f32 %v2255_v17, %v1125_v49  ;;  %v1875_v44 = vpop.f32.mrf.mxu1 }
 0x107   : > { %v1743_v54 = vpop.f32.mrf.mxu0 }
 0x108   : > { %v1126_v57 = vmul.f32 %v2249_v11, %v1007_v53  ;;  %v1744_v58 = vadd.f32 %v1743_v54, %v1742_v51  ;;  %1897 = vmatmul.mubr.msk.bf16.vlgmr.msra.gmra.mxu1 %vm743_vm0, %v1225_v52  ;;  %v1196_v0 = vmax.f32 %v1164_v56, 0.0  ;;  %v1038_v52 = vpop.f32.mrf.mxu1 }
 0x109   : > { %v1745_v59 = vpop.f32.mrf.mxu0 }
 0x10a   : > { %v1165_v60 = vadd.f32 %v2255_v17, %v1126_v57  ;;  %v1012_v61 = vadd.f32 %v1866_v21, %v1744_v58 }
 0x10b   : > { %v1746_v62 = vpop.f32.mrf.mxu0 }
 0x10c   : > { %v1197_v1 = vmax.f32 %v1165_v60, 0.0  ;;  %v1127_v2 = vmul.f32 %v2249_v11, %v1012_v61  ;;  %v1747_v3 = vadd.f32 %v1746_v62, %v1745_v59  ;;  %v1878_v61 = vpop.f32.mrf.mxu1 }
 0x10d   : > { %v1748_v4 = vpop.f32.mrf.mxu0 }
 0x10e   : > { %v1226_v5 = vpack.c.bf16 %v1197_v1, %v1196_v0  ;;  %v1015_v6 = vadd.f32 %v1867_v38, %v1747_v3  ;;  %v1166_v9 = vadd.f32 %v2255_v17, %v1127_v2 }
 0x10f   : > { %v1749_v7 = vpop.f32.mrf.mxu0 }
 0x110   : > { %v1128_v10 = vmul.f32 %v2249_v11, %v1015_v6  ;;  %v1750_v12 = vadd.f32 %v1749_v7, %v1748_v4  ;;  %1900 = vmatprep.mubr.msk.bf16.mxu1 %vm743_vm0, %v1226_v5  ;;  %v1198_v19 = vmax.f32 %v1166_v9, 0.0  ;;  %v1051_v5 = vpop.f32.mrf.mxu1 }
 0x111   : > { %v1751_v13 = vpop.f32.mrf.mxu0 }
 0x112   : > { %v1167_v14 = vadd.f32 %v2255_v17, %v1128_v10  ;;  %v1020_v15 = vadd.f32 %v1750_v12, %v1019_v63 }
 0x113   : > { %v1752_v16 = vpop.f32.mrf.mxu0 }
 0x114   : > { %v1199_v20 = vmax.f32 %v1167_v14, 0.0  ;;  %v1129_v21 = vmul.f32 %v2249_v11, %v1020_v15  ;;  %v1753_v22 = vadd.f32 %v1752_v16, %v1751_v13  ;;  %v1879_v15 = vpop.f32.mrf.mxu1 }
 0x115   : > { %v1754_v23 = vpop.f32.mrf.mxu0 }
 0x116   : > { %v1023_v24 = vadd.f32 %v1753_v22, %v1022_v18  ;;  %v1227_v25 = vpack.c.bf16 %v1199_v20, %v1198_v19  ;;  %v1168_v28 = vadd.f32 %v2255_v17, %v1129_v21 }
 0x117   : > { %v1755_v26 = vpop.f32.mrf.mxu0 }
 0x118   : > { %v1130_v29 = vmul.f32 %v2249_v11, %v1023_v24  ;;  %v1756_v30 = vadd.f32 %v1755_v26, %v1754_v23  ;;  %1901 = vmatmul.mubr.msk.bf16.gmra.mxu1 %vm743_vm0, %v1227_v25  ;;  %v1200_v36 = vmax.f32 %v1168_v28, 0.0  ;;  %v1054_v24 = vpop.f32.mrf.mxu1 }
 0x119   : > { %v1757_v31 = vpop.f32.mrf.mxu0 }
 0x11a   : > { %v1169_v32 = vadd.f32 %v2255_v17, %v1130_v29  ;;  %v1028_v33 = vadd.f32 %v1870_v55, %v1756_v30 }
 0x11b   : > { %v1758_v34 = vpop.f32.mrf.mxu0 }
 0x11c   : > { %v1201_v37 = vmax.f32 %v1169_v32, 0.0  ;;  %v1131_v38 = vmul.f32 %v2249_v11, %v1028_v33  ;;  %v1759_v39 = vadd.f32 %v1758_v34, %v1757_v31  ;;  %v1882_v33 = vpop.f32.mrf.mxu1 }
 0x11d   : > { %v1760_v40 = vpop.f32.mrf.mxu0 }
 0x11e   : > { %v1228_v41 = vpack.c.bf16 %v1201_v37, %v1200_v36  ;;  %v1031_v42 = vadd.f32 %v1871_v8, %v1759_v39  ;;  %v1170_v45 = vadd.f32 %v2255_v17, %v1131_v38 }
 0x11f   : > { %v1761_v43 = vpop.f32.mrf.mxu0 }
 0x120   : > { %v1132_v46 = vmul.f32 %v2249_v11, %v1031_v42  ;;  %v1762_v47 = vadd.f32 %v1761_v43, %v1760_v40  ;;  %1904 = vmatprep.mubr.msk.bf16.mxu1 %vm743_vm0, %v1228_v41  ;;  %v1202_v53 = vmax.f32 %v1170_v45, 0.0  ;;  %v1067_v41 = vpop.f32.mrf.mxu1 }
 0x121   : > { %v1763_v48 = vpop.f32.mrf.mxu0 }
 0x122   : > { %v1171_v49 = vadd.f32 %v2255_v17, %v1132_v46  ;;  %v1036_v50 = vadd.f32 %v1762_v47, %v1035_v35 }
 0x123   : > { %v1764_v51 = vpop.f32.mrf.mxu0 }
 0x124   : > { %v1203_v54 = vmax.f32 %v1171_v49, 0.0  ;;  %v1133_v55 = vmul.f32 %v2249_v11, %v1036_v50  ;;  %v1765_v56 = vadd.f32 %v1764_v51, %v1763_v48  ;;  %v1883_v50 = vpop.f32.mrf.mxu1 }
 0x125   : > { %v1766_v57 = vpop.f32.mrf.mxu0 }
 0x126   : > { %v1039_v58 = vadd.f32 %v1765_v56, %v1038_v52  ;;  %v1229_v59 = vpack.c.bf16 %v1203_v54, %v1202_v53  ;;  %v1172_v62 = vadd.f32 %v2255_v17, %v1133_v55 }
 0x127   : > { %v1767_v60 = vpop.f32.mrf.mxu0 }
 0x128   : > { %v1134_v63 = vmul.f32 %v2249_v11, %v1039_v58  ;;  %v1768_v0 = vadd.f32 %v1767_v60, %v1766_v57  ;;  %1905 = vmatmul.mubr.msk.bf16.gmra.mxu1 %vm743_vm0, %v1229_v59  ;;  %v1204_v6 = vmax.f32 %v1172_v62, 0.0  ;;  %v1070_v58 = vpop.f32.mrf.mxu1 }
 0x129   : > { %v1769_v1 = vpop.f32.mrf.mxu0 }
 0x12a   : > { %v1173_v2 = vadd.f32 %v2255_v17, %v1134_v63  ;;  %v1044_v3 = vadd.f32 %v1874_v27, %v1768_v0 }
 0x12b   : > { %v1770_v4 = vpop.f32.mrf.mxu0 }
 0x12c   : > { %v1205_v7 = vmax.f32 %v1173_v2, 0.0  ;;  %v1135_v8 = vmul.f32 %v2249_v11, %v1044_v3  ;;  %v1771_v9 = vadd.f32 %v1770_v4, %v1769_v1  ;;  %v1886_v3 = vpop.f32.mrf.mxu1 }
 0x12d   : > { %v1772_v10 = vpop.f32.mrf.mxu0 }
 0x12e   : > { %v1230_v12 = vpack.c.bf16 %v1205_v7, %v1204_v6  ;;  %v1047_v13 = vadd.f32 %v1875_v44, %v1771_v9  ;;  %v1174_v16 = vadd.f32 %v2255_v17, %v1135_v8 }
 0x12f   : > { %v1773_v14 = vpop.f32.mrf.mxu0 }
 0x130   : > { %v1136_v18 = vmul.f32 %v2249_v11, %v1047_v13  ;;  %v1774_v19 = vadd.f32 %v1773_v14, %v1772_v10  ;;  %1908 = vmatprep.mubr.msk.bf16.mxu1 %vm743_vm0, %v1230_v12  ;;  %v1206_v25 = vmax.f32 %v1174_v16, 0.0  ;;  %v1083_v12 = vpop.f32.mrf.mxu1 }
 0x131   : > { %v1775_v20 = vpop.f32.mrf.mxu0 }
 0x132   : > { %v1175_v21 = vadd.f32 %v2255_v17, %v1136_v18  ;;  %v1052_v22 = vadd.f32 %v1774_v19, %v1051_v5 }
 0x133   : > { %v1776_v23 = vpop.f32.mrf.mxu0 }
 0x134   : > { %v1207_v26 = vmax.f32 %v1175_v21, 0.0  ;;  %v1137_v27 = vmul.f32 %v2249_v11, %v1052_v22  ;;  %v1777_v28 = vadd.f32 %v1776_v23, %v1775_v20  ;;  %v1887_v22 = vpop.f32.mrf.mxu1 }
 0x135   : > { %v1778_v29 = vpop.f32.mrf.mxu0 }
 0x136   : > { %v1055_v30 = vadd.f32 %v1777_v28, %v1054_v24  ;;  %v1231_v31 = vpack.c.bf16 %v1207_v26, %v1206_v25  ;;  %v1176_v34 = vadd.f32 %v2255_v17, %v1137_v27 }
 0x137   : > { %v1779_v32 = vpop.f32.mrf.mxu0 }
 0x138   : > { %v1138_v35 = vmul.f32 %v2249_v11, %v1055_v30  ;;  %v1780_v36 = vadd.f32 %v1779_v32, %v1778_v29  ;;  %1909 = vmatmul.mubr.msk.bf16.gmra.mxu1 %vm743_vm0, %v1231_v31  ;;  %v1208_v42 = vmax.f32 %v1176_v34, 0.0  ;;  %v1086_v30 = vpop.f32.mrf.mxu1 }
 0x139   : > { %v1781_v37 = vpop.f32.mrf.mxu0 }
 0x13a   : > { %v1177_v38 = vadd.f32 %v2255_v17, %v1138_v35  ;;  %v1060_v39 = vadd.f32 %v1878_v61, %v1780_v36 }
 0x13b   : > { %v1782_v40 = vpop.f32.mrf.mxu0 }
 0x13c   : > { %v1209_v43 = vmax.f32 %v1177_v38, 0.0  ;;  %v1139_v44 = vmul.f32 %v2249_v11, %v1060_v39  ;;  %v1783_v45 = vadd.f32 %v1782_v40, %v1781_v37  ;;  %v1890_v39 = vpop.f32.mrf.mxu1 }
 0x13d   : > { %v1784_v46 = vpop.f32.mrf.mxu0 }
 0x13e   : > { %v1232_v47 = vpack.c.bf16 %v1209_v43, %v1208_v42  ;;  %v1063_v48 = vadd.f32 %v1879_v15, %v1783_v45  ;;  %v1178_v51 = vadd.f32 %v2255_v17, %v1139_v44 }
 0x13f   : > { %v1785_v49 = vpop.f32.mrf.mxu0 }
 0x140   : > { %v1140_v52 = vmul.f32 %v2249_v11, %v1063_v48  ;;  %v1786_v53 = vadd.f32 %v1785_v49, %v1784_v46  ;;  %1912 = vmatprep.mubr.msk.bf16.mxu1 %vm743_vm0, %v1232_v47  ;;  %v1210_v59 = vmax.f32 %v1178_v51, 0.0  ;;  %v1099_v47 = vpop.f32.mrf.mxu1 }
 0x141   : > { %v1787_v54 = vpop.f32.mrf.mxu0 }
 0x142   : > { %v1179_v55 = vadd.f32 %v2255_v17, %v1140_v52  ;;  %v1068_v56 = vadd.f32 %v1786_v53, %v1067_v41 }
 0x143   : > { %v1788_v57 = vpop.f32.mrf.mxu0 }
 0x144   : > { %v1211_v60 = vmax.f32 %v1179_v55, 0.0  ;;  %v1141_v61 = vmul.f32 %v2249_v11, %v1068_v56  ;;  %v1789_v62 = vadd.f32 %v1788_v57, %v1787_v54  ;;  %v1891_v56 = vpop.f32.mrf.mxu1 }
 0x145   : > { %v1790_v63 = vpop.f32.mrf.mxu0 }
 0x146   : > { %v1071_v0 = vadd.f32 %v1789_v62, %v1070_v58  ;;  %v1233_v1 = vpack.c.bf16 %v1211_v60, %v1210_v59  ;;  %v1180_v4 = vadd.f32 %v2255_v17, %v1141_v61 }
 0x147   : > { %v1791_v2 = vpop.f32.mrf.mxu0 }
 0x148   : > { %v1142_v5 = vmul.f32 %v2249_v11, %v1071_v0  ;;  %v1792_v6 = vadd.f32 %v1791_v2, %v1790_v63  ;;  %1913 = vmatmul.mubr.msk.bf16.gmra.mxu1 %vm743_vm0, %v1233_v1  ;;  %v1212_v13 = vmax.f32 %v1180_v4, 0.0  ;;  %v1102_v0 = vpop.f32.mrf.mxu1 }
 0x149   : > { %v1793_v7 = vpop.f32.mrf.mxu0 }
 0x14a   : > { %v1181_v8 = vadd.f32 %v2255_v17, %v1142_v5  ;;  %v1076_v9 = vadd.f32 %v1882_v33, %v1792_v6 }
 0x14b   : > { %v1794_v10 = vpop.f32.mrf.mxu0 }
 0x14c   : > { %v1213_v14 = vmax.f32 %v1181_v8, 0.0  ;;  %v1143_v15 = vmul.f32 %v2249_v11, %v1076_v9  ;;  %v1795_v16 = vadd.f32 %v1794_v10, %v1793_v7 }
 0x14d   : > { %v1796_v18 = vpop.f32.mrf.mxu0 }
 0x14e   : > { %v1234_v19 = vpack.c.bf16 %v1213_v14, %v1212_v13  ;;  %v1079_v20 = vadd.f32 %v1883_v50, %v1795_v16  ;;  %v1182_v23 = vadd.f32 %v2255_v17, %v1143_v15 }
 0x14f   : > { %v1797_v21 = vpop.f32.mrf.mxu0 }
 0x150   : > { %v1144_v24 = vmul.f32 %v2249_v11, %v1079_v20  ;;  %v1798_v25 = vadd.f32 %v1797_v21, %v1796_v18  ;;  %1916 = vmatprep.mubr.msk.bf16.mxu1 %vm743_vm0, %v1234_v19  ;;  %v1214_v31 = vmax.f32 %v1182_v23, 0.0 }
 0x151   : > { %v1799_v26 = vpop.f32.mrf.mxu0 }
 0x152   : > { %v1183_v27 = vadd.f32 %v2255_v17, %v1144_v24  ;;  %v1084_v28 = vadd.f32 %v1798_v25, %v1083_v12 }
 0x153   : > { %v1800_v29 = vpop.f32.mrf.mxu0 }
 0x154   : > { %v1215_v32 = vmax.f32 %v1183_v27, 0.0  ;;  %v1145_v33 = vmul.f32 %v2249_v11, %v1084_v28  ;;  %v1801_v34 = vadd.f32 %v1800_v29, %v1799_v26 }
 0x155   : > { %v1802_v35 = vpop.f32.mrf.mxu0 }
 0x156   : > { %v1087_v36 = vadd.f32 %v1801_v34, %v1086_v30  ;;  %v1235_v37 = vpack.c.bf16 %v1215_v32, %v1214_v31  ;;  %v1184_v40 = vadd.f32 %v2255_v17, %v1145_v33  ;;  %v2340_v30 = vld [vmem:[%s2425_s5] ss:$0 sm:$0xff] }
 0x157   : > { %v1803_v38 = vpop.f32.mrf.mxu0 }
 0x158   : > { %v1146_v41 = vmul.f32 %v2249_v11, %v1087_v36  ;;  %v1804_v42 = vadd.f32 %v1803_v38, %v1802_v35  ;;  %1917 = vmatmul.mubr.msk.bf16.gmra.mxu1 %vm743_vm0, %v1235_v37  ;;  %v1216_v48 = vmax.f32 %v1184_v40, 0.0 }
 0x159   : > { %v1805_v43 = vpop.f32.mrf.mxu0 }
 0x15a   : > { %v1185_v44 = vadd.f32 %v2255_v17, %v1146_v41  ;;  %v1092_v45 = vadd.f32 %v1886_v3, %v1804_v42 }
 0x15b   : > { %v1806_v46 = vpop.f32.mrf.mxu0 }
 0x15c   : > { %v1217_v49 = vmax.f32 %v1185_v44, 0.0  ;;  %v1147_v50 = vmul.f32 %v2249_v11, %v1092_v45  ;;  %v1807_v51 = vadd.f32 %v1806_v46, %v1805_v43 }
 0x15d   : > { %v1808_v52 = vpop.f32.mrf.mxu0 }
 0x15e   : > { %v1236_v53 = vpack.c.bf16 %v1217_v49, %v1216_v48  ;;  %v1095_v54 = vadd.f32 %v1887_v22, %v1807_v51  ;;  %v1186_v57 = vadd.f32 %v2255_v17, %v1147_v50 }
 0x15f   : > { %v1809_v55 = vpop.f32.mrf.mxu0 }
 0x160   : > { %v1148_v58 = vmul.f32 %v2249_v11, %v1095_v54  ;;  %v1810_v59 = vadd.f32 %v1809_v55, %v1808_v52  ;;  %1920 = vmatprep.mubr.msk.bf16.mxu1 %vm743_vm0, %v1236_v53  ;;  %v1218_v1 = vmax.f32 %v1186_v57, 0.0 }
 0x161   : > { %v1811_v60 = vpop.f32.mrf.mxu0 }
 0x162   : > { %v1187_v61 = vadd.f32 %v2255_v17, %v1148_v58  ;;  %v1100_v62 = vadd.f32 %v1810_v59, %v1099_v47 }
 0x163   : > { %v1812_v63 = vpop.f32.mrf.mxu0 }
 0x164   : > { %v1219_v2 = vmax.f32 %v1187_v61, 0.0  ;;  %v1149_v3 = vmul.f32 %v2249_v11, %v1100_v62  ;;  %v1813_v4 = vadd.f32 %v1812_v63, %v1811_v60 }
 0x165   : > { %v1814_v5 = vpop.f32.mrf.mxu0 }
 0x166   : > { %v1103_v6 = vadd.f32 %v1813_v4, %v1102_v0  ;;  %v1237_v7 = vpack.c.bf16 %v1219_v2, %v1218_v1  ;;  %v1188_v9 = vadd.f32 %v2255_v17, %v1149_v3 }
 0x167   : > { %v1815_v8 = vpop.f32.mrf.mxu0 }
 0x168   : > { %v1150_v10 = vmul.f32 %v2249_v11, %v1103_v6  ;;  %v1816_v12 = vadd.f32 %v1815_v8, %v1814_v5  ;;  %1921 = vmatmul.mubr.msk.bf16.gmra.mxu1 %vm743_vm0, %v1237_v7  ;;  %v1220_v18 = vmax.f32 %v1188_v9, 0.0 }
 0x169   : > { %v1817_v13 = vpop.f32.mrf.mxu0 }
 0x16a   : > { %v1189_v14 = vadd.f32 %v2255_v17, %v1150_v10  ;;  %v1108_v15 = vadd.f32 %v1890_v39, %v1816_v12 }
 0x16b   : > { %v1818_v16 = vpop.f32.mrf.mxu0 }
 0x16c   : > { %v1221_v19 = vmax.f32 %v1189_v14, 0.0  ;;  %v1151_v20 = vmul.f32 %v2249_v11, %v1108_v15  ;;  %v1819_v21 = vadd.f32 %v1818_v16, %v1817_v13 }
 0x16e   : > { %v1238_v22 = vpack.c.bf16 %v1221_v19, %v1220_v18  ;;  %v1111_v23 = vadd.f32 %v1891_v56, %v1819_v21  ;;  %v1190_v24 = vadd.f32 %v2255_v17, %v1151_v20 }
 0x170   : > { %v1152_v25 = vmul.f32 %v2249_v11, %v1111_v23  ;;  %1924 = vmatprep.mubr.msk.bf16.mxu1 %vm743_vm0, %v1238_v22  ;;  %v1222_v27 = vmax.f32 %v1190_v24, 0.0 }
 0x172   : > { %v1191_v26 = vadd.f32 %v2255_v17, %v1152_v25 }
 0x174   : > { %v1223_v28 = vmax.f32 %v1191_v26, 0.0 }
 0x176   : > { %v1239_v29 = vpack.c.bf16 %v1223_v28, %v1222_v27 }
 0x178   : > { %1925 = vmatmul.mubr.msk.bf16.gmra.mxu1 %vm743_vm0, %v1239_v29 }
 0x1c8   : > { %v1898_v11 = vpop.f32.mrf.mxu1 }
 0x1c9   : > { %v1354_v17 = vadd.f32 %v1898_v11, %v2340_v30 }
 0x1ca   : > { %v1345_v31 = vpop.f32.mrf.mxu1 }
 0x1cb   : > { %1474 = vst [vmem:[%s2345_s14 + $0x10] sm:$0xff] %v1354_v17  ;;  %v1346_v32 = vadd.f32 %v2340_v30, %v1345_v31 }
 0x1cc   : > { %v1899_v33 = vpop.f32.mrf.mxu1 }
 0x1cd   : > { %1472 = vst [vmem:[%s2345_s14] sm:$0xff] %v1346_v32  ;;  %v1357_v34 = vadd.f32 %v1899_v33, %v2340_v30 }
 0x1ce   : > { %v1348_v35 = vpop.f32.mrf.mxu1 }
 0x1cf   : > { %1475 = vst [vmem:[%s2345_s14 + $0x18] sm:$0xff] %v1357_v34  ;;  %v1349_v36 = vadd.f32 %v2340_v30, %v1348_v35 }
 0x1d1   : > { %1473 = vst [vmem:[%s2345_s14 + $0x8] sm:$0xff] %v1349_v36 }
 0x1d8   : > { %v1902_v37 = vpop.f32.mrf.mxu1 }
 0x1d9   : > { %v1370_v38 = vadd.f32 %v1902_v37, %v2340_v30 }
 0x1da   : > { %v1361_v39 = vpop.f32.mrf.mxu1 }
 0x1db   : > { %1478 = vst [vmem:[%s2345_s14 + $0x30] sm:$0xff] %v1370_v38  ;;  %v1362_v40 = vadd.f32 %v2340_v30, %v1361_v39 }
 0x1dc   : > { %v1903_v41 = vpop.f32.mrf.mxu1 }
 0x1dd   : > { %1476 = vst [vmem:[%s2345_s14 + $0x20] sm:$0xff] %v1362_v40  ;;  %v1373_v42 = vadd.f32 %v1903_v41, %v2340_v30 }
 0x1de   : > { %v1364_v43 = vpop.f32.mrf.mxu1 }
 0x1df   : > { %1479 = vst [vmem:[%s2345_s14 + $0x38] sm:$0xff] %v1373_v42  ;;  %v1365_v44 = vadd.f32 %v2340_v30, %v1364_v43 }
 0x1e1   : > { %1477 = vst [vmem:[%s2345_s14 + $0x28] sm:$0xff] %v1365_v44 }
 0x1e8   : > { %v1906_v45 = vpop.f32.mrf.mxu1 }
 0x1e9   : > { %v1386_v46 = vadd.f32 %v1906_v45, %v2340_v30 }
 0x1ea   : > { %v1377_v47 = vpop.f32.mrf.mxu1 }
 0x1eb   : > { %1482 = vst [vmem:[%s2345_s14 + $0x50] sm:$0xff] %v1386_v46  ;;  %v1378_v48 = vadd.f32 %v2340_v30, %v1377_v47 }
 0x1ec   : > { %v1907_v49 = vpop.f32.mrf.mxu1 }
 0x1ed   : > { %1480 = vst [vmem:[%s2345_s14 + $0x40] sm:$0xff] %v1378_v48  ;;  %v1389_v50 = vadd.f32 %v1907_v49, %v2340_v30 }
 0x1ee   : > { %v1380_v51 = vpop.f32.mrf.mxu1 }
 0x1ef   : > { %1483 = vst [vmem:[%s2345_s14 + $0x58] sm:$0xff] %v1389_v50  ;;  %v1381_v52 = vadd.f32 %v2340_v30, %v1380_v51 }
 0x1f1   : > { %1481 = vst [vmem:[%s2345_s14 + $0x48] sm:$0xff] %v1381_v52 }
 0x1f8   : > { %v1910_v53 = vpop.f32.mrf.mxu1 }
 0x1f9   : > { %v1402_v54 = vadd.f32 %v1910_v53, %v2340_v30 }
 0x1fa   : > { %v1393_v55 = vpop.f32.mrf.mxu1 }
 0x1fb   : > { %1486 = vst [vmem:[%s2345_s14 + $0x70] sm:$0xff] %v1402_v54  ;;  %v1394_v56 = vadd.f32 %v2340_v30, %v1393_v55 }
 0x1fc   : > { %v1911_v57 = vpop.f32.mrf.mxu1 }
 0x1fd   : > { %1484 = vst [vmem:[%s2345_s14 + $0x60] sm:$0xff] %v1394_v56  ;;  %v1405_v58 = vadd.f32 %v1911_v57, %v2340_v30 }
 0x1fe   : > { %v1396_v59 = vpop.f32.mrf.mxu1 }
 0x1ff   : > { %1487 = vst [vmem:[%s2345_s14 + $0x78] sm:$0xff] %v1405_v58  ;;  %v1397_v60 = vadd.f32 %v2340_v30, %v1396_v59 }
 0x201   : > { %1485 = vst [vmem:[%s2345_s14 + $0x68] sm:$0xff] %v1397_v60 }
 0x208   : > { %v1914_v61 = vpop.f32.mrf.mxu1 }
 0x209   : > { %v1418_v62 = vadd.f32 %v1914_v61, %v2340_v30 }
 0x20a   : > { %v1409_v63 = vpop.f32.mrf.mxu1 }
 0x20b   : > { %1490 = vst [vmem:[%s2345_s14 + $0x90] sm:$0xff] %v1418_v62  ;;  %v1410_v0 = vadd.f32 %v2340_v30, %v1409_v63 }
 0x20c   : > { %v1915_v1 = vpop.f32.mrf.mxu1 }
 0x20d   : > { %1488 = vst [vmem:[%s2345_s14 + $0x80] sm:$0xff] %v1410_v0  ;;  %v1421_v2 = vadd.f32 %v1915_v1, %v2340_v30 }
 0x20e   : > { %v1412_v3 = vpop.f32.mrf.mxu1 }
 0x20f   : > { %1491 = vst [vmem:[%s2345_s14 + $0x98] sm:$0xff] %v1421_v2  ;;  %v1413_v4 = vadd.f32 %v2340_v30, %v1412_v3 }
 0x211   : > { %1489 = vst [vmem:[%s2345_s14 + $0x88] sm:$0xff] %v1413_v4 }
 0x218   : > { %v1918_v5 = vpop.f32.mrf.mxu1 }
 0x219   : > { %v1434_v6 = vadd.f32 %v1918_v5, %v2340_v30 }
 0x21a   : > { %v1425_v7 = vpop.f32.mrf.mxu1 }
 0x21b   : > { %1494 = vst [vmem:[%s2345_s14 + $0xb0] sm:$0xff] %v1434_v6  ;;  %v1426_v8 = vadd.f32 %v2340_v30, %v1425_v7 }
 0x21c   : > { %v1919_v9 = vpop.f32.mrf.mxu1 }
 0x21d   : > { %1492 = vst [vmem:[%s2345_s14 + $0xa0] sm:$0xff] %v1426_v8  ;;  %v1437_v10 = vadd.f32 %v1919_v9, %v2340_v30 }
 0x21e   : > { %v1428_v12 = vpop.f32.mrf.mxu1 }
 0x21f   : > { %1495 = vst [vmem:[%s2345_s14 + $0xb8] sm:$0xff] %v1437_v10  ;;  %v1429_v13 = vadd.f32 %v2340_v30, %v1428_v12 }
 0x221   : > { %1493 = vst [vmem:[%s2345_s14 + $0xa8] sm:$0xff] %v1429_v13 }
 0x228   : > { %v1922_v14 = vpop.f32.mrf.mxu1 }
 0x229   : > { %v1450_v15 = vadd.f32 %v1922_v14, %v2340_v30 }
 0x22a   : > { %v1441_v16 = vpop.f32.mrf.mxu1 }
 0x22b   : > { %1498 = vst [vmem:[%s2345_s14 + $0xd0] sm:$0xff] %v1450_v15  ;;  %v1442_v18 = vadd.f32 %v2340_v30, %v1441_v16 }
 0x22c   : > { %v1923_v19 = vpop.f32.mrf.mxu1 }
 0x22d   : > { %1496 = vst [vmem:[%s2345_s14 + $0xc0] sm:$0xff] %v1442_v18  ;;  %v1453_v20 = vadd.f32 %v1923_v19, %v2340_v30 }
 0x22e   : > { %v1444_v21 = vpop.f32.mrf.mxu1 }
 0x22f   : > { %1499 = vst [vmem:[%s2345_s14 + $0xd8] sm:$0xff] %v1453_v20  ;;  %v1445_v22 = vadd.f32 %v2340_v30, %v1444_v21 }
 0x231   : > { %1497 = vst [vmem:[%s2345_s14 + $0xc8] sm:$0xff] %v1445_v22 }
 0x238   : > { %v1926_v23 = vpop.f32.mrf.mxu1 }
 0x239   : > { %v1466_v24 = vadd.f32 %v1926_v23, %v2340_v30 }
 0x23a   : > { %v1457_v25 = vpop.f32.mrf.mxu1 }
 0x23b   : > { %1502 = vst [vmem:[%s2345_s14 + $0xf0] sm:$0xff] %v1466_v24  ;;  %v1458_v26 = vadd.f32 %v2340_v30, %v1457_v25 }
 0x23c   : > { %v1927_v27 = vpop.f32.mrf.mxu1 }
 0x23d   : > { %1500 = vst [vmem:[%s2345_s14 + $0xe0] sm:$0xff] %v1458_v26  ;;  %v1469_v28 = vadd.f32 %v1927_v27, %v2340_v30 }
 0x23e   : > { %v1460_v29 = vpop.f32.mrf.mxu1 }
 0x23f   : > { %1503 = vst [vmem:[%s2345_s14 + $0xf8] sm:$0xff] %v1469_v28  ;;  %v1461_v11 = vadd.f32 %v2340_v30, %v1460_v29 }
 0x241   : > { %1501 = vst [vmem:[%s2345_s14 + $0xe8] sm:$0xff] %v1461_v11 }
 0x242 PF: > { %s16_s23 = sadd.s32 1, %s2059_s23   ;;  %s2427_s21 = smov %s2055_s22 }
 0x243   : > { %p13_p5 = scmp.ge.s32.totalorder %s16_s23, 4   ;;  %s2428_s22 = smov %s2430_s24 }
 0x245   :  { %15 = sbr.rel (!%p13_p5) target bundleno = 2 (0x2), region = 74 }

</bundles_post_ra>
